<compile_context>
chip_gen: v6e
topology: v6e:2x2x1
jax: 0.10.0
libtpu: 0.0.40
codegen_flags: <defaults>
</compile_context>

<pallas_src>
import jax
import jax.numpy as jnp
from jax import lax
from jax.experimental import pallas as pl
from jax.experimental.pallas import tpu as pltpu

CLASS_NUM = 10
IMG_SIZE = 28
DISC_LAYERS = [1024, 512, 256]

IN_FEATURES = IMG_SIZE * IMG_SIZE + CLASS_NUM   # 794
IN_PAD = 896                                    # 7 * 128, lane-aligned input width
W4_ROWS = 16                                    # sublane-padded final weight rows (row 0 real)


def _leaky_relu(x, slope=0.2):
    return jnp.where(x > 0, x, slope * x)


def disc_mlp_kernel(x_ref,
                    w1_ref, b1_ref,
                    w2_ref, b2_ref,
                    w3_ref, b3_ref,
                    w4_ref, b4_ref,
                    out_ref):
    """Fused MLP: (TB, 896) -> 1024 -> 512 -> 256 -> sigmoid logit packed as (1, TB).

    Weights are bf16 (MXU native), accumulation + elementwise math in f32.
    """
    x = x_ref[...]                                                   # bf16 (TB, IN_PAD)

    h = jnp.dot(x, w1_ref[...], preferred_element_type=jnp.float32) + b1_ref[...]
    h = _leaky_relu(h)
    # TODO(synk): nn.Dropout(0.3) layers are identity here (eval-mode forward);
    # training-mode dropout would use pltpu.prng_seed / pltpu.prng_random_bits.

    h = jnp.dot(h.astype(jnp.bfloat16), w2_ref[...],
                preferred_element_type=jnp.float32) + b2_ref[...]
    h = _leaky_relu(h)

    h = jnp.dot(h.astype(jnp.bfloat16), w3_ref[...],
                preferred_element_type=jnp.float32) + b3_ref[...]
    h = _leaky_relu(h)                                               # f32 (TB, 256)

    # Final layer computed transposed on the MXU (NT matmul):
    #   z[j, b] = sum_k w4t[j, k] * h[b, k]   ->   (W4_ROWS, TB); row 0 is the logit.
    # This lands the per-tile logits lane-dense, so the output block is (1, TB).
    z = lax.dot_general(w4_ref[...], h.astype(jnp.bfloat16),
                        dimension_numbers=(((1,), (1,)), ((), ())),
                        preferred_element_type=jnp.float32)          # (W4_ROWS, TB)
    logit = z[0:1, :] + b4_ref[...]                                  # (1, TB)

    # sigmoid: exp + reciprocal both on the EUP slot; clip guards approx-recip overshoot.
    sig = pl.reciprocal(1.0 + jnp.exp(-logit), approx=True)
    out_ref[...] = jnp.clip(sig, 0.0, 1.0)


def _round_up(n, m):
    return ((n + m - 1) // m) * m


def _pick_batch_tile(B):
    """Batch tile: big tiles to amortize ~0.35us/step overhead, but >= 2 grid steps
    for v7x's two TensorCores when batch allows, capped at 1024 rows for VMEM."""
    if B <= 128:
        return _round_up(max(B, 16), 16)      # single tile; >=16 rows for bf16 sublane pack
    return min(1024, _round_up((B + 1) // 2, 128))


@jax.jit
def discriminator_forward(x, labels, kparams):
    """Mirrors Discriminator.forward (eval mode): flatten, embed, concat, MLP, squeeze."""
    x = x.reshape(-1, IMG_SIZE * IMG_SIZE).astype(jnp.bfloat16)      # bf16 glue (cheap pre-pass)
    B = x.shape[0]
    c = kparams["emb"][labels]                                       # bf16 (B, class_num) gather glue
    feat = jnp.concatenate([x, c], axis=1)                           # bf16 (B, 794)

    TB = _pick_batch_tile(B)
    B_pad = _round_up(B, TB)
    # single fused pad: feature lanes 794 -> 896 and batch rows B -> B_pad
    feat = jnp.pad(feat, ((0, B_pad - B), (0, IN_PAD - IN_FEATURES)))

    num_tiles = B_pad // TB
    resident = lambda i: (0, 0)     # weights/biases: same block every step -> stay VMEM-resident

    out = pl.pallas_call(
        disc_mlp_kernel,
        out_shape=jax.ShapeDtypeStruct((num_tiles, TB), jnp.float32),
        grid=(num_tiles,),
        in_specs=[
            pl.BlockSpec((TB, IN_PAD), lambda i: (i, 0)),
            pl.BlockSpec(kparams["w1"].shape, resident),
            pl.BlockSpec(kparams["b1"].shape, resident),
            pl.BlockSpec(kparams["w2"].shape, resident),
            pl.BlockSpec(kparams["b2"].shape, resident),
            pl.BlockSpec(kparams["w3"].shape, resident),
            pl.BlockSpec(kparams["b3"].shape, resident),
            pl.BlockSpec(kparams["w4"].shape, resident),
            pl.BlockSpec(kparams["b4"].shape, resident),
        ],
        out_specs=pl.BlockSpec((1, TB), lambda i: (i, 0)),
        compiler_params=pltpu.CompilerParams(
            dimension_semantics=("parallel",),
            vmem_limit_bytes=32 * 1024 * 1024,
        ),
    )(feat,
      kparams["w1"], kparams["b1"],
      kparams["w2"], kparams["b2"],
      kparams["w3"], kparams["b3"],
      kparams["w4"], kparams["b4"])

    # lane-packed logits: (num_tiles, TB) -> (B_pad,) -> (B,)   (== out.squeeze())
    return out.reshape(B_pad)[:B]


def init_params(key):
    """Deterministic synthetic parameters with the shapes implied by __init__.

    Weights stored as (in, out) — transpose of nn.Linear — so the MLP computes x @ W + b.
    """
    dims = [IN_FEATURES] + DISC_LAYERS + [1]
    keys = jax.random.split(key, 1 + 2 * (len(dims) - 1))
    params = {"emb": jax.random.normal(keys[0], (CLASS_NUM, CLASS_NUM), jnp.float32)}
    for i in range(len(dims) - 1):
        fan_in, fan_out = dims[i], dims[i + 1]
        scale = 1.0 / jnp.sqrt(jnp.float32(fan_in))
        params[f"w{i+1}"] = scale * jax.random.normal(
            keys[1 + 2 * i], (fan_in, fan_out), jnp.float32)
        params[f"b{i+1}"] = scale * jax.random.normal(
            keys[2 + 2 * i], (1, fan_out), jnp.float32)
    return params


def prepare_kernel_params(params):
    """One-time prep: lane-align shapes, cast weights (and emb) to bf16 (biases stay f32)."""
    kp = {"emb": params["emb"].astype(jnp.bfloat16)}
    # w1: pad input features 794 -> 896 with zero rows (matches zero-padded x columns).
    kp["w1"] = jnp.pad(params["w1"],
                       ((0, IN_PAD - IN_FEATURES), (0, 0))).astype(jnp.bfloat16)
    kp["b1"] = params["b1"]
    kp["w2"] = params["w2"].astype(jnp.bfloat16)
    kp["b2"] = params["b2"]
    kp["w3"] = params["w3"].astype(jnp.bfloat16)
    kp["b3"] = params["b3"]
    # w4 stored transposed (out, in) and sublane-padded 1 -> W4_ROWS rows (rows 1.. are zero);
    # the kernel contracts it against h on the feature axis so logits land lane-dense.
    kp["w4"] = jnp.pad(params["w4"].T,
                       ((0, W4_ROWS - 1), (0, 0))).astype(jnp.bfloat16)
    kp["b4"] = params["b4"]                                          # (1, 1) f32 scalar bias
    return kp


def discriminator_ref(x, labels, params):
    """Pure-JAX f32 reference (eval mode) for correctness checking."""
    x = x.reshape(-1, IMG_SIZE * IMG_SIZE).astype(jnp.float32)
    c = params["emb"][labels]
    h = jnp.concatenate([x, c], axis=1)
    h = _leaky_relu(h @ params["w1"] + params["b1"])
    h = _leaky_relu(h @ params["w2"] + params["b2"])
    h = _leaky_relu(h @ params["w3"] + params["b3"])
    h = h @ params["w4"] + params["b4"]
    return jax.nn.sigmoid(h)[:, 0]


if __name__ == "__main__":
    key = jax.random.PRNGKey(0)
    k_param, k_x, k_lab = jax.random.split(key, 3)

    params = init_params(k_param)
    kparams = prepare_kernel_params(params)

    B = 8
    x = jax.random.normal(k_x, (B, IMG_SIZE, IMG_SIZE), jnp.float32)
    labels = jax.random.randint(k_lab, (B,), 0, CLASS_NUM, jnp.int32)

    out = discriminator_forward(x, labels, kparams)
    jax.block_until_ready(out)

    assert out.shape == (B,)
    assert out.dtype == jnp.float32
    # sigmoid output must be in [0, 1]
    assert bool(jnp.all((out >= 0.0) & (out <= 1.0)))

    # compare against f32 reference (bf16 weights + approx reciprocal -> loose tolerance)
    ref = discriminator_ref(x, labels, params)
    assert bool(jnp.max(jnp.abs(out - ref)) < 5e-2)

    print("KERNEL_OK")
</pallas_src>

<mosaic_0001>
module attributes {stable_mosaic.version = 11 : i64} {
  func.func @disc_mlp_kernel(%arg0: i32, %arg1: memref<16x896xbf16, #tpu.memory_space<vmem>>, %arg2: memref<896x1024xbf16, #tpu.memory_space<vmem>>, %arg3: memref<1x1024xf32, #tpu.memory_space<vmem>>, %arg4: memref<1024x512xbf16, #tpu.memory_space<vmem>>, %arg5: memref<1x512xf32, #tpu.memory_space<vmem>>, %arg6: memref<512x256xbf16, #tpu.memory_space<vmem>>, %arg7: memref<1x256xf32, #tpu.memory_space<vmem>>, %arg8: memref<16x256xbf16, #tpu.memory_space<vmem>>, %arg9: memref<1x1xf32, #tpu.memory_space<vmem>>, %arg10: memref<1x16xf32, #tpu.memory_space<vmem>>) attributes {dimension_semantics = [#tpu.dimension_semantics<parallel>], iteration_bounds = array<i64: 1>, scalar_prefetch = 0 : i64, scratch_operands = 0 : i64, tpu.core_type = #tpu.core_type<tc>, window_params = [{transform_indices = @transform_0, window_bounds = array<i64: 16, 896>}, {pipeline_mode = #tpu.pipeline_mode<synchronous>, transform_indices = @transform_1, window_bounds = array<i64: 896, 1024>}, {pipeline_mode = #tpu.pipeline_mode<synchronous>, transform_indices = @transform_2, window_bounds = array<i64: 1, 1024>}, {pipeline_mode = #tpu.pipeline_mode<synchronous>, transform_indices = @transform_3, window_bounds = array<i64: 1024, 512>}, {pipeline_mode = #tpu.pipeline_mode<synchronous>, transform_indices = @transform_4, window_bounds = array<i64: 1, 512>}, {pipeline_mode = #tpu.pipeline_mode<synchronous>, transform_indices = @transform_5, window_bounds = array<i64: 512, 256>}, {pipeline_mode = #tpu.pipeline_mode<synchronous>, transform_indices = @transform_6, window_bounds = array<i64: 1, 256>}, {pipeline_mode = #tpu.pipeline_mode<synchronous>, transform_indices = @transform_7, window_bounds = array<i64: 16, 256>}, {pipeline_mode = #tpu.pipeline_mode<synchronous>, transform_indices = @transform_8, window_bounds = array<i64: 1, 1>}, {transform_indices = @transform_9, window_bounds = array<i64: 1, 16>}]} {
    %c0 = arith.constant 0 : index
    %c0_0 = arith.constant 0 : index
    %0 = vector.load %arg1[%c0, %c0_0] : memref<16x896xbf16, #tpu.memory_space<vmem>>, vector<16x896xbf16>
    %c0_1 = arith.constant 0 : index
    %c0_2 = arith.constant 0 : index
    %1 = vector.load %arg2[%c0_1, %c0_2] : memref<896x1024xbf16, #tpu.memory_space<vmem>>, vector<896x1024xbf16>
    %cst = arith.constant dense<0.000000e+00> : vector<16x1024xf32>
    %2 = tpu.matmul %0, %1, %cst {dimension_numbers = #tpu.dot_dimension_numbers<[1], [0], [0], [1], [0, 0, 1, 1], [], []>} : vector<16x896xbf16>, vector<896x1024xbf16>, vector<16x1024xf32> -> vector<16x1024xf32>
    %c0_3 = arith.constant 0 : index
    %c0_4 = arith.constant 0 : index
    %3 = vector.load %arg3[%c0_3, %c0_4] : memref<1x1024xf32, #tpu.memory_space<vmem>>, vector<1x1024xf32>
    %4 = vector.broadcast %3 : vector<1x1024xf32> to vector<16x1024xf32>
    %5 = arith.addf %2, %4 : vector<16x1024xf32>
    %cst_5 = arith.constant 0.000000e+00 : f32
    %6 = vector.broadcast %cst_5 : f32 to vector<16x1024xf32>
    %7 = arith.cmpf ogt, %5, %6 : vector<16x1024xf32>
    %cst_6 = arith.constant 2.000000e-01 : f32
    %8 = vector.broadcast %cst_6 : f32 to vector<16x1024xf32>
    %9 = arith.mulf %8, %5 : vector<16x1024xf32>
    %10 = arith.select %7, %5, %9 : vector<16x1024xi1>, vector<16x1024xf32>
    %11 = arith.truncf %10 : vector<16x1024xf32> to vector<16x1024xbf16>
    %c0_7 = arith.constant 0 : index
    %c0_8 = arith.constant 0 : index
    %12 = vector.load %arg4[%c0_7, %c0_8] : memref<1024x512xbf16, #tpu.memory_space<vmem>>, vector<1024x512xbf16>
    %cst_9 = arith.constant dense<0.000000e+00> : vector<16x512xf32>
    %13 = tpu.matmul %11, %12, %cst_9 {dimension_numbers = #tpu.dot_dimension_numbers<[1], [0], [0], [1], [0, 0, 1, 1], [], []>} : vector<16x1024xbf16>, vector<1024x512xbf16>, vector<16x512xf32> -> vector<16x512xf32>
    %c0_10 = arith.constant 0 : index
    %c0_11 = arith.constant 0 : index
    %14 = vector.load %arg5[%c0_10, %c0_11] : memref<1x512xf32, #tpu.memory_space<vmem>>, vector<1x512xf32>
    %15 = vector.broadcast %14 : vector<1x512xf32> to vector<16x512xf32>
    %16 = arith.addf %13, %15 : vector<16x512xf32>
    %cst_12 = arith.constant 0.000000e+00 : f32
    %17 = vector.broadcast %cst_12 : f32 to vector<16x512xf32>
    %18 = arith.cmpf ogt, %16, %17 : vector<16x512xf32>
    %cst_13 = arith.constant 2.000000e-01 : f32
    %19 = vector.broadcast %cst_13 : f32 to vector<16x512xf32>
    %20 = arith.mulf %19, %16 : vector<16x512xf32>
    %21 = arith.select %18, %16, %20 : vector<16x512xi1>, vector<16x512xf32>
    %22 = arith.truncf %21 : vector<16x512xf32> to vector<16x512xbf16>
    %c0_14 = arith.constant 0 : index
    %c0_15 = arith.constant 0 : index
    %23 = vector.load %arg6[%c0_14, %c0_15] : memref<512x256xbf16, #tpu.memory_space<vmem>>, vector<512x256xbf16>
    %cst_16 = arith.constant dense<0.000000e+00> : vector<16x256xf32>
    %24 = tpu.matmul %22, %23, %cst_16 {dimension_numbers = #tpu.dot_dimension_numbers<[1], [0], [0], [1], [0, 0, 1, 1], [], []>} : vector<16x512xbf16>, vector<512x256xbf16>, vector<16x256xf32> -> vector<16x256xf32>
    %c0_17 = arith.constant 0 : index
    %c0_18 = arith.constant 0 : index
    %25 = vector.load %arg7[%c0_17, %c0_18] : memref<1x256xf32, #tpu.memory_space<vmem>>, vector<1x256xf32>
    %26 = vector.broadcast %25 : vector<1x256xf32> to vector<16x256xf32>
    %27 = arith.addf %24, %26 : vector<16x256xf32>
    %cst_19 = arith.constant 0.000000e+00 : f32
    %28 = vector.broadcast %cst_19 : f32 to vector<16x256xf32>
    %29 = arith.cmpf ogt, %27, %28 : vector<16x256xf32>
    %cst_20 = arith.constant 2.000000e-01 : f32
    %30 = vector.broadcast %cst_20 : f32 to vector<16x256xf32>
    %31 = arith.mulf %30, %27 : vector<16x256xf32>
    %32 = arith.select %29, %27, %31 : vector<16x256xi1>, vector<16x256xf32>
    %c0_21 = arith.constant 0 : index
    %c0_22 = arith.constant 0 : index
    %33 = vector.load %arg8[%c0_21, %c0_22] : memref<16x256xbf16, #tpu.memory_space<vmem>>, vector<16x256xbf16>
    %34 = arith.truncf %32 : vector<16x256xf32> to vector<16x256xbf16>
    %cst_23 = arith.constant dense<0.000000e+00> : vector<16x16xf32>
    %35 = tpu.matmul %33, %34, %cst_23 {dimension_numbers = #tpu.dot_dimension_numbers<[1], [1], [0], [0], [0, 0, 1, 0], [], []>} : vector<16x256xbf16>, vector<16x256xbf16>, vector<16x16xf32> -> vector<16x16xf32>
    %36 = vector.extract_strided_slice %35 {offsets = [0, 0], sizes = [1, 16], strides = [1, 1]} : vector<16x16xf32> to vector<1x16xf32>
    %c0_24 = arith.constant 0 : index
    %c0_25 = arith.constant 0 : index
    %37 = vector.load %arg9[%c0_24, %c0_25] : memref<1x1xf32, #tpu.memory_space<vmem>>, vector<1x1xf32>
    %38 = vector.broadcast %37 : vector<1x1xf32> to vector<1x16xf32>
    %39 = arith.addf %36, %38 : vector<1x16xf32>
    %cst_26 = arith.constant 0.000000e+00 : f32
    %40 = vector.broadcast %cst_26 : f32 to vector<1x16xf32>
    %41 = arith.subf %40, %39 : vector<1x16xf32>
    %42 = math.exp %41 : vector<1x16xf32>
    %cst_27 = arith.constant 1.000000e+00 : f32
    %43 = vector.broadcast %cst_27 : f32 to vector<1x16xf32>
    %44 = arith.addf %43, %42 : vector<1x16xf32>
    %45 = tpu.reciprocal %44 {approx = true} : vector<1x16xf32> -> vector<1x16xf32>
    %cst_28 = arith.constant 0.000000e+00 : f32
    %cst_29 = arith.constant 1.000000e+00 : f32
    %46 = vector.broadcast %cst_28 : f32 to vector<1x16xf32>
    %47 = arith.maximumf %46, %45 : vector<1x16xf32>
    %48 = vector.broadcast %cst_29 : f32 to vector<1x16xf32>
    %49 = arith.minimumf %48, %47 : vector<1x16xf32>
    %c0_30 = arith.constant 0 : index
    %c0_31 = arith.constant 0 : index
    %50 = vector.load %arg10[%c0_30, %c0_31] : memref<1x16xf32, #tpu.memory_space<vmem>>, vector<1x16xf32>
    tpu.vector_store %arg10[%c0_30, %c0_31], %49 {strides = array<i32>} : memref<1x16xf32, #tpu.memory_space<vmem>>, vector<1x16xf32>,
    return
  }
  func.func @transform_0(%arg0: i32) -> (i32, i32) {
    %c0_i32 = arith.constant 0 : i32
    %c0_i32_0 = arith.constant 0 : i32
    return %arg0, %c0_i32 : i32, i32
  }
  func.func @transform_1(%arg0: i32) -> (i32, i32) {
    %c0_i32 = arith.constant 0 : i32
    %c0_i32_0 = arith.constant 0 : i32
    %c0_i32_1 = arith.constant 0 : i32
    return %c0_i32, %c0_i32_0 : i32, i32
  }
  func.func @transform_2(%arg0: i32) -> (i32, i32) {
    %c0_i32 = arith.constant 0 : i32
    %c0_i32_0 = arith.constant 0 : i32
    %c0_i32_1 = arith.constant 0 : i32
    return %c0_i32, %c0_i32_0 : i32, i32
  }
  func.func @transform_3(%arg0: i32) -> (i32, i32) {
    %c0_i32 = arith.constant 0 : i32
    %c0_i32_0 = arith.constant 0 : i32
    %c0_i32_1 = arith.constant 0 : i32
    return %c0_i32, %c0_i32_0 : i32, i32
  }
  func.func @transform_4(%arg0: i32) -> (i32, i32) {
    %c0_i32 = arith.constant 0 : i32
    %c0_i32_0 = arith.constant 0 : i32
    %c0_i32_1 = arith.constant 0 : i32
    return %c0_i32, %c0_i32_0 : i32, i32
  }
  func.func @transform_5(%arg0: i32) -> (i32, i32) {
    %c0_i32 = arith.constant 0 : i32
    %c0_i32_0 = arith.constant 0 : i32
    %c0_i32_1 = arith.constant 0 : i32
    return %c0_i32, %c0_i32_0 : i32, i32
  }
  func.func @transform_6(%arg0: i32) -> (i32, i32) {
    %c0_i32 = arith.constant 0 : i32
    %c0_i32_0 = arith.constant 0 : i32
    %c0_i32_1 = arith.constant 0 : i32
    return %c0_i32, %c0_i32_0 : i32, i32
  }
  func.func @transform_7(%arg0: i32) -> (i32, i32) {
    %c0_i32 = arith.constant 0 : i32
    %c0_i32_0 = arith.constant 0 : i32
    %c0_i32_1 = arith.constant 0 : i32
    return %c0_i32, %c0_i32_0 : i32, i32
  }
  func.func @transform_8(%arg0: i32) -> (i32, i32) {
    %c0_i32 = arith.constant 0 : i32
    %c0_i32_0 = arith.constant 0 : i32
    %c0_i32_1 = arith.constant 0 : i32
    return %c0_i32, %c0_i32_0 : i32, i32
  }
  func.func @transform_9(%arg0: i32) -> (i32, i32) {
    %c0_i32 = arith.constant 0 : i32
    %c0_i32_0 = arith.constant 0 : i32
    return %arg0, %c0_i32 : i32, i32
  }
}

</mosaic_0001>

<bundles_post_ra>
// kernel: discriminator_forward.1
= control target key start
LH: loop header
LB: loop body
LE: loop exit
PB: predicated region body
PF: predicated region fallthrough
CT: control target
= control target key end

     0   :  { %s7932_s0 = inlined_call_operand.vmem [shape: bf16[16,896], index: 0, kind: input, shape index: {}]   ;;  %s7933_s1 = inlined_call_operand.hbm [shape: bf16[896,1024], index: 1, kind: input, shape index: {}]   ;;  %s7934_s2 = inlined_call_operand.hbm [shape: f32[1,1024], index: 2, kind: input, shape index: {}]   ;;  %s7935_s3 = inlined_call_operand.hbm [shape: bf16[1024,512], index: 3, kind: input, shape index: {}]   ;;  %s7936_s4 = inlined_call_operand.hbm [shape: f32[1,512], index: 4, kind: input, shape index: {}]   ;;  %s7937_s5 = inlined_call_operand.hbm [shape: bf16[512,256], index: 5, kind: input, shape index: {}]   ;;  %s7938_s6 = inlined_call_operand.hbm [shape: f32[1,256], index: 6, kind: input, shape index: {}]   ;;  %s7939_s7 = inlined_call_operand.hbm [shape: bf16[16,256], index: 7, kind: input, shape index: {}]   ;;  %s7940_s8 = inlined_call_operand.<no memory space> [shape: f32[1,1], index: 8, kind: input, shape index: {}]   ;;  %s7941_s9 = inlined_call_operand.vmem [shape: f32[1,16], index: 9, kind: output, shape index: {}]  }
   0x1   :  { %v14_v0 = vstv %s7940_s8 }
   0x2   :  { %15 = vst [vmem:[#allocation2] sm:$0x1] %v14_v0 }
   0x3   :  { %16 = vsyncpa [#allocation4], 0 }
   0x4   :  { %17 = vsyncpa [#allocation6], 0 }
   0x5   :  { %18 = vsyncpa [#allocation9], 0 }
   0x6   :  { %19 = vsyncpa [#allocation12], 0  ;;  %s7596_s11 = smov [#allocation5]   ;;  %s7597_s13 = smov [#allocation8]  }
   0x7   :  { %s40_s12 = sshll.u32 %s7596_s11, 4  ;;  %s62_s14 = sshll.u32 %s7597_s13, 4  ;;  %s41_s12 = int_to_ptr.vmem [resolvable:$true] %s40_s12  ;;  %s63_s14 = int_to_ptr.vmem [resolvable:$true] %s62_s14 }
   0x8   :  { %s7456_s15 = scalar_lea.vmem %s41_s12, 128  ;;  %p7461_p1 = scmp.lt.s32.totalorder %s41_s12, %s41_s12 }
   0x9   :  { %p7457_p0 = scmp.ne.s32.totalorder %s41_s12, %s7456_s15  ;;  %p7462_p2 = scmp.lt.s32.totalorder %s7456_s15, %s7456_s15 }
   0xb   :  { %p7463_p3 = por %p7462_p2, %p7461_p1 }
   0xd   :  { %p7464_p4 = pnand %p7463_p3, %p7457_p0 }
   0xf   :  { %7467 = shalt.err (!%p7464_p4)
}
  0x10   :  { %43 = dma.hbm_to_vmem [thread:$0]  %s7934_s2, 128, %s41_s12, [#allocation6]  }
  0x11   :  { %s7476_s17 = scalar_lea.vmem %s63_s14, 64  ;;  %p7481_p6 = scmp.lt.s32.totalorder %s63_s14, %s63_s14 }
  0x12   :  { %p7477_p5 = scmp.ne.s32.totalorder %s63_s14, %s7476_s17  ;;  %p7482_p7 = scmp.lt.s32.totalorder %s7476_s17, %s7476_s17 }
  0x14   :  { %p7483_p8 = por %p7482_p7, %p7481_p6 }
  0x16   :  { %p7484_p9 = pnand %p7483_p8, %p7477_p5 }
  0x18   :  { %7487 = shalt.err (!%p7484_p9)
}
  0x19   :  { %65 = dma.hbm_to_vmem [thread:$0]  %s7936_s4, 64, %s63_s14, [#allocation9]  }
  0x1a   :  { %s7598_s20 = smov [#allocation11]   ;;  %s7599_s22 = smov [#allocation3]  }
  0x1b   :  { %s84_s21 = sshll.u32 %s7598_s20, 4  ;;  %s27_s23 = sshll.u32 %s7599_s22, 4  ;;  %s85_s21 = int_to_ptr.vmem [resolvable:$true] %s84_s21  ;;  %s28_s23 = int_to_ptr.vmem [resolvable:$true] %s27_s23 }
  0x1c   :  { %s7496_s24 = scalar_lea.vmem %s85_s21, 32  ;;  %p7501_p11 = scmp.lt.s32.totalorder %s85_s21, %s85_s21 }
  0x1d   :  { %p7497_p10 = scmp.ne.s32.totalorder %s85_s21, %s7496_s24  ;;  %p7502_p12 = scmp.lt.s32.totalorder %s7496_s24, %s7496_s24 }
  0x1f   :  { %p7503_p13 = por %p7502_p12, %p7501_p11 }
  0x21   :  { %p7504_p0 = pnand %p7503_p13, %p7497_p10 }
  0x23   :  { %7507 = shalt.err (!%p7504_p0)
}
  0x24   :  { %87 = dma.hbm_to_vmem [thread:$0]  %s7938_s6, 32, %s85_s21, [#allocation12]  }
  0x25   :  { %s7516_s26 = scalar_lea.vmem %s28_s23, 57344  ;;  %p7521_p2 = scmp.lt.s32.totalorder %s28_s23, %s28_s23 }
  0x26   :  { %p7517_p1 = scmp.ne.s32.totalorder %s28_s23, %s7516_s26  ;;  %p7522_p3 = scmp.lt.s32.totalorder %s7516_s26, %s7516_s26 }
  0x28   :  { %p7523_p4 = por %p7522_p3, %p7521_p2 }
  0x2a   :  { %p7524_p5 = pnand %p7523_p4, %p7517_p1 }
  0x2c   :  { %7527 = shalt.err (!%p7524_p5)
}
  0x2d   :  { %s7600_s4 = smov 512   ;;  %s7601_s27 = smov 32  }
  0x2e   :  { %33 = dma.hbm_to_vmem [thread:$0]  %s7933_s1, 57344, %s28_s23, [#allocation4], %s7600_s4, %s7600_s4, %s7601_s27  }
  0x2f   :  { %s7602_s30 = smov [#allocation7]  }
  0x30   :  { %s49_s10 = sshll.u32 %s7602_s30, 4  ;;  %s50_s10 = int_to_ptr.vmem [resolvable:$true] %s49_s10 }
  0x31   :  { %s7536_s11 = scalar_lea.vmem %s50_s10, 32768  ;;  %p7541_p7 = scmp.lt.s32.totalorder %s50_s10, %s50_s10 }
  0x32   :  { %p7537_p6 = scmp.ne.s32.totalorder %s50_s10, %s7536_s11  ;;  %p7542_p8 = scmp.lt.s32.totalorder %s7536_s11, %s7536_s11 }
  0x34   :  { %p7543_p9 = por %p7542_p8, %p7541_p7 }
  0x36   :  { %p7544_p10 = pnand %p7543_p9, %p7537_p6 }
  0x38   :  { %7547 = shalt.err (!%p7544_p10)
}
  0x39   :  { %s7603_s6 = smov 256   ;;  %s7604_s12 = smov 16  }
  0x3a   :  { %55 = dma.hbm_to_vmem [thread:$0]  %s7935_s3, 32768, %s50_s10, [#allocation6], %s7603_s6, %s7603_s6, %s7604_s12  }
  0x3b   :  { %s7605_s15 = smov [#allocation10]  }
  0x3c   :  { %s71_s16 = sshll.u32 %s7605_s15, 4  ;;  %s72_s16 = int_to_ptr.vmem [resolvable:$true] %s71_s16 }
  0x3d   :  { %s7556_s1 = scalar_lea.vmem %s72_s16, 8192  ;;  %p7561_p12 = scmp.lt.s32.totalorder %s72_s16, %s72_s16 }
  0x3e   :  { %p7557_p11 = scmp.ne.s32.totalorder %s72_s16, %s7556_s1  ;;  %p7562_p13 = scmp.lt.s32.totalorder %s7556_s1, %s7556_s1 }
  0x40   :  { %p7563_p0 = por %p7562_p13, %p7561_p12 }
  0x42   :  { %p7564_p1 = pnand %p7563_p0, %p7557_p11 }
  0x44   :  { %7567 = shalt.err (!%p7564_p1)
}
  0x45   :  { %s7606_s8 = smov 128   ;;  %s7607_s17 = smov 8  }
  0x46   :  { %77 = dma.hbm_to_vmem [thread:$0]  %s7937_s5, 8192, %s72_s16, [#allocation9], %s7606_s8, %s7606_s8, %s7607_s17  }
  0x47   :  { %s7608_s20 = smov [#allocation13]  }
  0x48   :  { %s93_s21 = sshll.u32 %s7608_s20, 4  ;;  %s94_s21 = int_to_ptr.vmem [resolvable:$true] %s93_s21 }
  0x49   :  { %s7576_s3 = scalar_lea.vmem %s94_s21, 256  ;;  %p7581_p3 = scmp.lt.s32.totalorder %s94_s21, %s94_s21 }
  0x4a   :  { %p7577_p2 = scmp.ne.s32.totalorder %s94_s21, %s7576_s3  ;;  %p7582_p4 = scmp.lt.s32.totalorder %s7576_s3, %s7576_s3 }
  0x4c   :  { %p7583_p5 = por %p7582_p4, %p7581_p3 }
  0x4e   :  { %p7584_p6 = pnand %p7583_p5, %p7577_p2 }
  0x50   :  { %7587 = shalt.err (!%p7584_p6)
}
  0x51   :  { %99 = dma.hbm_to_vmem [thread:$0]  %s7939_s7, 256, %s94_s21, [#allocation12], %s7606_s8, %s7606_s8, %s7607_s17  }
  0x52   :  { %7588 = dma.done.wait [#allocation4], 57344  }
  0x53   :  { %7589 = vsyncadd [#allocation4], 4294909952 }
  0x54   :  { %7590 = dma.done.wait [#allocation6], 32896  }
  0x55   :  { %7591 = vsyncadd [#allocation6], 4294934400 }
  0x56   :  { %7592 = dma.done.wait [#allocation9], 8256  }
  0x57   :  { %7593 = vsyncadd [#allocation9], 4294959040 }
  0x58   :  { %7594 = dma.done.wait [#allocation12], 288  }
  0x59   :  { %7595 = vsyncadd [#allocation12], 4294967008  ;;  %v7609_v1 = vmov 0   ;;  %v188_v2 = vld [vmem:[#allocation3 + $0x1c0] sm:$0xff] }
  0x5a   :  { %6939 = vset.pattern.permute.xlu0 %v7609_v1  ;;  %v192_v3 = vld [vmem:[#allocation3 + $0x1e0] sm:$0xff] }
  0x5b   :  { %v316_v4 = vld [vmem:[#allocation3 + $0x5c0] sm:$0xff]  ;;  %v6212_v5 = vcombine.high %v188_v2, %v192_v3  ;;  %v6211_v7 = vcombine.low %v188_v2, %v192_v3 }
  0x5c   :  { %v320_v6 = vld [vmem:[#allocation3 + $0x5e0] sm:$0xff] }
  0x5d   :  { %v180_v8 = vld [vmem:[#allocation3 + $0x180] sm:$0xff]  ;;  %v6340_v10 = vcombine.high %v316_v4, %v320_v6  ;;  %v6339_v11 = vcombine.low %v316_v4, %v320_v6  ;;  %2898 = vmatprep.subr.bf16.mxu0 %v6212_v5 }
  0x5e   :  { %v184_v9 = vld [vmem:[#allocation3 + $0x1a0] sm:$0xff]  ;;  %2899 = vmatpush1.bf16.msra.mxu0 %v6211_v7 }
  0x5f   :  { %v6204_v12 = vcombine.high %v180_v8, %v184_v9  ;;  %v308_v13 = vld [vmem:[#allocation3 + $0x580] sm:$0xff]  ;;  %2941 = vmatprep.subr.bf16.mxu1 %v6340_v10  ;;  %v6203_v20 = vcombine.low %v180_v8, %v184_v9 }
  0x60   :  { %v312_v14 = vld [vmem:[#allocation3 + $0x5a0] sm:$0xff]  ;;  %2942 = vmatpush1.bf16.msra.mxu1 %v6339_v11 }
  0x61   :  { %v172_v15 = vld [vmem:[#allocation3 + $0x140] sm:$0xff]  ;;  %v6332_v16 = vcombine.high %v308_v13, %v312_v14  ;;  %2900 = vmatprep.subr.bf16.mxu0 %v6204_v12  ;;  %v6331_v21 = vcombine.low %v308_v13, %v312_v14 }
  0x62   :  { %v176_v17 = vld [vmem:[#allocation3 + $0x160] sm:$0xff]  ;;  %2901 = vmatpush1.bf16.msra.mxu0 %v6203_v20 }
  0x63   :  { %v300_v18 = vld [vmem:[#allocation3 + $0x540] sm:$0xff]  ;;  %v6196_v22 = vcombine.high %v172_v15, %v176_v17  ;;  %2943 = vmatprep.subr.bf16.mxu1 %v6332_v16  ;;  %v6195_v28 = vcombine.low %v172_v15, %v176_v17 }
  0x64   :  { %v304_v19 = vld [vmem:[#allocation3 + $0x560] sm:$0xff]  ;;  %2944 = vmatpush1.bf16.msra.mxu1 %v6331_v21 }
  0x65   :  { %v6324_v23 = vcombine.high %v300_v18, %v304_v19  ;;  %v164_v24 = vld [vmem:[#allocation3 + $0x100] sm:$0xff]  ;;  %2902 = vmatprep.subr.bf16.mxu0 %v6196_v22  ;;  %v6323_v29 = vcombine.low %v300_v18, %v304_v19 }
  0x66   :  { %v168_v25 = vld [vmem:[#allocation3 + $0x120] sm:$0xff]  ;;  %2903 = vmatpush1.bf16.msra.mxu0 %v6195_v28 }
  0x67   :  { %v292_v26 = vld [vmem:[#allocation3 + $0x500] sm:$0xff]  ;;  %v6188_v30 = vcombine.high %v164_v24, %v168_v25  ;;  %2945 = vmatprep.subr.bf16.mxu1 %v6324_v23  ;;  %v6187_v36 = vcombine.low %v164_v24, %v168_v25 }
  0x68   :  { %v296_v27 = vld [vmem:[#allocation3 + $0x520] sm:$0xff]  ;;  %2946 = vmatpush1.bf16.msra.mxu1 %v6323_v29 }
  0x69   :  { %v6316_v31 = vcombine.high %v292_v26, %v296_v27  ;;  %v156_v32 = vld [vmem:[#allocation3 + $0xc0] sm:$0xff]  ;;  %2904 = vmatprep.subr.bf16.mxu0 %v6188_v30  ;;  %v6315_v37 = vcombine.low %v292_v26, %v296_v27 }
  0x6a   :  { %v160_v33 = vld [vmem:[#allocation3 + $0xe0] sm:$0xff]  ;;  %2905 = vmatpush1.bf16.msra.mxu0 %v6187_v36 }
  0x6b   :  { %v284_v34 = vld [vmem:[#allocation3 + $0x4c0] sm:$0xff]  ;;  %v6180_v38 = vcombine.high %v156_v32, %v160_v33  ;;  %2947 = vmatprep.subr.bf16.mxu1 %v6316_v31  ;;  %v6179_v44 = vcombine.low %v156_v32, %v160_v33 }
  0x6c   :  { %v288_v35 = vld [vmem:[#allocation3 + $0x4e0] sm:$0xff]  ;;  %2948 = vmatpush1.bf16.msra.mxu1 %v6315_v37 }
  0x6d   :  { %v6308_v39 = vcombine.high %v284_v34, %v288_v35  ;;  %v148_v40 = vld [vmem:[#allocation3 + $0x80] sm:$0xff]  ;;  %2906 = vmatprep.subr.bf16.mxu0 %v6180_v38  ;;  %v6307_v45 = vcombine.low %v284_v34, %v288_v35 }
  0x6e   :  { %v152_v41 = vld [vmem:[#allocation3 + $0xa0] sm:$0xff]  ;;  %2907 = vmatpush1.bf16.msra.mxu0 %v6179_v44 }
  0x6f   :  { %v276_v42 = vld [vmem:[#allocation3 + $0x480] sm:$0xff]  ;;  %v6172_v46 = vcombine.high %v148_v40, %v152_v41  ;;  %2949 = vmatprep.subr.bf16.mxu1 %v6308_v39  ;;  %v6171_v52 = vcombine.low %v148_v40, %v152_v41 }
  0x70   :  { %v280_v43 = vld [vmem:[#allocation3 + $0x4a0] sm:$0xff]  ;;  %2950 = vmatpush1.bf16.msra.mxu1 %v6307_v45 }
  0x71   :  { %v6300_v47 = vcombine.high %v276_v42, %v280_v43  ;;  %v140_v48 = vld [vmem:[#allocation3 + $0x40] sm:$0xff]  ;;  %2908 = vmatprep.subr.bf16.mxu0 %v6172_v46  ;;  %v6299_v54 = vcombine.low %v276_v42, %v280_v43 }
  0x72   :  { %v144_v49 = vld [vmem:[#allocation3 + $0x60] sm:$0xff]  ;;  %2909 = vmatpush1.bf16.msra.mxu0 %v6171_v52 }
  0x73   :  { %v268_v50 = vld [vmem:[#allocation3 + $0x440] sm:$0xff]  ;;  %v6164_v55 = vcombine.high %v140_v48, %v144_v49  ;;  %2951 = vmatprep.subr.bf16.mxu1 %v6300_v47  ;;  %v6163_v62 = vcombine.low %v140_v48, %v144_v49 }
  0x74   :  { %v272_v51 = vld [vmem:[#allocation3 + $0x460] sm:$0xff]  ;;  %2952 = vmatpush1.bf16.msra.mxu1 %v6299_v54 }
  0x75   :  { %v132_v53 = vld [vmem:[#allocation3] sm:$0xff]  ;;  %v6292_v57 = vcombine.high %v268_v50, %v272_v51  ;;  %2910 = vmatprep.subr.bf16.mxu0 %v6164_v55  ;;  %v6291_v63 = vcombine.low %v268_v50, %v272_v51 }
  0x76   :  { %v136_v56 = vld [vmem:[#allocation3 + $0x20] sm:$0xff]  ;;  %2911 = vmatpush1.bf16.msra.mxu0 %v6163_v62 }
  0x77   :  { %v7688_v58 = vld [vmem:[%s7932_s0 + $0x4] ss:$28 sps:$4 sm:$0xff]   ;;  %v7693_v61 = vld [vmem:[%s7932_s0 + $0xc] ss:$28 sps:$4 sm:$0xff]   ;;  %v6156_v0 = vcombine.high %v132_v53, %v136_v56  ;;  %2953 = vmatprep.subr.bf16.mxu1 %v6292_v57  ;;  %v6155_v7 = vcombine.low %v132_v53, %v136_v56 }
  0x78   :  { %v260_v59 = vld [vmem:[#allocation3 + $0x400] sm:$0xff]  ;;  %2930 = vmatprep.mubr.bf16.mxu0 %v7688_v58  ;;  %2973 = vmatprep.mubr.bf16.mxu1 %v7693_v61 }
  0x79   :  { %v264_v60 = vld [vmem:[#allocation3 + $0x420] sm:$0xff]  ;;  %2954 = vmatpush1.bf16.msra.mxu1 %v6291_v63  ;;  %2912 = vmatprep.subr.bf16.mxu0 %v6156_v0 }
  0x7a   :  { %v6284_v2 = vcombine.high %v260_v59, %v264_v60  ;;  %v252_v3 = vld [vmem:[#allocation3 + $0x3c0] sm:$0xff]  ;;  %v6283_v8 = vcombine.low %v260_v59, %v264_v60  ;;  %2913 = vmatpush1.bf16.msra.mxu0 %v6155_v7 }
  0x7b   :  { %v256_v4 = vld [vmem:[#allocation3 + $0x3e0] sm:$0xff] }
  0x7c   :  { %v380_v5 = vld [vmem:[#allocation3 + $0x7c0] sm:$0xff]  ;;  %v6276_v9 = vcombine.high %v252_v3, %v256_v4  ;;  %2955 = vmatprep.subr.bf16.mxu1 %v6284_v2  ;;  %v6275_v15 = vcombine.low %v252_v3, %v256_v4 }
  0x7d   :  { %v384_v6 = vld [vmem:[#allocation3 + $0x7e0] sm:$0xff]  ;;  %2956 = vmatpush1.bf16.msra.mxu1 %v6283_v8 }
  0x7e   :  { %v6404_v10 = vcombine.high %v380_v5, %v384_v6  ;;  %v244_v11 = vld [vmem:[#allocation3 + $0x380] sm:$0xff]  ;;  %2914 = vmatprep.subr.bf16.mxu0 %v6276_v9  ;;  %v6403_v16 = vcombine.low %v380_v5, %v384_v6 }
  0x7f   :  { %v248_v12 = vld [vmem:[#allocation3 + $0x3a0] sm:$0xff]  ;;  %2915 = vmatpush2.bf16.msra.mxu0 %v6275_v15 }
  0x80   :  { %v372_v13 = vld [vmem:[#allocation3 + $0x780] sm:$0xff]  ;;  %v6268_v17 = vcombine.high %v244_v11, %v248_v12  ;;  %2957 = vmatprep.subr.bf16.mxu1 %v6404_v10  ;;  %v6267_v23 = vcombine.low %v244_v11, %v248_v12 }
  0x81   :  { %v376_v14 = vld [vmem:[#allocation3 + $0x7a0] sm:$0xff]  ;;  %2958 = vmatpush2.bf16.msra.mxu1 %v6403_v16 }
  0x82   :  { %v6396_v18 = vcombine.high %v372_v13, %v376_v14  ;;  %v236_v19 = vld [vmem:[#allocation3 + $0x340] sm:$0xff]  ;;  %2916 = vmatprep.subr.bf16.mxu0 %v6268_v17  ;;  %v6395_v24 = vcombine.low %v372_v13, %v376_v14 }
  0x83   :  { %v240_v20 = vld [vmem:[#allocation3 + $0x360] sm:$0xff]  ;;  %2917 = vmatpush2.bf16.msra.mxu0 %v6267_v23 }
  0x84   :  { %v364_v21 = vld [vmem:[#allocation3 + $0x740] sm:$0xff]  ;;  %v6260_v25 = vcombine.high %v236_v19, %v240_v20  ;;  %2959 = vmatprep.subr.bf16.mxu1 %v6396_v18  ;;  %v6259_v31 = vcombine.low %v236_v19, %v240_v20 }
  0x85   :  { %v368_v22 = vld [vmem:[#allocation3 + $0x760] sm:$0xff]  ;;  %2960 = vmatpush2.bf16.msra.mxu1 %v6395_v24 }
  0x86   :  { %v6388_v26 = vcombine.high %v364_v21, %v368_v22  ;;  %v228_v27 = vld [vmem:[#allocation3 + $0x300] sm:$0xff]  ;;  %2918 = vmatprep.subr.bf16.mxu0 %v6260_v25  ;;  %v6387_v32 = vcombine.low %v364_v21, %v368_v22 }
  0x87   :  { %v232_v28 = vld [vmem:[#allocation3 + $0x320] sm:$0xff]  ;;  %2919 = vmatpush2.bf16.msra.mxu0 %v6259_v31 }
  0x88   :  { %v356_v29 = vld [vmem:[#allocation3 + $0x700] sm:$0xff]  ;;  %v6252_v33 = vcombine.high %v228_v27, %v232_v28  ;;  %2961 = vmatprep.subr.bf16.mxu1 %v6388_v26  ;;  %v6251_v39 = vcombine.low %v228_v27, %v232_v28  ;;  %v7709_v28 = vld [vmem:[%s7932_s0 + $0x14] ss:$28 sps:$4 sm:$0xff]  }
  0x89   :  { %v360_v30 = vld [vmem:[#allocation3 + $0x720] sm:$0xff]  ;;  %2962 = vmatpush2.bf16.msra.mxu1 %v6387_v32 }
  0x8a   :  { %v6380_v34 = vcombine.high %v356_v29, %v360_v30  ;;  %v220_v35 = vld [vmem:[#allocation3 + $0x2c0] sm:$0xff]  ;;  %2920 = vmatprep.subr.bf16.mxu0 %v6252_v33  ;;  %v6379_v40 = vcombine.low %v356_v29, %v360_v30 }
  0x8b   :  { %v224_v36 = vld [vmem:[#allocation3 + $0x2e0] sm:$0xff]  ;;  %2921 = vmatpush2.bf16.msra.mxu0 %v6251_v39 }
  0x8c   :  { %v348_v37 = vld [vmem:[#allocation3 + $0x6c0] sm:$0xff]  ;;  %v6244_v41 = vcombine.high %v220_v35, %v224_v36  ;;  %2963 = vmatprep.subr.bf16.mxu1 %v6380_v34  ;;  %v6243_v47 = vcombine.low %v220_v35, %v224_v36 }
  0x8d   :  { %v352_v38 = vld [vmem:[#allocation3 + $0x6e0] sm:$0xff]  ;;  %2964 = vmatpush2.bf16.msra.mxu1 %v6379_v40 }
  0x8e   :  { %v212_v42 = vld [vmem:[#allocation3 + $0x280] sm:$0xff]  ;;  %v6372_v43 = vcombine.high %v348_v37, %v352_v38  ;;  %2922 = vmatprep.subr.bf16.mxu0 %v6244_v41  ;;  %v6371_v48 = vcombine.low %v348_v37, %v352_v38 }
  0x8f   :  { %v216_v44 = vld [vmem:[#allocation3 + $0x2a0] sm:$0xff]  ;;  %2923 = vmatpush2.bf16.msra.mxu0 %v6243_v47 }
  0x90   :  { %v340_v45 = vld [vmem:[#allocation3 + $0x680] sm:$0xff]  ;;  %v6236_v49 = vcombine.high %v212_v42, %v216_v44  ;;  %2965 = vmatprep.subr.bf16.mxu1 %v6372_v43  ;;  %v6235_v55 = vcombine.low %v212_v42, %v216_v44 }
  0x91   :  { %v344_v46 = vld [vmem:[#allocation3 + $0x6a0] sm:$0xff]  ;;  %2966 = vmatpush2.bf16.msra.mxu1 %v6371_v48 }
  0x92   :  { %v6364_v50 = vcombine.high %v340_v45, %v344_v46  ;;  %v204_v51 = vld [vmem:[#allocation3 + $0x240] sm:$0xff]  ;;  %2924 = vmatprep.subr.bf16.mxu0 %v6236_v49  ;;  %v6363_v56 = vcombine.low %v340_v45, %v344_v46 }
  0x93   :  { %v208_v52 = vld [vmem:[#allocation3 + $0x260] sm:$0xff]  ;;  %2925 = vmatpush2.bf16.msra.mxu0 %v6235_v55 }
  0x94   :  { %v332_v53 = vld [vmem:[#allocation3 + $0x640] sm:$0xff]  ;;  %v6228_v57 = vcombine.high %v204_v51, %v208_v52  ;;  %2967 = vmatprep.subr.bf16.mxu1 %v6364_v50  ;;  %v6227_v2 = vcombine.low %v204_v51, %v208_v52 }
  0x95   :  { %v336_v54 = vld [vmem:[#allocation3 + $0x660] sm:$0xff]  ;;  %2968 = vmatpush2.bf16.msra.mxu1 %v6363_v56 }
  0x96   :  { %v6356_v59 = vcombine.high %v332_v53, %v336_v54  ;;  %v196_v60 = vld [vmem:[#allocation3 + $0x200] sm:$0xff]  ;;  %2926 = vmatprep.subr.bf16.mxu0 %v6228_v57  ;;  %v6355_v3 = vcombine.low %v332_v53, %v336_v54 }
  0x97   :  { %v200_v62 = vld [vmem:[#allocation3 + $0x220] sm:$0xff]  ;;  %2927 = vmatpush2.bf16.msra.mxu0 %v6227_v2 }
  0x98   :  { %v324_v63 = vld [vmem:[#allocation3 + $0x600] sm:$0xff]  ;;  %v6220_v4 = vcombine.high %v196_v60, %v200_v62  ;;  %2969 = vmatprep.subr.bf16.mxu1 %v6356_v59  ;;  %v6219_v10 = vcombine.low %v196_v60, %v200_v62 }
  0x99   :  { %v328_v0 = vld [vmem:[#allocation3 + $0x620] sm:$0xff]  ;;  %2970 = vmatpush2.bf16.msra.mxu1 %v6355_v3 }
  0x9a   :  { %v6348_v5 = vcombine.high %v324_v63, %v328_v0  ;;  %v444_v6 = vld [vmem:[#allocation3 + $0x9c0] sm:$0xff]  ;;  %2928 = vmatprep.subr.bf16.mxu0 %v6220_v4  ;;  %v6347_v11 = vcombine.low %v324_v63, %v328_v0 }
  0x9b   :  { %v448_v7 = vld [vmem:[#allocation3 + $0x9e0] sm:$0xff]  ;;  %2929 = vmatpush2.bf16.msra.mxu0 %v6219_v10 }
  0x9c   :  { %v572_v8 = vld [vmem:[#allocation3 + $0xdc0] sm:$0xff]  ;;  %v6468_v12 = vcombine.high %v444_v6, %v448_v7  ;;  %2971 = vmatprep.subr.bf16.mxu1 %v6348_v5  ;;  %v6467_v20 = vcombine.low %v444_v6, %v448_v7 }
  0x9d   :  { %v576_v9 = vld [vmem:[#allocation3 + $0xde0] sm:$0xff]  ;;  %2972 = vmatpush2.bf16.msra.mxu1 %v6347_v11 }
  0x9e   :  { %v6596_v13 = vcombine.high %v572_v8, %v576_v9  ;;  %v436_v14 = vld [vmem:[#allocation3 + $0x980] sm:$0xff]  ;;  %2984 = vmatprep.subr.bf16.mxu0 %v6468_v12  ;;  %v6595_v21 = vcombine.low %v572_v8, %v576_v9 }
  0x9f   :  { %v440_v15 = vld [vmem:[#allocation3 + $0x9a0] sm:$0xff] }
  0xa0   :  { %v7700_v16 = vld [vmem:[%s7932_s0] ss:$28 sps:$4 sm:$0xff]   ;;  %v6945_v19 = vld [vmem:[%s7932_s0 + $0x8] ss:$28 sps:$4 sm:$0xff]   ;;  %v6460_v22 = vcombine.high %v436_v14, %v440_v15  ;;  %3027 = vmatprep.subr.bf16.mxu1 %v6596_v13  ;;  %v6459_v29 = vcombine.low %v436_v14, %v440_v15 }
  0xa1   :  { %v564_v17 = vld [vmem:[#allocation3 + $0xd80] sm:$0xff]  ;;  %2931 = vmatmul.mubr.bf16.vlgmr.msra.gmra.mxu0 %v7700_v16  ;;  %2974 = vmatmul.mubr.bf16.vlgmr.msra.gmra.mxu1 %v6945_v19  ;;  %v189_v13 = vld [vmem:[#allocation3 + $0x1c8] sm:$0xff] }
  0xa2   :  { %v568_v18 = vld [vmem:[#allocation3 + $0xda0] sm:$0xff]  ;;  %2985 = vmatpush1.bf16.msra.mxu0 %v6467_v20  ;;  %3028 = vmatpush1.bf16.msra.mxu1 %v6595_v21  ;;  %v193_v15 = vld [vmem:[#allocation3 + $0x1e8] sm:$0xff] }
  0xa3   :  { %v6588_v23 = vcombine.high %v564_v17, %v568_v18  ;;  %v428_v24 = vld [vmem:[#allocation3 + $0x940] sm:$0xff]  ;;  %2986 = vmatprep.subr.bf16.mxu0 %v6460_v22  ;;  %v6587_v30 = vcombine.low %v564_v17, %v568_v18  ;;  %3059 = vmatprep.mubr.bf16.mxu1 %v7609_v1  ;;  %v181_v22 = vld [vmem:[#allocation3 + $0x188] sm:$0xff] }
  0xa4   :  { %v432_v25 = vld [vmem:[#allocation3 + $0x960] sm:$0xff]  ;;  %3016 = vmatprep.mubr.bf16.mxu0 %v7709_v28 }
  0xa5   :  { %v556_v26 = vld [vmem:[#allocation3 + $0xd40] sm:$0xff]  ;;  %v6452_v31 = vcombine.high %v428_v24, %v432_v25  ;;  %3029 = vmatprep.subr.bf16.mxu1 %v6588_v23  ;;  %v6451_v37 = vcombine.low %v428_v24, %v432_v25  ;;  %v6946_v23 = vld [vmem:[%s7932_s0 + $0x18] ss:$28 sps:$4 sm:$0xff]   ;;  %v6214_v24 = vcombine.high %v189_v13, %v193_v15  ;;  %v185_v25 = vld [vmem:[#allocation3 + $0x1a8] sm:$0xff] }
  0xa6   :  { %v560_v27 = vld [vmem:[#allocation3 + $0xd60] sm:$0xff]  ;;  %2987 = vmatpush1.bf16.msra.mxu0 %v6459_v29  ;;  %3030 = vmatpush1.bf16.msra.mxu1 %v6587_v30 }
  0xa7   :  { %v6580_v32 = vcombine.high %v556_v26, %v560_v27  ;;  %v420_v33 = vld [vmem:[#allocation3 + $0x900] sm:$0xff]  ;;  %2988 = vmatprep.subr.bf16.mxu0 %v6452_v31  ;;  %v6579_v38 = vcombine.low %v556_v26, %v560_v27  ;;  %v6213_v27 = vcombine.low %v189_v13, %v193_v15 }
  0xa8   :  { %v424_v34 = vld [vmem:[#allocation3 + $0x920] sm:$0xff] }
  0xa9   :  { %v548_v35 = vld [vmem:[#allocation3 + $0xd00] sm:$0xff]  ;;  %v6444_v39 = vcombine.high %v420_v33, %v424_v34  ;;  %3031 = vmatprep.subr.bf16.mxu1 %v6580_v32  ;;  %v6443_v45 = vcombine.low %v420_v33, %v424_v34  ;;  %v173_v32 = vld [vmem:[#allocation3 + $0x148] sm:$0xff]  ;;  %v6206_v33 = vcombine.high %v181_v22, %v185_v25 }
  0xaa   :  { %v552_v36 = vld [vmem:[#allocation3 + $0xd20] sm:$0xff]  ;;  %2989 = vmatpush1.bf16.msra.mxu0 %v6451_v37  ;;  %3032 = vmatpush1.bf16.msra.mxu1 %v6579_v38  ;;  %v177_v34 = vld [vmem:[#allocation3 + $0x168] sm:$0xff] }
  0xab   :  { %v412_v40 = vld [vmem:[#allocation3 + $0x8c0] sm:$0xff]  ;;  %v6572_v43 = vcombine.high %v548_v35, %v552_v36  ;;  %2990 = vmatprep.subr.bf16.mxu0 %v6444_v39  ;;  %v6571_v46 = vcombine.low %v548_v35, %v552_v36  ;;  %v6205_v36 = vcombine.low %v181_v22, %v185_v25 }
  0xac   :  { %v416_v41 = vld [vmem:[#allocation3 + $0x8e0] sm:$0xff] }
  0xad   :  { %v540_v42 = vld [vmem:[#allocation3 + $0xcc0] sm:$0xff]  ;;  %v6436_v47 = vcombine.high %v412_v40, %v416_v41  ;;  %3033 = vmatprep.subr.bf16.mxu1 %v6572_v43  ;;  %v6435_v53 = vcombine.low %v412_v40, %v416_v41  ;;  %v165_v40 = vld [vmem:[#allocation3 + $0x108] sm:$0xff]  ;;  %v6198_v41 = vcombine.high %v173_v32, %v177_v34 }
  0xae   :  { %v544_v44 = vld [vmem:[#allocation3 + $0xce0] sm:$0xff]  ;;  %2991 = vmatpush1.bf16.msra.mxu0 %v6443_v45  ;;  %3034 = vmatpush1.bf16.msra.mxu1 %v6571_v46 }
  0xaf   :  { %v404_v48 = vld [vmem:[#allocation3 + $0x880] sm:$0xff]  ;;  %v6564_v51 = vcombine.high %v540_v42, %v544_v44  ;;  %2992 = vmatprep.subr.bf16.mxu0 %v6436_v47  ;;  %v6563_v54 = vcombine.low %v540_v42, %v544_v44  ;;  %v169_v42 = vld [vmem:[#allocation3 + $0x128] sm:$0xff]  ;;  %v6197_v44 = vcombine.low %v173_v32, %v177_v34 }
  0xb0   :  { %v408_v49 = vld [vmem:[#allocation3 + $0x8a0] sm:$0xff] }
  0xb1   :  { %v532_v50 = vld [vmem:[#allocation3 + $0xc80] sm:$0xff]  ;;  %v6428_v55 = vcombine.high %v404_v48, %v408_v49  ;;  %3035 = vmatprep.subr.bf16.mxu1 %v6564_v51  ;;  %v6427_v63 = vcombine.low %v404_v48, %v408_v49  ;;  %v157_v48 = vld [vmem:[#allocation3 + $0xc8] sm:$0xff]  ;;  %v6190_v49 = vcombine.high %v165_v40, %v169_v42 }
  0xb2   :  { %v536_v52 = vld [vmem:[#allocation3 + $0xca0] sm:$0xff]  ;;  %2993 = vmatpush1.bf16.msra.mxu0 %v6435_v53  ;;  %3036 = vmatpush1.bf16.msra.mxu1 %v6563_v54 }
  0xb3   :  { %v396_v56 = vld [vmem:[#allocation3 + $0x840] sm:$0xff]  ;;  %v6556_v60 = vcombine.high %v532_v50, %v536_v52  ;;  %2994 = vmatprep.subr.bf16.mxu0 %v6428_v55  ;;  %v6555_v0 = vcombine.low %v532_v50, %v536_v52  ;;  %v161_v50 = vld [vmem:[#allocation3 + $0xe8] sm:$0xff]  ;;  %v6189_v52 = vcombine.low %v165_v40, %v169_v42 }
  0xb4   :  { %v400_v57 = vld [vmem:[#allocation3 + $0x860] sm:$0xff]  ;;  %v149_v55 = vld [vmem:[#allocation3 + $0x88] sm:$0xff] }
  0xb5   :  { %v524_v59 = vld [vmem:[#allocation3 + $0xc40] sm:$0xff]  ;;  %v6420_v2 = vcombine.high %v396_v56, %v400_v57  ;;  %3037 = vmatprep.subr.bf16.mxu1 %v6556_v60  ;;  %v6419_v8 = vcombine.low %v396_v56, %v400_v57  ;;  %v6182_v56 = vcombine.high %v157_v48, %v161_v50  ;;  %v153_v57 = vld [vmem:[#allocation3 + $0xa8] sm:$0xff]  ;;  %v6181_v60 = vcombine.low %v157_v48, %v161_v50 }
  0xb6   :  { %v528_v62 = vld [vmem:[#allocation3 + $0xc60] sm:$0xff]  ;;  %2995 = vmatpush1.bf16.msra.mxu0 %v6427_v63  ;;  %3038 = vmatpush1.bf16.msra.mxu1 %v6555_v0 }
  0xb7   :  { %v388_v3 = vld [vmem:[#allocation3 + $0x800] sm:$0xff]  ;;  %v6548_v6 = vcombine.high %v524_v59, %v528_v62  ;;  %2996 = vmatprep.subr.bf16.mxu0 %v6420_v2  ;;  %v6547_v9 = vcombine.low %v524_v59, %v528_v62  ;;  %v141_v2 = vld [vmem:[#allocation3 + $0x48] sm:$0xff] }
  0xb8   :  { %v392_v4 = vld [vmem:[#allocation3 + $0x820] sm:$0xff] }
  0xb9   :  { %v516_v5 = vld [vmem:[#allocation3 + $0xc00] sm:$0xff]  ;;  %v6412_v10 = vcombine.high %v388_v3, %v392_v4  ;;  %3039 = vmatprep.subr.bf16.mxu1 %v6548_v6  ;;  %v6411_v17 = vcombine.low %v388_v3, %v392_v4  ;;  %v6174_v3 = vcombine.high %v149_v55, %v153_v57  ;;  %v145_v4 = vld [vmem:[#allocation3 + $0x68] sm:$0xff]  ;;  %v6173_v6 = vcombine.low %v149_v55, %v153_v57 }
  0xba   :  { %v520_v7 = vld [vmem:[#allocation3 + $0xc20] sm:$0xff]  ;;  %2997 = vmatpush1.bf16.msra.mxu0 %v6419_v8  ;;  %3040 = vmatpush1.bf16.msra.mxu1 %v6547_v9  ;;  %v213_v57 = vld [vmem:[#allocation3 + $0x288] sm:$0xff] }
  0xbb   :  { %v508_v11 = vld [vmem:[#allocation3 + $0xbc0] sm:$0xff]  ;;  %v6540_v14 = vcombine.high %v516_v5, %v520_v7  ;;  %2998 = vmatprep.subr.bf16.mxu0 %v6412_v10  ;;  %v6539_v18 = vcombine.low %v516_v5, %v520_v7  ;;  %v133_v10 = vld [vmem:[#allocation3 + $0x8] sm:$0xff] }
  0xbc   :  { %v512_v12 = vld [vmem:[#allocation3 + $0xbe0] sm:$0xff] }
  0xbd   :  { %v6532_v19 = vcombine.high %v508_v11, %v512_v12  ;;  %v500_v20 = vld [vmem:[#allocation3 + $0xb80] sm:$0xff]  ;;  %3041 = vmatprep.subr.bf16.mxu1 %v6540_v14  ;;  %v6531_v26 = vcombine.low %v508_v11, %v512_v12  ;;  %v6166_v11 = vcombine.high %v141_v2, %v145_v4  ;;  %v137_v12 = vld [vmem:[#allocation3 + $0x28] sm:$0xff]  ;;  %v6165_v14 = vcombine.low %v141_v2, %v145_v4 }
  0xbe   :  { %v504_v21 = vld [vmem:[#allocation3 + $0xba0] sm:$0xff]  ;;  %2999 = vmatpush1.bf16.msra.mxu0 %v6411_v17  ;;  %3042 = vmatpush1.bf16.msra.mxu1 %v6539_v18  ;;  %v253_v17 = vld [vmem:[#allocation3 + $0x3c8] sm:$0xff] }
  0xbf   :  { %3000 = vmatprep.subr.bf16.mxu0 %v6532_v19  ;;  %v6524_v29 = vcombine.high %v500_v20, %v504_v21  ;;  %v492_v30 = vld [vmem:[#allocation3 + $0xb40] sm:$0xff]  ;;  %3070 = vmatprep.subr.bf16.mxu1 %v6214_v24  ;;  %v6523_v35 = vcombine.low %v500_v20, %v504_v21  ;;  %v257_v18 = vld [vmem:[#allocation3 + $0x3e8] sm:$0xff]  ;;  %v6158_v20 = vcombine.high %v133_v10, %v137_v12 }
  0xc0   :  { %v496_v31 = vld [vmem:[#allocation3 + $0xb60] sm:$0xff]  ;;  %v317_v19 = vld [vmem:[#allocation3 + $0x5c8] sm:$0xff] }
  0xc1   :  { %3060 = vmatmul.mubr.bf16.vlgmr.msra.gmra.mxu1 %v6946_v23  ;;  %v6516_v37 = vcombine.high %v492_v30, %v496_v31  ;;  %v484_v38 = vld [vmem:[#allocation3 + $0xb00] sm:$0xff]  ;;  %v6515_v43 = vcombine.low %v492_v30, %v496_v31  ;;  %v321_v21 = vld [vmem:[#allocation3 + $0x5e8] sm:$0xff]  ;;  %v6157_v23 = vcombine.low %v133_v10, %v137_v12  ;;  %v6278_v30 = vcombine.high %v253_v17, %v257_v18 }
  0xc2   :  { %3001 = vmatpush2.bf16.msra.mxu0 %v6531_v26  ;;  %3071 = vmatpush1.bf16.msra.mxu1 %v6213_v27  ;;  %v488_v39 = vld [vmem:[#allocation3 + $0xb20] sm:$0xff]  ;;  %v6949_v24 = vld [vmem:[%s7932_s0 + $0x10] ss:$28 sps:$4 sm:$0xff]   ;;  %v6342_v25 = vcombine.high %v317_v19, %v321_v21  ;;  %v6341_v32 = vcombine.low %v317_v19, %v321_v21 }
  0xc3   :  { %3002 = vmatprep.subr.bf16.mxu0 %v6524_v29  ;;  %3072 = vmatprep.subr.bf16.mxu1 %v6206_v33  ;;  %v6508_v45 = vcombine.high %v484_v38, %v488_v39  ;;  %v476_v46 = vld [vmem:[#allocation3 + $0xac0] sm:$0xff]  ;;  %v6507_v51 = vcombine.low %v484_v38, %v488_v39  ;;  %v245_v26 = vld [vmem:[#allocation3 + $0x388] sm:$0xff]  ;;  %v6277_v33 = vcombine.low %v253_v17, %v257_v18 }
  0xc4   :  { %3102 = vmatprep.mubr.bf16.mxu1 %v7688_v58  ;;  %v480_v47 = vld [vmem:[#allocation3 + $0xae0] sm:$0xff]  ;;  %v249_v27 = vld [vmem:[#allocation3 + $0x3a8] sm:$0xff] }
  0xc5   :  { %v6500_v53 = vcombine.high %v476_v46, %v480_v47  ;;  %v468_v54 = vld [vmem:[#allocation3 + $0xa80] sm:$0xff]  ;;  %v6499_v59 = vcombine.low %v476_v46, %v480_v47  ;;  %v309_v29 = vld [vmem:[#allocation3 + $0x588] sm:$0xff] }
  0xc6   :  { %3003 = vmatpush2.bf16.msra.mxu0 %v6523_v35  ;;  %3073 = vmatpush1.bf16.msra.mxu1 %v6205_v36  ;;  %v472_v58 = vld [vmem:[#allocation3 + $0xaa0] sm:$0xff]  ;;  %v313_v31 = vld [vmem:[#allocation3 + $0x5a8] sm:$0xff] }
  0xc7   :  { %3004 = vmatprep.subr.bf16.mxu0 %v6516_v37  ;;  %3074 = vmatprep.subr.bf16.mxu1 %v6198_v41  ;;  %v6492_v62 = vcombine.high %v468_v54, %v472_v58  ;;  %v460_v63 = vld [vmem:[#allocation3 + $0xa40] sm:$0xff]  ;;  %v6491_v5 = vcombine.low %v468_v54, %v472_v58  ;;  %v6334_v34 = vcombine.high %v309_v29, %v313_v31  ;;  %v237_v35 = vld [vmem:[#allocation3 + $0x348] sm:$0xff] }
  0xc8   :  { %v464_v0 = vld [vmem:[#allocation3 + $0xa60] sm:$0xff]  ;;  %v241_v36 = vld [vmem:[#allocation3 + $0x368] sm:$0xff]  ;;  %v6270_v37 = vcombine.high %v245_v26, %v249_v27  ;;  %v6333_v40 = vcombine.low %v309_v29, %v313_v31  ;;  %v6269_v41 = vcombine.low %v245_v26, %v249_v27 }
  0xc9   :  { %v6484_v7 = vcombine.high %v460_v63, %v464_v0  ;;  %v452_v8 = vld [vmem:[#allocation3 + $0xa00] sm:$0xff]  ;;  %v6483_v13 = vcombine.low %v460_v63, %v464_v0  ;;  %v301_v38 = vld [vmem:[#allocation3 + $0x548] sm:$0xff]  ;;  %v6262_v46 = vcombine.high %v237_v35, %v241_v36 }
  0xca   :  { %3005 = vmatpush2.bf16.msra.mxu0 %v6515_v43  ;;  %3075 = vmatpush1.bf16.msra.mxu1 %v6197_v44  ;;  %v456_v9 = vld [vmem:[#allocation3 + $0xa20] sm:$0xff]  ;;  %v305_v39 = vld [vmem:[#allocation3 + $0x568] sm:$0xff] }
  0xcb   :  { %3006 = vmatprep.subr.bf16.mxu0 %v6508_v45  ;;  %3076 = vmatprep.subr.bf16.mxu1 %v6190_v49  ;;  %v6476_v15 = vcombine.high %v452_v8, %v456_v9  ;;  %v6475_v22 = vcombine.low %v452_v8, %v456_v9  ;;  %v6326_v42 = vcombine.high %v301_v38, %v305_v39  ;;  %v229_v43 = vld [vmem:[#allocation3 + $0x308] sm:$0xff] }
  0xcc   :  { %v233_v44 = vld [vmem:[#allocation3 + $0x328] sm:$0xff]  ;;  %v6325_v48 = vcombine.low %v301_v38, %v305_v39  ;;  %v6261_v49 = vcombine.low %v237_v35, %v241_v36 }
  0xcd   :  { %v293_v45 = vld [vmem:[#allocation3 + $0x508] sm:$0xff]  ;;  %v6253_v55 = vcombine.low %v229_v43, %v233_v44 }
  0xce   :  { %3007 = vmatpush2.bf16.msra.mxu0 %v6507_v51  ;;  %3077 = vmatpush1.bf16.msra.mxu1 %v6189_v52  ;;  %v297_v47 = vld [vmem:[#allocation3 + $0x528] sm:$0xff] }
  0xcf   :  { %3008 = vmatprep.subr.bf16.mxu0 %v6500_v53  ;;  %3078 = vmatprep.subr.bf16.mxu1 %v6182_v56  ;;  %v6318_v50 = vcombine.high %v293_v45, %v297_v47  ;;  %v221_v51 = vld [vmem:[#allocation3 + $0x2c8] sm:$0xff]  ;;  %v6317_v58 = vcombine.low %v293_v45, %v297_v47 }
  0xd0   :  { %v225_v52 = vld [vmem:[#allocation3 + $0x2e8] sm:$0xff] }
  0xd1   :  { %v285_v53 = vld [vmem:[#allocation3 + $0x4c8] sm:$0xff]  ;;  %v6245_v2 = vcombine.low %v221_v51, %v225_v52 }
  0xd2   :  { %3009 = vmatpush2.bf16.msra.mxu0 %v6499_v59  ;;  %3079 = vmatpush1.bf16.msra.mxu1 %v6181_v60  ;;  %v289_v54 = vld [vmem:[#allocation3 + $0x4e8] sm:$0xff] }
  0xd3   :  { %3010 = vmatprep.subr.bf16.mxu0 %v6492_v62  ;;  %3080 = vmatprep.subr.bf16.mxu1 %v6174_v3  ;;  %v6310_v56 = vcombine.high %v285_v53, %v289_v54  ;;  %v217_v59 = vld [vmem:[#allocation3 + $0x2a8] sm:$0xff]  ;;  %v6246_v62 = vcombine.high %v221_v51, %v225_v52  ;;  %v6309_v0 = vcombine.low %v285_v53, %v289_v54 }
  0xd4   :  { %v277_v60 = vld [vmem:[#allocation3 + $0x488] sm:$0xff]  ;;  %v6237_v10 = vcombine.low %v213_v57, %v217_v59 }
  0xd5   :  { %v281_v63 = vld [vmem:[#allocation3 + $0x4a8] sm:$0xff] }
  0xd6   :  { %3011 = vmatpush2.bf16.msra.mxu0 %v6491_v5  ;;  %3081 = vmatpush1.bf16.msra.mxu1 %v6173_v6  ;;  %v6302_v3 = vcombine.high %v277_v60, %v281_v63  ;;  %v205_v4 = vld [vmem:[#allocation3 + $0x248] sm:$0xff]  ;;  %v6301_v9 = vcombine.low %v277_v60, %v281_v63 }
  0xd7   :  { %3012 = vmatprep.subr.bf16.mxu0 %v6484_v7  ;;  %3082 = vmatprep.subr.bf16.mxu1 %v6166_v11  ;;  %v209_v5 = vld [vmem:[#allocation3 + $0x268] sm:$0xff]  ;;  %v6238_v7 = vcombine.high %v213_v57, %v217_v59 }
  0xd8   :  { %v269_v6 = vld [vmem:[#allocation3 + $0x448] sm:$0xff]  ;;  %v6229_v19 = vcombine.low %v205_v4, %v209_v5 }
  0xd9   :  { %v273_v8 = vld [vmem:[#allocation3 + $0x468] sm:$0xff] }
  0xda   :  { %3013 = vmatpush2.bf16.msra.mxu0 %v6483_v13  ;;  %3083 = vmatpush1.bf16.msra.mxu1 %v6165_v14  ;;  %v6294_v11 = vcombine.high %v269_v6, %v273_v8  ;;  %v197_v12 = vld [vmem:[#allocation3 + $0x208] sm:$0xff]  ;;  %v6293_v18 = vcombine.low %v269_v6, %v273_v8 }
  0xdb   :  { %3014 = vmatprep.subr.bf16.mxu0 %v6476_v15  ;;  %3084 = vmatprep.subr.bf16.mxu1 %v6158_v20  ;;  %v201_v13 = vld [vmem:[#allocation3 + $0x228] sm:$0xff]  ;;  %v6230_v15 = vcombine.high %v205_v4, %v209_v5 }
  0xdc   :  { %v261_v14 = vld [vmem:[#allocation3 + $0x408] sm:$0xff]  ;;  %v6221_v27 = vcombine.low %v197_v12, %v201_v13 }
  0xdd   :  { %v265_v17 = vld [vmem:[#allocation3 + $0x428] sm:$0xff] }
  0xde   :  { %3015 = vmatpush2.bf16.msra.mxu0 %v6475_v22  ;;  %3085 = vmatpush1.bf16.msra.mxu1 %v6157_v23  ;;  %v6286_v20 = vcombine.high %v261_v14, %v265_v17  ;;  %v381_v21 = vld [vmem:[#allocation3 + $0x7c8] sm:$0xff]  ;;  %v6285_v26 = vcombine.low %v261_v14, %v265_v17 }
  0xdf   :  { %3113 = vmatprep.subr.bf16.mxu0 %v6342_v25  ;;  %3086 = vmatprep.subr.bf16.mxu1 %v6278_v30  ;;  %v385_v22 = vld [vmem:[#allocation3 + $0x7e8] sm:$0xff] }
  0xe0   :  { %v445_v23 = vld [vmem:[#allocation3 + $0x9c8] sm:$0xff]  ;;  %v6406_v29 = vcombine.high %v381_v21, %v385_v22  ;;  %v6405_v35 = vcombine.low %v381_v21, %v385_v22 }
  0xe1   :  { %3017 = vmatmul.mubr.bf16.vlgmr.msra.gmra.mxu0 %v6949_v24  ;;  %v6222_v24 = vcombine.high %v197_v12, %v201_v13  ;;  %v449_v25 = vld [vmem:[#allocation3 + $0x9e8] sm:$0xff] }
  0xe2   :  { %3114 = vmatpush1.bf16.msra.mxu0 %v6341_v32  ;;  %3145 = vmatprep.mubr.bf16.mxu0 %v7693_v61  ;;  %v6254_v61 = vcombine.high %v229_v43, %v233_v44  ;;  %v373_v30 = vld [vmem:[#allocation3 + $0x788] sm:$0xff]  ;;  %v6469_v36 = vcombine.low %v445_v23, %v449_v25 }
  0xe3   :  { %3087 = vmatpush2.bf16.msra.mxu1 %v6277_v33  ;;  %3115 = vmatprep.subr.bf16.mxu0 %v6334_v34  ;;  %v377_v31 = vld [vmem:[#allocation3 + $0x7a8] sm:$0xff]  ;;  %v6470_v33 = vcombine.high %v445_v23, %v449_v25 }
  0xe4   :  { %3088 = vmatprep.subr.bf16.mxu1 %v6270_v37  ;;  %v437_v32 = vld [vmem:[#allocation3 + $0x988] sm:$0xff]  ;;  %v6398_v37 = vcombine.high %v373_v30, %v377_v31  ;;  %v6397_v43 = vcombine.low %v373_v30, %v377_v31 }
  0xe5   :  { %v441_v34 = vld [vmem:[#allocation3 + $0x9a8] sm:$0xff] }
  0xe6   :  { %3116 = vmatpush1.bf16.msra.mxu0 %v6333_v40  ;;  %v365_v38 = vld [vmem:[#allocation3 + $0x748] sm:$0xff]  ;;  %v6461_v44 = vcombine.low %v437_v32, %v441_v34 }
  0xe7   :  { %3089 = vmatpush2.bf16.msra.mxu1 %v6269_v41  ;;  %3117 = vmatprep.subr.bf16.mxu0 %v6326_v42  ;;  %v369_v39 = vld [vmem:[#allocation3 + $0x768] sm:$0xff]  ;;  %v6462_v41 = vcombine.high %v437_v32, %v441_v34 }
  0xe8   :  { %3090 = vmatprep.subr.bf16.mxu1 %v6262_v46  ;;  %v429_v40 = vld [vmem:[#allocation3 + $0x948] sm:$0xff]  ;;  %v6390_v45 = vcombine.high %v365_v38, %v369_v39  ;;  %v6389_v51 = vcombine.low %v365_v38, %v369_v39 }
  0xe9   :  { %v433_v42 = vld [vmem:[#allocation3 + $0x968] sm:$0xff] }
  0xea   :  { %3118 = vmatpush1.bf16.msra.mxu0 %v6325_v48  ;;  %v357_v46 = vld [vmem:[#allocation3 + $0x708] sm:$0xff]  ;;  %v6453_v52 = vcombine.low %v429_v40, %v433_v42 }
  0xeb   :  { %3091 = vmatpush2.bf16.msra.mxu1 %v6261_v49  ;;  %3119 = vmatprep.subr.bf16.mxu0 %v6318_v50  ;;  %v361_v47 = vld [vmem:[#allocation3 + $0x728] sm:$0xff]  ;;  %v6454_v49 = vcombine.high %v429_v40, %v433_v42 }
  0xec   :  { %3092 = vmatprep.subr.bf16.mxu1 %v6254_v61  ;;  %v421_v48 = vld [vmem:[#allocation3 + $0x908] sm:$0xff] }
  0xed   :  { %v425_v50 = vld [vmem:[#allocation3 + $0x928] sm:$0xff] }
  0xee   :  { %3120 = vmatpush1.bf16.msra.mxu0 %v6317_v58  ;;  %v349_v53 = vld [vmem:[#allocation3 + $0x6c8] sm:$0xff]  ;;  %v6446_v58 = vcombine.high %v421_v48, %v425_v50  ;;  %v6445_v57 = vcombine.low %v421_v48, %v425_v50 }
  0xef   :  { %3093 = vmatpush2.bf16.msra.mxu1 %v6253_v55  ;;  %3121 = vmatprep.subr.bf16.mxu0 %v6310_v56  ;;  %v353_v61 = vld [vmem:[#allocation3 + $0x6e8] sm:$0xff]  ;;  %v6381_v56 = vcombine.low %v357_v46, %v361_v47 }
  0xf0   :  { %3094 = vmatprep.subr.bf16.mxu1 %v6246_v62  ;;  %v413_v54 = vld [vmem:[#allocation3 + $0x8c8] sm:$0xff]  ;;  %v6374_v59 = vcombine.high %v349_v53, %v353_v61 }
  0xf1   :  { %v417_v55 = vld [vmem:[#allocation3 + $0x8e8] sm:$0xff] }
  0xf2   :  { %3122 = vmatpush1.bf16.msra.mxu0 %v6309_v0  ;;  %v341_v60 = vld [vmem:[#allocation3 + $0x688] sm:$0xff]  ;;  %v6438_v63 = vcombine.high %v413_v54, %v417_v55 }
  0xf3   :  { %3095 = vmatpush2.bf16.msra.mxu1 %v6245_v2  ;;  %3123 = vmatprep.subr.bf16.mxu0 %v6302_v3  ;;  %v405_v62 = vld [vmem:[#allocation3 + $0x888] sm:$0xff]  ;;  %v6373_v2 = vcombine.low %v349_v53, %v353_v61  ;;  %v6437_v3 = vcombine.low %v413_v54, %v417_v55 }
  0xf4   :  { %3096 = vmatprep.subr.bf16.mxu1 %v6238_v7  ;;  %v409_v0 = vld [vmem:[#allocation3 + $0x8a8] sm:$0xff] }
  0xf5   :  { %v333_v5 = vld [vmem:[#allocation3 + $0x648] sm:$0xff]  ;;  %v6430_v8 = vcombine.high %v405_v62, %v409_v0 }
  0xf6   :  { %3124 = vmatpush1.bf16.msra.mxu0 %v6301_v9  ;;  %v337_v6 = vld [vmem:[#allocation3 + $0x668] sm:$0xff] }
  0xf7   :  { %3097 = vmatpush2.bf16.msra.mxu1 %v6237_v10  ;;  %3125 = vmatprep.subr.bf16.mxu0 %v6294_v11  ;;  %v397_v7 = vld [vmem:[#allocation3 + $0x848] sm:$0xff]  ;;  %v6429_v11 = vcombine.low %v405_v62, %v409_v0  ;;  %v6358_v12 = vcombine.high %v333_v5, %v337_v6 }
  0xf8   :  { %3098 = vmatprep.subr.bf16.mxu1 %v6230_v15  ;;  %v401_v9 = vld [vmem:[#allocation3 + $0x868] sm:$0xff] }
  0xf9   :  { %v325_v13 = vld [vmem:[#allocation3 + $0x608] sm:$0xff]  ;;  %v6422_v17 = vcombine.high %v397_v7, %v401_v9 }
  0xfa   :  { %3126 = vmatpush1.bf16.msra.mxu0 %v6293_v18  ;;  %v329_v14 = vld [vmem:[#allocation3 + $0x628] sm:$0xff] }
  0xfb   :  { %3099 = vmatpush2.bf16.msra.mxu1 %v6229_v19  ;;  %3127 = vmatprep.subr.bf16.mxu0 %v6286_v20  ;;  %v389_v15 = vld [vmem:[#allocation3 + $0x808] sm:$0xff]  ;;  %v6357_v19 = vcombine.low %v333_v5, %v337_v6  ;;  %v6421_v20 = vcombine.low %v397_v7, %v401_v9  ;;  %v6350_v21 = vcombine.high %v325_v13, %v329_v14 }
  0xfc   :  { %3100 = vmatprep.subr.bf16.mxu1 %v6222_v24  ;;  %v393_v18 = vld [vmem:[#allocation3 + $0x828] sm:$0xff] }
  0xfd   :  { %v509_v22 = vld [vmem:[#allocation3 + $0xbc8] sm:$0xff]  ;;  %v6414_v25 = vcombine.high %v389_v15, %v393_v18 }
  0xfe   :  { %3128 = vmatpush1.bf16.msra.mxu0 %v6285_v26  ;;  %v513_v23 = vld [vmem:[#allocation3 + $0xbe8] sm:$0xff] }
  0xff   :  { %3101 = vmatpush2.bf16.msra.mxu1 %v6221_v27  ;;  %3129 = vmatprep.subr.bf16.mxu0 %v6406_v29  ;;  %v573_v24 = vld [vmem:[#allocation3 + $0xdc8] sm:$0xff]  ;;  %v6349_v27 = vcombine.low %v325_v13, %v329_v14  ;;  %v6413_v29 = vcombine.low %v389_v15, %v393_v18  ;;  %v6534_v34 = vcombine.high %v509_v22, %v513_v23 }
 0x100   :  { %3156 = vmatprep.subr.bf16.mxu1 %v6470_v33  ;;  %v577_v26 = vld [vmem:[#allocation3 + $0xde8] sm:$0xff] }
 0x101   :  { %v6598_v30 = vcombine.high %v573_v24, %v577_v26  ;;  %v501_v31 = vld [vmem:[#allocation3 + $0xb88] sm:$0xff] }
 0x102   :  { %3103 = vmatmul.mubr.bf16.vlgmr.msra.gmra.mxu1 %v7700_v16  ;;  %3130 = vmatpush2.bf16.msra.mxu0 %v6405_v35  ;;  %v6382_v16 = vcombine.high %v357_v46, %v361_v47  ;;  %v505_v32 = vld [vmem:[#allocation3 + $0xba8] sm:$0xff] }
 0x103   :  { %3157 = vmatpush1.bf16.msra.mxu1 %v6469_v36  ;;  %3131 = vmatprep.subr.bf16.mxu0 %v6398_v37  ;;  %v565_v33 = vld [vmem:[#allocation3 + $0xd88] sm:$0xff]  ;;  %v6597_v36 = vcombine.low %v573_v24, %v577_v26  ;;  %v6533_v37 = vcombine.low %v509_v22, %v513_v23  ;;  %v6526_v42 = vcombine.high %v501_v31, %v505_v32  ;;  %v190_v24 = vld [vmem:[#allocation3 + $0x1d0] sm:$0xff] }
 0x104   :  { %3158 = vmatprep.subr.bf16.mxu1 %v6462_v41  ;;  %3188 = vmatprep.mubr.bf16.mxu1 %v7709_v28  ;;  %v345_v28 = vld [vmem:[#allocation3 + $0x6a8] sm:$0xff]  ;;  %v6525_v46 = vcombine.low %v501_v31, %v505_v32  ;;  %v318_v26 = vld [vmem:[#allocation3 + $0x5d0] sm:$0xff] }
 0x105   :  { %v6366_v4 = vcombine.high %v341_v60, %v345_v28  ;;  %v6365_v10 = vcombine.low %v341_v60, %v345_v28  ;;  %v569_v35 = vld [vmem:[#allocation3 + $0xda8] sm:$0xff] }
 0x106   :  { %3132 = vmatpush2.bf16.msra.mxu0 %v6397_v43  ;;  %v6590_v38 = vcombine.high %v565_v33, %v569_v35  ;;  %v493_v39 = vld [vmem:[#allocation3 + $0xb48] sm:$0xff] }
 0x107   :  { %3159 = vmatpush1.bf16.msra.mxu1 %v6461_v44  ;;  %3133 = vmatprep.subr.bf16.mxu0 %v6390_v45  ;;  %v497_v40 = vld [vmem:[#allocation3 + $0xb68] sm:$0xff]  ;;  %v6589_v45 = vcombine.low %v565_v33, %v569_v35  ;;  %v182_v33 = vld [vmem:[#allocation3 + $0x190] sm:$0xff] }
 0x108   :  { %3160 = vmatprep.subr.bf16.mxu1 %v6454_v49  ;;  %v557_v41 = vld [vmem:[#allocation3 + $0xd48] sm:$0xff]  ;;  %v6517_v53 = vcombine.low %v493_v39, %v497_v40  ;;  %v310_v35 = vld [vmem:[#allocation3 + $0x590] sm:$0xff] }
 0x109   :  { %v561_v43 = vld [vmem:[#allocation3 + $0xd68] sm:$0xff] }
 0x10a   :  { %3134 = vmatpush2.bf16.msra.mxu0 %v6389_v51  ;;  %v7726_v44 = vld [vmem:[%s7932_s0 + $0x8] ss:$28 sps:$4 sm:$0xff]   ;;  %v6582_v47 = vcombine.high %v557_v41, %v561_v43  ;;  %v6518_v51 = vcombine.high %v493_v39, %v497_v40 }
 0x10b   :  { %3161 = vmatpush1.bf16.msra.mxu1 %v6453_v52  ;;  %3135 = vmatprep.subr.bf16.mxu0 %v6382_v16  ;;  %v485_v48 = vld [vmem:[#allocation3 + $0xb08] sm:$0xff]  ;;  %v6581_v16 = vcombine.low %v557_v41, %v561_v43  ;;  %v174_v41 = vld [vmem:[#allocation3 + $0x150] sm:$0xff] }
 0x10c   :  { %3162 = vmatprep.subr.bf16.mxu1 %v6446_v58  ;;  %v489_v49 = vld [vmem:[#allocation3 + $0xb28] sm:$0xff]  ;;  %v302_v43 = vld [vmem:[#allocation3 + $0x550] sm:$0xff] }
 0x10d   :  { %v549_v50 = vld [vmem:[#allocation3 + $0xd08] sm:$0xff]  ;;  %v6509_v60 = vcombine.low %v485_v48, %v489_v49 }
 0x10e   :  { %3136 = vmatpush2.bf16.msra.mxu0 %v6381_v56  ;;  %v553_v52 = vld [vmem:[#allocation3 + $0xd28] sm:$0xff]  ;;  %v6510_v56 = vcombine.high %v485_v48, %v489_v49 }
 0x10f   :  { %3163 = vmatpush1.bf16.msra.mxu1 %v6445_v57  ;;  %3137 = vmatprep.subr.bf16.mxu0 %v6374_v59  ;;  %v6574_v61 = vcombine.high %v549_v50, %v553_v52  ;;  %v477_v54 = vld [vmem:[#allocation3 + $0xac8] sm:$0xff]  ;;  %v6573_v59 = vcombine.low %v549_v50, %v553_v52  ;;  %v166_v52 = vld [vmem:[#allocation3 + $0x110] sm:$0xff] }
 0x110   :  { %3164 = vmatprep.subr.bf16.mxu1 %v6438_v63  ;;  %v481_v58 = vld [vmem:[#allocation3 + $0xae8] sm:$0xff] }
 0x111   :  { %v541_v55 = vld [vmem:[#allocation3 + $0xcc8] sm:$0xff]  ;;  %v6501_v5 = vcombine.low %v477_v54, %v481_v58 }
 0x112   :  { %3138 = vmatpush2.bf16.msra.mxu0 %v6373_v2  ;;  %v545_v57 = vld [vmem:[#allocation3 + $0xce8] sm:$0xff]  ;;  %v6502_v2 = vcombine.high %v477_v54, %v481_v58  ;;  %v298_v54 = vld [vmem:[#allocation3 + $0x530] sm:$0xff]  ;;  %v7745_v58 = vld [vmem:[%s7932_s0 + $0x4] ss:$28 sps:$4 sm:$0xff]  }
 0x113   :  { %3165 = vmatpush1.bf16.msra.mxu1 %v6437_v3  ;;  %3139 = vmatprep.subr.bf16.mxu0 %v6366_v4  ;;  %v6566_v28 = vcombine.high %v541_v55, %v545_v57  ;;  %v469_v62 = vld [vmem:[#allocation3 + $0xa88] sm:$0xff]  ;;  %v6565_v4 = vcombine.low %v541_v55, %v545_v57 }
 0x114   :  { %3166 = vmatprep.subr.bf16.mxu1 %v6430_v8  ;;  %v473_v63 = vld [vmem:[#allocation3 + $0xaa8] sm:$0xff] }
 0x115   :  { %v533_v0 = vld [vmem:[#allocation3 + $0xc88] sm:$0xff]  ;;  %v6493_v13 = vcombine.low %v469_v62, %v473_v63 }
 0x116   :  { %3140 = vmatpush2.bf16.msra.mxu0 %v6365_v10  ;;  %v537_v3 = vld [vmem:[#allocation3 + $0xca8] sm:$0xff]  ;;  %v6494_v10 = vcombine.high %v469_v62, %v473_v63  ;;  %v162_v62 = vld [vmem:[#allocation3 + $0xf0] sm:$0xff] }
 0x117   :  { %3167 = vmatpush1.bf16.msra.mxu1 %v6429_v11  ;;  %3141 = vmatprep.subr.bf16.mxu0 %v6358_v12  ;;  %v6558_v6 = vcombine.high %v533_v0, %v537_v3  ;;  %v461_v7 = vld [vmem:[#allocation3 + $0xa48] sm:$0xff]  ;;  %v6557_v12 = vcombine.low %v533_v0, %v537_v3  ;;  %v286_v63 = vld [vmem:[#allocation3 + $0x4d0] sm:$0xff] }
 0x118   :  { %3168 = vmatprep.subr.bf16.mxu1 %v6422_v17  ;;  %v465_v8 = vld [vmem:[#allocation3 + $0xa68] sm:$0xff]  ;;  %v290_v0 = vld [vmem:[#allocation3 + $0x4f0] sm:$0xff] }
 0x119   :  { %v525_v9 = vld [vmem:[#allocation3 + $0xc48] sm:$0xff]  ;;  %v6485_v22 = vcombine.low %v461_v7, %v465_v8 }
 0x11a   :  { %3142 = vmatpush2.bf16.msra.mxu0 %v6357_v19  ;;  %v529_v11 = vld [vmem:[#allocation3 + $0xc68] sm:$0xff]  ;;  %v6486_v19 = vcombine.high %v461_v7, %v465_v8  ;;  %v154_v7 = vld [vmem:[#allocation3 + $0xb0] sm:$0xff] }
 0x11b   :  { %3169 = vmatpush1.bf16.msra.mxu1 %v6421_v20  ;;  %3143 = vmatprep.subr.bf16.mxu0 %v6350_v21  ;;  %v6550_v14 = vcombine.high %v525_v9, %v529_v11  ;;  %v453_v15 = vld [vmem:[#allocation3 + $0xa08] sm:$0xff]  ;;  %v6549_v21 = vcombine.low %v525_v9, %v529_v11  ;;  %v278_v8 = vld [vmem:[#allocation3 + $0x490] sm:$0xff]  ;;  %v6311_v11 = vcombine.low %v286_v63, %v290_v0 }
 0x11c   :  { %3170 = vmatprep.subr.bf16.mxu1 %v6414_v25  ;;  %v457_v17 = vld [vmem:[#allocation3 + $0xa28] sm:$0xff]  ;;  %v194_v25 = vld [vmem:[#allocation3 + $0x1f0] sm:$0xff] }
 0x11d   :  { %v517_v18 = vld [vmem:[#allocation3 + $0xc08] sm:$0xff]  ;;  %v6477_v31 = vcombine.low %v453_v15, %v457_v17  ;;  %v6216_v32 = vcombine.high %v190_v24, %v194_v25  ;;  %v282_v9 = vld [vmem:[#allocation3 + $0x4b0] sm:$0xff] }
 0x11e   :  { %3144 = vmatpush2.bf16.msra.mxu0 %v6349_v27  ;;  %v521_v20 = vld [vmem:[#allocation3 + $0xc28] sm:$0xff]  ;;  %v6478_v27 = vcombine.high %v453_v15, %v457_v17  ;;  %v146_v15 = vld [vmem:[#allocation3 + $0x70] sm:$0xff] }
 0x11f   :  { %3171 = vmatpush1.bf16.msra.mxu1 %v6413_v29  ;;  %3199 = vmatprep.subr.bf16.mxu0 %v6598_v30  ;;  %v6542_v23 = vcombine.high %v517_v18, %v521_v20  ;;  %v322_v29 = vld [vmem:[#allocation3 + $0x5f0] sm:$0xff]  ;;  %v6541_v30 = vcombine.low %v517_v18, %v521_v20  ;;  %v7751_v55 = vld [vmem:[%s7932_s0 + $0xc] ss:$28 sps:$4 sm:$0xff]   ;;  %v582_v20 = vlaneseq }
 0x120   :  { %3172 = vmatprep.subr.bf16.mxu1 %v6534_v34  ;;  %v186_v34 = vld [vmem:[#allocation3 + $0x1b0] sm:$0xff]  ;;  %v6343_v39 = vcombine.low %v318_v26, %v322_v29 }
 0x121   :  { %3146 = vmatmul.mubr.bf16.vlgmr.msra.gmra.mxu0 %v7726_v44  ;;  %v6208_v40 = vcombine.high %v182_v33, %v186_v34  ;;  %v7739_v48 = vld [vmem:[%s7932_s0 + $0x10] ss:$28 sps:$4 sm:$0xff]   ;;  %v6207_v49 = vcombine.low %v182_v33, %v186_v34 }
 0x122   :  { %3200 = vmatpush1.bf16.msra.mxu0 %v6597_v36  ;;  %3231 = vmatprep.mubr.bf16.mxu0 %v7609_v1  ;;  %v6344_v36 = vcombine.high %v318_v26, %v322_v29  ;;  %v270_v17 = vld [vmem:[#allocation3 + $0x450] sm:$0xff] }
 0x123   :  { %3173 = vmatpush2.bf16.msra.mxu1 %v6533_v37  ;;  %3201 = vmatprep.subr.bf16.mxu0 %v6590_v38  ;;  %v314_v37 = vld [vmem:[#allocation3 + $0x5b0] sm:$0xff]  ;;  %v6215_v38 = vcombine.low %v190_v24, %v194_v25 }
 0x124   :  { %3174 = vmatprep.subr.bf16.mxu1 %v6526_v42  ;;  %v178_v42 = vld [vmem:[#allocation3 + $0x170] sm:$0xff]  ;;  %v6335_v50 = vcombine.low %v310_v35, %v314_v37 }
 0x125   :  { %v274_v18 = vld [vmem:[#allocation3 + $0x470] sm:$0xff] }
 0x126   :  { %3202 = vmatpush1.bf16.msra.mxu0 %v6589_v45  ;;  %v6336_v45 = vcombine.high %v310_v35, %v314_v37  ;;  %v134_v24 = vld [vmem:[#allocation3 + $0x10] sm:$0xff] }
 0x127   :  { %3175 = vmatpush2.bf16.msra.mxu1 %v6525_v46  ;;  %3203 = vmatprep.subr.bf16.mxu0 %v6582_v47  ;;  %v306_v46 = vld [vmem:[#allocation3 + $0x570] sm:$0xff] }
 0x128   :  { %3176 = vmatprep.subr.bf16.mxu1 %v6518_v51  ;;  %v7733_v47 = vld [vmem:[%s7932_s0 + $0x18] ss:$28 sps:$4 sm:$0xff]   ;;  %v6200_v51 = vcombine.high %v174_v41, %v178_v42  ;;  %v6327_v57 = vcombine.low %v302_v43, %v306_v46 }
 0x129   :  { %v138_v25 = vld [vmem:[#allocation3 + $0x30] sm:$0xff] }
 0x12a   :  { %3204 = vmatpush1.bf16.msra.mxu0 %v6581_v16  ;;  %v170_v16 = vld [vmem:[#allocation3 + $0x130] sm:$0xff] }
 0x12b   :  { %3177 = vmatpush2.bf16.msra.mxu1 %v6517_v53  ;;  %3205 = vmatprep.subr.bf16.mxu0 %v6574_v61  ;;  %v294_v53 = vld [vmem:[#allocation3 + $0x510] sm:$0xff]  ;;  %v6328_v61 = vcombine.high %v302_v43, %v306_v46 }
 0x12c   :  { %3178 = vmatprep.subr.bf16.mxu1 %v6510_v56  ;;  %v6199_v56 = vcombine.low %v174_v41, %v178_v42  ;;  %v6319_v3 = vcombine.low %v294_v53, %v298_v54  ;;  %v262_v26 = vld [vmem:[#allocation3 + $0x410] sm:$0xff]  ;;  %v7759_v41 = vld [vmem:[#allocation5] sm:$0xff] }
 0x12d   :  { %v254_v34 = vld [vmem:[#allocation3 + $0x3d0] sm:$0xff] }
 0x12e   :  { %3206 = vmatpush1.bf16.msra.mxu0 %v6573_v59  ;;  %v6192_v59 = vcombine.high %v166_v52, %v170_v16  ;;  %v258_v35 = vld [vmem:[#allocation3 + $0x3f0] sm:$0xff] }
 0x12f   :  { %3179 = vmatpush2.bf16.msra.mxu1 %v6509_v60  ;;  %3207 = vmatprep.subr.bf16.mxu0 %v6566_v28  ;;  %v6320_v60 = vcombine.high %v294_v53, %v298_v54  ;;  %v158_v28 = vld [vmem:[#allocation3 + $0xd0] sm:$0xff]  ;;  %v6280_v42 = vcombine.high %v254_v34, %v258_v35 }
 0x130   :  { %3180 = vmatprep.subr.bf16.mxu1 %v6502_v2  ;;  %v6191_v2 = vcombine.low %v166_v52, %v170_v16  ;;  %v386_v37 = vld [vmem:[#allocation3 + $0x7f0] sm:$0xff]  ;;  %v6279_v52 = vcombine.low %v254_v34, %v258_v35 }
 0x131   :  { %v250_v46 = vld [vmem:[#allocation3 + $0x3b0] sm:$0xff] }
 0x132   :  { %3208 = vmatpush1.bf16.msra.mxu0 %v6565_v4  ;;  %v6184_v4 = vcombine.high %v158_v28, %v162_v62  ;;  %v238_v54 = vld [vmem:[#allocation3 + $0x350] sm:$0xff] }
 0x133   :  { %3181 = vmatpush2.bf16.msra.mxu1 %v6501_v5  ;;  %3209 = vmatprep.subr.bf16.mxu0 %v6558_v6  ;;  %v6312_v5 = vcombine.high %v286_v63, %v290_v0  ;;  %v150_v6 = vld [vmem:[#allocation3 + $0x90] sm:$0xff] }
 0x134   :  { %3182 = vmatprep.subr.bf16.mxu1 %v6494_v10  ;;  %v6183_v10 = vcombine.low %v158_v28, %v162_v62 }
 0x136   :  { %3210 = vmatpush1.bf16.msra.mxu0 %v6557_v12  ;;  %v6176_v12 = vcombine.high %v150_v6, %v154_v7 }
 0x137   :  { %3183 = vmatpush2.bf16.msra.mxu1 %v6493_v13  ;;  %3211 = vmatprep.subr.bf16.mxu0 %v6550_v14  ;;  %v6304_v13 = vcombine.high %v278_v8, %v282_v9  ;;  %v142_v14 = vld [vmem:[#allocation3 + $0x50] sm:$0xff] }
 0x138   :  { %3184 = vmatprep.subr.bf16.mxu1 %v6486_v19  ;;  %v6175_v19 = vcombine.low %v150_v6, %v154_v7  ;;  %v6167_v29 = vcombine.low %v142_v14, %v146_v15  ;;  %v230_v7 = vld [vmem:[#allocation3 + $0x310] sm:$0xff] }
 0x13a   :  { %3212 = vmatpush1.bf16.msra.mxu0 %v6549_v21  ;;  %v6303_v21 = vcombine.low %v278_v8, %v282_v9  ;;  %v234_v8 = vld [vmem:[#allocation3 + $0x330] sm:$0xff] }
 0x13b   :  { %3185 = vmatpush2.bf16.msra.mxu1 %v6485_v22  ;;  %3213 = vmatprep.subr.bf16.mxu0 %v6542_v23  ;;  %v6168_v22 = vcombine.high %v142_v14, %v146_v15  ;;  %v6296_v23 = vcombine.high %v270_v17, %v274_v18 }
 0x13c   :  { %3186 = vmatprep.subr.bf16.mxu1 %v6478_v27  ;;  %v266_v27 = vld [vmem:[#allocation3 + $0x430] sm:$0xff] }
 0x13d   :  { %v6288_v33 = vcombine.high %v262_v26, %v266_v27 }
 0x13e   :  { %3214 = vmatpush1.bf16.msra.mxu0 %v6541_v30  ;;  %v7754_v30 = vshrl.u32 %v582_v20, 7  ;;  %v222_v20 = vld [vmem:[#allocation3 + $0x2d0] sm:$0xff] }
 0x13f   :  { %3187 = vmatpush2.bf16.msra.mxu1 %v6477_v31  ;;  %3242 = vmatprep.subr.bf16.mxu0 %v6216_v32  ;;  %v6295_v31 = vcombine.low %v270_v17, %v274_v18  ;;  %v6160_v32 = vcombine.high %v134_v24, %v138_v25  ;;  %v6256_v17 = vcombine.high %v230_v7, %v234_v8 }
 0x140   :  { %3285 = vmatprep.subr.bf16.mxu1 %v6344_v36  ;;  %v382_v36 = vld [vmem:[#allocation3 + $0x7d0] sm:$0xff] }
 0x141   :  { %3232 = vmatmul.mubr.bf16.vlgmr.msra.gmra.mxu0 %v7733_v47  ;;  %v6408_v43 = vcombine.high %v382_v36, %v386_v37  ;;  %v6407_v16 = vcombine.low %v382_v36, %v386_v37 }
 0x142   :  { %3189 = vmatmul.mubr.bf16.vlgmr.msra.gmra.mxu1 %v7739_v48  ;;  %3243 = vmatpush1.bf16.msra.mxu0 %v6215_v38  ;;  %v6159_v38 = vcombine.low %v134_v24, %v138_v25  ;;  %v6255_v24 = vcombine.low %v230_v7, %v234_v8  ;;  %v438_v7 = vld [vmem:[#allocation3 + $0x990] sm:$0xff] }
 0x143   :  { %3286 = vmatpush1.bf16.msra.mxu1 %v6343_v39  ;;  %3244 = vmatprep.subr.bf16.mxu0 %v6208_v40  ;;  %v7757_v39 = vsub.s32 0, %v7754_v30  ;;  %v6287_v40 = vcombine.low %v262_v26, %v266_v27  ;;  %v442_v8 = vld [vmem:[#allocation3 + $0x9b0] sm:$0xff] }
 0x144   :  { %3287 = vmatprep.subr.bf16.mxu1 %v6336_v45  ;;  %3274 = vmatprep.mubr.bf16.mxu0 %v7745_v58  ;;  %v246_v45 = vld [vmem:[#allocation3 + $0x390] sm:$0xff] }
 0x145   :  { %3317 = vmatprep.mubr.bf16.mxu1 %v7751_v55  ;;  %v6272_v53 = vcombine.high %v246_v45, %v250_v46  ;;  %v6271_v63 = vcombine.low %v246_v45, %v250_v46 }
 0x146   :  { %3245 = vmatpush1.bf16.msra.mxu0 %v6207_v49  ;;  %v374_v49 = vld [vmem:[#allocation3 + $0x790] sm:$0xff] }
 0x147   :  { %3288 = vmatpush1.bf16.msra.mxu1 %v6335_v50  ;;  %3246 = vmatprep.subr.bf16.mxu0 %v6200_v51  ;;  %v378_v50 = vld [vmem:[#allocation3 + $0x7b0] sm:$0xff]  ;;  %v585_v51 = vrot.slane %v7759_v41, %v7757_v39 }
 0x148   :  { %3289 = vmatprep.subr.bf16.mxu1 %v6328_v61  ;;  %v6400_v61 = vcombine.high %v374_v49, %v378_v50 }
 0x14a   :  { %3247 = vmatpush1.bf16.msra.mxu0 %v6199_v56  ;;  %v242_v56 = vld [vmem:[#allocation3 + $0x370] sm:$0xff] }
 0x14b   :  { %3290 = vmatpush1.bf16.msra.mxu1 %v6327_v57  ;;  %3248 = vmatprep.subr.bf16.mxu0 %v6192_v59  ;;  %v366_v59 = vld [vmem:[#allocation3 + $0x750] sm:$0xff] }
 0x14c   :  { %3291 = vmatprep.subr.bf16.mxu1 %v6320_v60  ;;  %v370_v60 = vld [vmem:[#allocation3 + $0x770] sm:$0xff] }
 0x14d   :  { %v6392_v6 = vcombine.high %v366_v59, %v370_v60  ;;  %v6391_v15 = vcombine.low %v366_v59, %v370_v60  ;;  %v446_v59 = vld [vmem:[#allocation3 + $0x9d0] sm:$0xff] }
 0x14e   :  { %3249 = vmatpush1.bf16.msra.mxu0 %v6191_v2  ;;  %v6399_v2 = vcombine.low %v374_v49, %v378_v50  ;;  %v450_v60 = vld [vmem:[#allocation3 + $0x9f0] sm:$0xff] }
 0x14f   :  { %3292 = vmatpush1.bf16.msra.mxu1 %v6319_v3  ;;  %3250 = vmatprep.subr.bf16.mxu0 %v6184_v4  ;;  %v6264_v3 = vcombine.high %v238_v54, %v242_v56 }
 0x150   :  { %3293 = vmatprep.subr.bf16.mxu1 %v6312_v5 }
 0x152   :  { %3251 = vmatpush1.bf16.msra.mxu0 %v6183_v10  ;;  %v358_v10 = vld [vmem:[#allocation3 + $0x710] sm:$0xff] }
 0x153   :  { %3294 = vmatpush1.bf16.msra.mxu1 %v6311_v11  ;;  %3252 = vmatprep.subr.bf16.mxu0 %v6176_v12  ;;  %v362_v11 = vld [vmem:[#allocation3 + $0x730] sm:$0xff] }
 0x154   :  { %3295 = vmatprep.subr.bf16.mxu1 %v6304_v13  ;;  %v6263_v13 = vcombine.low %v238_v54, %v242_v56  ;;  %v6383_v25 = vcombine.low %v358_v10, %v362_v11 }
 0x156   :  { %3253 = vmatpush1.bf16.msra.mxu0 %v6175_v19  ;;  %v6384_v19 = vcombine.high %v358_v10, %v362_v11  ;;  %v570_v10 = vld [vmem:[#allocation3 + $0xdb0] sm:$0xff]  ;;  %v6471_v11 = vcombine.low %v446_v59, %v450_v60 }
 0x157   :  { %3296 = vmatpush1.bf16.msra.mxu1 %v6303_v21  ;;  %3254 = vmatprep.subr.bf16.mxu0 %v6168_v22  ;;  %v226_v21 = vld [vmem:[#allocation3 + $0x2f0] sm:$0xff] }
 0x158   :  { %3297 = vmatprep.subr.bf16.mxu1 %v6296_v23  ;;  %v350_v22 = vld [vmem:[#allocation3 + $0x6d0] sm:$0xff]  ;;  %v6248_v26 = vcombine.high %v222_v20, %v226_v21  ;;  %v6247_v34 = vcombine.low %v222_v20, %v226_v21 }
 0x159   :  { %v354_v23 = vld [vmem:[#allocation3 + $0x6f0] sm:$0xff] }
 0x15a   :  { %3255 = vmatpush1.bf16.msra.mxu0 %v6167_v29  ;;  %v6376_v27 = vcombine.high %v350_v22, %v354_v23  ;;  %v214_v29 = vld [vmem:[#allocation3 + $0x290] sm:$0xff]  ;;  %v6375_v35 = vcombine.low %v350_v22, %v354_v23  ;;  %v6463_v22 = vcombine.low %v438_v7, %v442_v8 }
 0x15b   :  { %3298 = vmatpush1.bf16.msra.mxu1 %v6295_v31  ;;  %3256 = vmatprep.subr.bf16.mxu0 %v6160_v32  ;;  %v218_v31 = vld [vmem:[#allocation3 + $0x2b0] sm:$0xff] }
 0x15c   :  { %3299 = vmatprep.subr.bf16.mxu1 %v6288_v33  ;;  %v342_v32 = vld [vmem:[#allocation3 + $0x690] sm:$0xff]  ;;  %v6240_v36 = vcombine.high %v214_v29, %v218_v31  ;;  %v6239_v45 = vcombine.low %v214_v29, %v218_v31 }
 0x15d   :  { %v346_v33 = vld [vmem:[#allocation3 + $0x6b0] sm:$0xff] }
 0x15e   :  { %3257 = vmatpush1.bf16.msra.mxu0 %v6159_v38  ;;  %v6368_v37 = vcombine.high %v342_v32, %v346_v33  ;;  %v206_v38 = vld [vmem:[#allocation3 + $0x250] sm:$0xff]  ;;  %v6367_v46 = vcombine.low %v342_v32, %v346_v33 }
 0x15f   :  { %3300 = vmatpush1.bf16.msra.mxu1 %v6287_v40  ;;  %3258 = vmatprep.subr.bf16.mxu0 %v6280_v42  ;;  %v210_v40 = vld [vmem:[#allocation3 + $0x270] sm:$0xff] }
 0x160   :  { %3301 = vmatprep.subr.bf16.mxu1 %v6408_v43  ;;  %v334_v42 = vld [vmem:[#allocation3 + $0x650] sm:$0xff]  ;;  %v6232_v49 = vcombine.high %v206_v38, %v210_v40 }
 0x161   :  { %v2932_v57 = vpop.f32.mrf.mxu0  ;;  %v2975_v62 = vpop.f32.mrf.mxu1  ;;  %v338_v43 = vld [vmem:[#allocation3 + $0x670] sm:$0xff] }
 0x162   :  { %v2933_v28 = vadd.f32 %v2932_v57, %v585_v51  ;;  %3259 = vmatpush2.bf16.msra.mxu0 %v6279_v52  ;;  %v6360_v50 = vcombine.high %v334_v42, %v338_v43  ;;  %v202_v52 = vld [vmem:[#allocation3 + $0x230] sm:$0xff]  ;;  %v6359_v54 = vcombine.low %v334_v42, %v338_v43 }
 0x163   :  { %3302 = vmatpush2.bf16.msra.mxu1 %v6407_v16  ;;  %v7763_v0 = vpop.f32.mrf.mxu0  ;;  %3260 = vmatprep.subr.bf16.mxu0 %v6272_v53  ;;  %v7767_v5 = vpop.f32.mrf.mxu1  ;;  %v326_v16 = vld [vmem:[#allocation3 + $0x610] sm:$0xff] }
 0x164   :  { %v7765_v4 = vadd.f32 %v2975_v62, %v2933_v28  ;;  %3303 = vmatprep.subr.bf16.mxu1 %v6400_v61  ;;  %v330_v53 = vld [vmem:[#allocation3 + $0x630] sm:$0xff]  ;;  %v6231_v61 = vcombine.low %v206_v38, %v210_v40 }
 0x165   :  { %v2936_v9 = vpop.f32.mrf.mxu0  ;;  %v2979_v14 = vpop.f32.mrf.mxu1  ;;  %v6352_v57 = vcombine.high %v326_v16, %v330_v53  ;;  %v574_v28 = vld [vmem:[#allocation3 + $0xdd0] sm:$0xff] }
 0x166   :  { %v2937_v12 = vadd.f32 %v2936_v9, %v585_v51  ;;  %3261 = vmatpush2.bf16.msra.mxu0 %v6271_v63  ;;  %v198_v51 = vld [vmem:[#allocation3 + $0x210] sm:$0xff] }
 0x167   :  { %3304 = vmatpush2.bf16.msra.mxu1 %v6399_v2  ;;  %3262 = vmatprep.subr.bf16.mxu0 %v6264_v3  ;;  %v6224_v56 = vcombine.high %v198_v51, %v202_v52  ;;  %v578_v62 = vld [vmem:[#allocation3 + $0xdf0] sm:$0xff]  ;;  %v6223_v63 = vcombine.low %v198_v51, %v202_v52  ;;  %v6351_v2 = vcombine.low %v326_v16, %v330_v53 }
 0x168   :  { %v7769_v18 = vadd.f32 %v2979_v14, %v2937_v12  ;;  %3305 = vmatprep.subr.bf16.mxu1 %v6392_v6  ;;  %v6472_v3 = vcombine.high %v446_v59, %v450_v60  ;;  %v6600_v6 = vcombine.high %v574_v28, %v578_v62  ;;  %v566_v9 = vld [vmem:[#allocation3 + $0xd90] sm:$0xff]  ;;  %v6599_v12 = vcombine.low %v574_v28, %v578_v62 }
 0x169   :  { %v6592_v14 = vcombine.high %v566_v9, %v570_v10  ;;  %v558_v20 = vld [vmem:[#allocation3 + $0xd50] sm:$0xff]  ;;  %v6591_v23 = vcombine.low %v566_v9, %v570_v10 }
 0x16a   :  { %3263 = vmatpush2.bf16.msra.mxu0 %v6263_v13  ;;  %v6464_v13 = vcombine.high %v438_v7, %v442_v8  ;;  %v562_v21 = vld [vmem:[#allocation3 + $0xd70] sm:$0xff] }
 0x16b   :  { %3306 = vmatpush2.bf16.msra.mxu1 %v6391_v15  ;;  %3264 = vmatprep.subr.bf16.mxu0 %v6256_v17  ;;  %v430_v15 = vld [vmem:[#allocation3 + $0x950] sm:$0xff]  ;;  %v6583_v33 = vcombine.low %v558_v20, %v562_v21 }
 0x16c   :  { %3307 = vmatprep.subr.bf16.mxu1 %v6384_v19  ;;  %v434_v17 = vld [vmem:[#allocation3 + $0x970] sm:$0xff]  ;;  %v7774_v19 = vld [vmem:[%s7932_s0] ss:$28 sps:$4 sm:$0xff]  }
 0x16d   :  { %v550_v29 = vld [vmem:[#allocation3 + $0xd10] sm:$0xff] }
 0x16e   :  { %3265 = vmatpush2.bf16.msra.mxu0 %v6255_v24  ;;  %v6456_v24 = vcombine.high %v430_v15, %v434_v17  ;;  %v554_v31 = vld [vmem:[#allocation3 + $0xd30] sm:$0xff] }
 0x16f   :  { %3308 = vmatpush2.bf16.msra.mxu1 %v6383_v25  ;;  %3266 = vmatprep.subr.bf16.mxu0 %v6248_v26  ;;  %v6584_v25 = vcombine.high %v558_v20, %v562_v21  ;;  %v422_v26 = vld [vmem:[#allocation3 + $0x910] sm:$0xff]  ;;  %v6575_v43 = vcombine.low %v550_v29, %v554_v31 }
 0x170   :  { %3309 = vmatprep.subr.bf16.mxu1 %v6376_v27  ;;  %v426_v27 = vld [vmem:[#allocation3 + $0x930] sm:$0xff] }
 0x171   :  { %v7782_v32 = vld [vmem:[%s7932_s0 + $0x14] ss:$28 sps:$4 sm:$0xff]   ;;  %v6447_v42 = vcombine.low %v422_v26, %v426_v27 }
 0x172   :  { %3267 = vmatpush2.bf16.msra.mxu0 %v6247_v34  ;;  %v6448_v34 = vcombine.high %v422_v26, %v426_v27  ;;  %v542_v38 = vld [vmem:[#allocation3 + $0xcd0] sm:$0xff]  ;;  %v7785_v26 = vpop.f32.mrf.mxu1  ;;  %v183_v27 = vld [vmem:[#allocation3 + $0x198] sm:$0xff] }
 0x173   :  { %3310 = vmatpush2.bf16.msra.mxu1 %v6375_v35  ;;  %3268 = vmatprep.subr.bf16.mxu0 %v6240_v36  ;;  %v6576_v35 = vcombine.high %v550_v29, %v554_v31  ;;  %v414_v36 = vld [vmem:[#allocation3 + $0x8d0] sm:$0xff]  ;;  %v187_v29 = vld [vmem:[#allocation3 + $0x1b8] sm:$0xff] }
 0x174   :  { %3311 = vmatprep.subr.bf16.mxu1 %v6368_v37  ;;  %v418_v37 = vld [vmem:[#allocation3 + $0x8f0] sm:$0xff] }
 0x175   :  { %v546_v40 = vld [vmem:[#allocation3 + $0xcf0] sm:$0xff]  ;;  %v6439_v16 = vcombine.low %v414_v36, %v418_v37 }
 0x176   :  { %3269 = vmatpush2.bf16.msra.mxu0 %v6239_v45  ;;  %v6440_v45 = vcombine.high %v414_v36, %v418_v37  ;;  %v534_v51 = vld [vmem:[#allocation3 + $0xc90] sm:$0xff]  ;;  %v6567_v53 = vcombine.low %v542_v38, %v546_v40  ;;  %v6210_v36 = vcombine.high %v183_v27, %v187_v29 }
 0x177   :  { %3312 = vmatpush2.bf16.msra.mxu1 %v6367_v46  ;;  %3270 = vmatprep.subr.bf16.mxu0 %v6232_v49  ;;  %v6568_v46 = vcombine.high %v542_v38, %v546_v40  ;;  %v406_v49 = vld [vmem:[#allocation3 + $0x890] sm:$0xff] }
 0x178   :  { %3313 = vmatprep.subr.bf16.mxu1 %v6360_v50  ;;  %v410_v50 = vld [vmem:[#allocation3 + $0x8b0] sm:$0xff] }
 0x179   :  { %v538_v52 = vld [vmem:[#allocation3 + $0xcb0] sm:$0xff]  ;;  %v6431_v28 = vcombine.low %v406_v49, %v410_v50 }
 0x17a   :  { %3271 = vmatpush2.bf16.msra.mxu0 %v6231_v61  ;;  %v6432_v61 = vcombine.high %v406_v49, %v410_v50  ;;  %v526_v59 = vld [vmem:[#allocation3 + $0xc50] sm:$0xff]  ;;  %v6559_v62 = vcombine.low %v534_v51, %v538_v52 }
 0x17b   :  { %3314 = vmatpush2.bf16.msra.mxu1 %v6359_v54  ;;  %3272 = vmatprep.subr.bf16.mxu0 %v6224_v56  ;;  %v6560_v54 = vcombine.high %v534_v51, %v538_v52  ;;  %v398_v56 = vld [vmem:[#allocation3 + $0x850] sm:$0xff]  ;;  %v6209_v51 = vcombine.low %v183_v27, %v187_v29 }
 0x17c   :  { %3315 = vmatprep.subr.bf16.mxu1 %v6352_v57  ;;  %v402_v57 = vld [vmem:[#allocation3 + $0x870] sm:$0xff] }
 0x17d   :  { %v530_v60 = vld [vmem:[#allocation3 + $0xc70] sm:$0xff]  ;;  %v6423_v9 = vcombine.low %v398_v56, %v402_v57 }
 0x17e   :  { %3273 = vmatpush2.bf16.msra.mxu0 %v6223_v63  ;;  %v6424_v63 = vcombine.high %v398_v56, %v402_v57  ;;  %v518_v7 = vld [vmem:[#allocation3 + $0xc10] sm:$0xff]  ;;  %v6551_v10 = vcombine.low %v526_v59, %v530_v60  ;;  %v167_v56 = vld [vmem:[#allocation3 + $0x118] sm:$0xff] }
 0x17f   :  { %3316 = vmatpush2.bf16.msra.mxu1 %v6351_v2  ;;  %3328 = vmatprep.subr.bf16.mxu0 %v6472_v3  ;;  %v6552_v2 = vcombine.high %v526_v59, %v530_v60  ;;  %v390_v3 = vld [vmem:[#allocation3 + $0x810] sm:$0xff] }
 0x180   :  { %3371 = vmatprep.subr.bf16.mxu1 %v6600_v6  ;;  %v394_v6 = vld [vmem:[#allocation3 + $0x830] sm:$0xff] }
 0x181   :  { %3275 = vmatmul.mubr.bf16.vlgmr.msra.gmra.mxu0 %v7774_v19  ;;  %v522_v8 = vld [vmem:[#allocation3 + $0xc30] sm:$0xff]  ;;  %v6415_v20 = vcombine.low %v390_v3, %v394_v6 }
 0x182   :  { %3318 = vmatmul.mubr.bf16.vlgmr.msra.gmra.mxu1 %v7726_v44  ;;  %3329 = vmatpush1.bf16.msra.mxu0 %v6471_v11  ;;  %v6455_v44 = vcombine.low %v430_v15, %v434_v17  ;;  %v6416_v11 = vcombine.high %v390_v3, %v394_v6  ;;  %v191_v15 = vld [vmem:[#allocation3 + $0x1d8] sm:$0xff]  ;;  %v6543_v21 = vcombine.low %v518_v7, %v522_v8  ;;  %v494_v37 = vld [vmem:[#allocation3 + $0xb50] sm:$0xff] }
 0x183   :  { %3372 = vmatpush1.bf16.msra.mxu1 %v6599_v12  ;;  %3330 = vmatprep.subr.bf16.mxu0 %v6464_v13  ;;  %v6544_v12 = vcombine.high %v518_v7, %v522_v8  ;;  %v510_v13 = vld [vmem:[#allocation3 + $0xbd0] sm:$0xff]  ;;  %v195_v17 = vld [vmem:[#allocation3 + $0x1f8] sm:$0xff] }
 0x184   :  { %3373 = vmatprep.subr.bf16.mxu1 %v6592_v14  ;;  %3403 = vmatprep.mubr.bf16.mxu1 %v7609_v1  ;;  %v514_v14 = vld [vmem:[#allocation3 + $0xbf0] sm:$0xff]  ;;  %v163_v8 = vld [vmem:[#allocation3 + $0xf8] sm:$0xff] }
 0x185   :  { %3360 = vmatprep.mubr.bf16.mxu0 %v7782_v32  ;;  %v6535_v31 = vcombine.low %v510_v13, %v514_v14  ;;  %v498_v38 = vld [vmem:[#allocation3 + $0xb70] sm:$0xff] }
 0x186   :  { %3331 = vmatpush1.bf16.msra.mxu0 %v6463_v22  ;;  %v6536_v22 = vcombine.high %v510_v13, %v514_v14  ;;  %v6520_v52 = vcombine.high %v494_v37, %v498_v38  ;;  %v6519_v59 = vcombine.low %v494_v37, %v498_v38  ;;  %v478_v6 = vld [vmem:[#allocation3 + $0xad0] sm:$0xff] }
 0x187   :  { %3374 = vmatpush1.bf16.msra.mxu1 %v6591_v23  ;;  %3332 = vmatprep.subr.bf16.mxu0 %v6456_v24  ;;  %v6218_v23 = vcombine.high %v191_v15, %v195_v17  ;;  %v502_v24 = vld [vmem:[#allocation3 + $0xb90] sm:$0xff] }
 0x188   :  { %3375 = vmatprep.subr.bf16.mxu1 %v6584_v25  ;;  %v506_v25 = vld [vmem:[#allocation3 + $0xbb0] sm:$0xff] }
 0x189   :  { %v482_v7 = vld [vmem:[#allocation3 + $0xaf0] sm:$0xff] }
 0x18a   :  { %3333 = vmatpush1.bf16.msra.mxu0 %v6455_v44  ;;  %v7787_v44 = vpop.f32.mrf.mxu0  ;;  %v462_v29 = vld [vmem:[#allocation3 + $0xa50] sm:$0xff] }
 0x18b   :  { %3376 = vmatpush1.bf16.msra.mxu1 %v6583_v33  ;;  %3334 = vmatprep.subr.bf16.mxu0 %v6448_v34  ;;  %v3061_v33 = vpop.f32.mrf.mxu1  ;;  %v6217_v34 = vcombine.low %v191_v15, %v195_v17  ;;  %v470_v15 = vld [vmem:[#allocation3 + $0xa90] sm:$0xff] }
 0x18c   :  { %3377 = vmatprep.subr.bf16.mxu1 %v6576_v35  ;;  %v6528_v35 = vcombine.high %v502_v24, %v506_v25  ;;  %v474_v17 = vld [vmem:[#allocation3 + $0xab0] sm:$0xff] }
 0x18d   :  { %v7791_v49 = vpop.f32.mrf.mxu1 }
 0x18e   :  { %3335 = vmatpush1.bf16.msra.mxu0 %v6447_v42  ;;  %v175_v42 = vld [vmem:[#allocation3 + $0x158] sm:$0xff] }
 0x18f   :  { %3378 = vmatpush1.bf16.msra.mxu1 %v6575_v43  ;;  %3336 = vmatprep.subr.bf16.mxu0 %v6440_v45  ;;  %v179_v43 = vld [vmem:[#allocation3 + $0x178] sm:$0xff]  ;;  %v3065_v60 = vpop.f32.mrf.mxu1 }
 0x190   :  { %3379 = vmatprep.subr.bf16.mxu1 %v6568_v46  ;;  %v6527_v46 = vcombine.low %v502_v24, %v506_v25  ;;  %v6496_v25 = vcombine.high %v470_v15, %v474_v17 }
 0x192   :  { %3337 = vmatpush1.bf16.msra.mxu0 %v6439_v16 }
 0x193   :  { %3380 = vmatpush1.bf16.msra.mxu1 %v6567_v53  ;;  %3338 = vmatprep.subr.bf16.mxu0 %v6432_v61  ;;  %v6202_v53 = vcombine.high %v175_v42, %v179_v43  ;;  %v486_v61 = vld [vmem:[#allocation3 + $0xb10] sm:$0xff] }
 0x194   :  { %3381 = vmatprep.subr.bf16.mxu1 %v6560_v54  ;;  %v490_v54 = vld [vmem:[#allocation3 + $0xb30] sm:$0xff] }
 0x196   :  { %3339 = vmatpush1.bf16.msra.mxu0 %v6431_v28  ;;  %v6201_v28 = vcombine.low %v175_v42, %v179_v43  ;;  %v458_v42 = vld [vmem:[#allocation3 + $0xa30] sm:$0xff]  ;;  %v135_v43 = vld [vmem:[#allocation3 + $0x18] sm:$0xff] }
 0x197   :  { %3382 = vmatpush1.bf16.msra.mxu1 %v6559_v62  ;;  %3340 = vmatprep.subr.bf16.mxu0 %v6424_v63  ;;  %v6512_v62 = vcombine.high %v486_v61, %v490_v54 }
 0x198   :  { %3383 = vmatprep.subr.bf16.mxu1 %v6552_v2 }
 0x19a   :  { %3341 = vmatpush1.bf16.msra.mxu0 %v6423_v9 }
 0x19b   :  { %3384 = vmatpush1.bf16.msra.mxu1 %v6551_v10  ;;  %3342 = vmatprep.subr.bf16.mxu0 %v6416_v11  ;;  %v6504_v11 = vcombine.high %v478_v6, %v482_v7 }
 0x19c   :  { %3385 = vmatprep.subr.bf16.mxu1 %v6544_v12 }
 0x19e   :  { %3343 = vmatpush1.bf16.msra.mxu0 %v6415_v20  ;;  %v151_v20 = vld [vmem:[#allocation3 + $0x98] sm:$0xff] }
 0x19f   :  { %3386 = vmatpush1.bf16.msra.mxu1 %v6543_v21  ;;  %3344 = vmatprep.subr.bf16.mxu0 %v6536_v22  ;;  %v155_v21 = vld [vmem:[#allocation3 + $0xb8] sm:$0xff] }
 0x1a0   :  { %3414 = vmatprep.subr.bf16.mxu1 %v6218_v23  ;;  %v6503_v23 = vcombine.low %v478_v6, %v482_v7  ;;  %v6178_v27 = vcombine.high %v151_v20, %v155_v21 }
 0x1a1   :  { %v3018_v40 = vpop.f32.mrf.mxu0 }
 0x1a2   :  { %v3019_v45 = vadd.f32 %v3018_v40, %v7765_v4  ;;  %3404 = vmatmul.mubr.bf16.vlgmr.msra.gmra.mxu1 %v7733_v47  ;;  %3345 = vmatpush2.bf16.msra.mxu0 %v6535_v31  ;;  %v171_v47 = vld [vmem:[#allocation3 + $0x138] sm:$0xff]  ;;  %v466_v31 = vld [vmem:[#allocation3 + $0xa70] sm:$0xff] }
 0x1a3   :  { %3415 = vmatpush1.bf16.msra.mxu1 %v6217_v34  ;;  %v7793_v50 = vpop.f32.mrf.mxu0  ;;  %3346 = vmatprep.subr.bf16.mxu0 %v6528_v35  ;;  %v6194_v3 = vcombine.high %v167_v56, %v171_v47  ;;  %v6193_v10 = vcombine.low %v167_v56, %v171_v47  ;;  %v147_v34 = vld [vmem:[#allocation3 + $0x78] sm:$0xff]  ;;  %v6495_v35 = vcombine.low %v470_v15, %v474_v17  ;;  %v454_v40 = vld [vmem:[#allocation3 + $0xa10] sm:$0xff] }
 0x1a4   :  { %v3062_v16 = vadd.f32 %v3061_v33, %v3019_v45  ;;  %3416 = vmatprep.subr.bf16.mxu1 %v6210_v36  ;;  %3446 = vmatprep.mubr.bf16.mxu1 %v7745_v58  ;;  %v159_v58 = vld [vmem:[#allocation3 + $0xd8] sm:$0xff]  ;;  %v6177_v36 = vcombine.low %v151_v20, %v155_v21  ;;  %v6488_v37 = vcombine.high %v462_v29, %v466_v31 }
 0x1a5   :  { %v3022_v4 = vpop.f32.mrf.mxu0  ;;  %v6186_v14 = vcombine.high %v159_v58, %v163_v8  ;;  %v6185_v24 = vcombine.low %v159_v58, %v163_v8  ;;  %v143_v33 = vld [vmem:[#allocation3 + $0x58] sm:$0xff]  ;;  %v6479_v56 = vcombine.low %v454_v40, %v458_v42 }
 0x1a6   :  { %v3023_v57 = vadd.f32 %v3022_v4, %v7769_v18  ;;  %3347 = vmatpush2.bf16.msra.mxu0 %v6527_v46  ;;  %v3602_v63 = vmul.f32 0.2, %v3062_v16  ;;  %vm3586_vm0 = vcmp.gt.f32.partialorder %v3062_v16, 0.0  ;;  %v6511_v18 = vcombine.low %v486_v61, %v490_v54  ;;  %v139_v45 = vld [vmem:[#allocation3 + $0x38] sm:$0xff] }
 0x1a7   :  { %3417 = vmatpush1.bf16.msra.mxu1 %v6209_v51  ;;  %3348 = vmatprep.subr.bf16.mxu0 %v6520_v52  ;;  %v6170_v38 = vcombine.high %v143_v33, %v147_v34  ;;  %v6487_v46 = vcombine.low %v462_v29, %v466_v31  ;;  %v6169_v51 = vcombine.low %v143_v33, %v147_v34  ;;  %v323_v61 = vld [vmem:[#allocation3 + $0x5f8] sm:$0xff] }
 0x1a8   :  { %v3066_v2 = vadd.f32 %v3065_v60, %v3023_v57  ;;  %3418 = vmatprep.subr.bf16.mxu1 %v6202_v53  ;;  %v3618_v12 = vsel %vm3586_vm0, %v3062_v16, %v3602_v63  ;;  %v6480_v52 = vcombine.high %v454_v40, %v458_v42  ;;  %v6162_v16 = vcombine.high %v135_v43, %v139_v45  ;;  %v319_v53 = vld [vmem:[#allocation3 + $0x5d8] sm:$0xff] }
 0x1a9   :  { %v255_v54 = vld [vmem:[#allocation3 + $0x3d8] sm:$0xff]  ;;  %v6161_v47 = vcombine.low %v135_v43, %v139_v45  ;;  %v6346_v57 = vcombine.high %v319_v53, %v323_v61 }
 0x1aa   :  { %vm3594_vm1 = vcmp.gt.f32.partialorder %v3066_v2, 0.0  ;;  %v3610_v9 = vmul.f32 0.2, %v3066_v2  ;;  %3349 = vmatpush2.bf16.msra.mxu0 %v6519_v59  ;;  %v259_v4 = vld [vmem:[#allocation3 + $0x3f8] sm:$0xff] }
 0x1ab   :  { %3419 = vmatpush1.bf16.msra.mxu1 %v6201_v28  ;;  %3350 = vmatprep.subr.bf16.mxu0 %v6512_v62  ;;  %v6282_v59 = vcombine.high %v255_v54, %v259_v4  ;;  %v311_v60 = vld [vmem:[#allocation3 + $0x598] sm:$0xff] }
 0x1ac   :  { %v3626_v13 = vsel %vm3594_vm1, %v3066_v2, %v3610_v9  ;;  %3420 = vmatprep.subr.bf16.mxu1 %v6194_v3  ;;  %v315_v28 = vld [vmem:[#allocation3 + $0x5b8] sm:$0xff]  ;;  %v6345_v2 = vcombine.low %v319_v53, %v323_v61  ;;  %v6281_v3 = vcombine.low %v255_v54, %v259_v4 }
 0x1ad   :  { %v7797_v22 = vpack.c.bf16 %v3626_v13, %v3618_v12  ;;  %v247_v62 = vld [vmem:[#allocation3 + $0x398] sm:$0xff]  ;;  %v6338_v6 = vcombine.high %v311_v60, %v315_v28 }
 0x1ae   :  { %3351 = vmatpush2.bf16.msra.mxu0 %v6511_v18  ;;  %v251_v63 = vld [vmem:[#allocation3 + $0x3b8] sm:$0xff] }
 0x1af   :  { %3421 = vmatpush1.bf16.msra.mxu1 %v6193_v10  ;;  %3352 = vmatprep.subr.bf16.mxu0 %v6504_v11  ;;  %v6274_v7 = vcombine.high %v247_v62, %v251_v63  ;;  %v303_v58 = vld [vmem:[#allocation3 + $0x558] sm:$0xff]  ;;  %v6337_v10 = vcombine.low %v311_v60, %v315_v28  ;;  %v6273_v11 = vcombine.low %v247_v62, %v251_v63  ;;  %v7801_v62 = vpop.f32.mrf.mxu1 }
 0x1b0   :  { %3422 = vmatprep.subr.bf16.mxu1 %v6186_v14  ;;  %v307_v8 = vld [vmem:[#allocation3 + $0x578] sm:$0xff] }
 0x1b1   :  { %v239_v9 = vld [vmem:[#allocation3 + $0x358] sm:$0xff]  ;;  %v6330_v12 = vcombine.high %v303_v58, %v307_v8  ;;  %v6329_v21 = vcombine.low %v303_v58, %v307_v8 }
 0x1b2   :  { %3353 = vmatpush2.bf16.msra.mxu0 %v6503_v23  ;;  %v243_v18 = vld [vmem:[#allocation3 + $0x378] sm:$0xff] }
 0x1b3   :  { %3423 = vmatpush1.bf16.msra.mxu1 %v6185_v24  ;;  %3354 = vmatprep.subr.bf16.mxu0 %v6496_v25  ;;  %v6266_v13 = vcombine.high %v239_v9, %v243_v18  ;;  %v295_v14 = vld [vmem:[#allocation3 + $0x518] sm:$0xff] }
 0x1b4   :  { %3424 = vmatprep.subr.bf16.mxu1 %v6178_v27  ;;  %v299_v15 = vld [vmem:[#allocation3 + $0x538] sm:$0xff] }
 0x1b5   :  { %v231_v17 = vld [vmem:[#allocation3 + $0x318] sm:$0xff]  ;;  %v6322_v23 = vcombine.high %v295_v14, %v299_v15  ;;  %v6321_v31 = vcombine.low %v295_v14, %v299_v15 }
 0x1b6   :  { %3355 = vmatpush2.bf16.msra.mxu0 %v6495_v35  ;;  %v235_v20 = vld [vmem:[#allocation3 + $0x338] sm:$0xff] }
 0x1b7   :  { %3425 = vmatpush1.bf16.msra.mxu1 %v6177_v36  ;;  %3356 = vmatprep.subr.bf16.mxu0 %v6488_v37  ;;  %v6258_v24 = vcombine.high %v231_v17, %v235_v20  ;;  %v287_v25 = vld [vmem:[#allocation3 + $0x4d8] sm:$0xff]  ;;  %v6257_v33 = vcombine.low %v231_v17, %v235_v20 }
 0x1b8   :  { %3426 = vmatprep.subr.bf16.mxu1 %v6170_v38  ;;  %v223_v27 = vld [vmem:[#allocation3 + $0x2d8] sm:$0xff] }
 0x1b9   :  { %v227_v29 = vld [vmem:[#allocation3 + $0x2f8] sm:$0xff] }
 0x1ba   :  { %3357 = vmatpush2.bf16.msra.mxu0 %v6487_v46  ;;  %v6250_v35 = vcombine.high %v223_v27, %v227_v29  ;;  %v279_v36 = vld [vmem:[#allocation3 + $0x498] sm:$0xff]  ;;  %v6249_v43 = vcombine.low %v223_v27, %v227_v29 }
 0x1bb   :  { %3427 = vmatpush1.bf16.msra.mxu1 %v6169_v51  ;;  %3358 = vmatprep.subr.bf16.mxu0 %v6480_v52  ;;  %v283_v37 = vld [vmem:[#allocation3 + $0x4b8] sm:$0xff] }
 0x1bc   :  { %3428 = vmatprep.subr.bf16.mxu1 %v6162_v16  ;;  %v215_v38 = vld [vmem:[#allocation3 + $0x298] sm:$0xff]  ;;  %v6306_v45 = vcombine.high %v279_v36, %v283_v37  ;;  %v6305_v61 = vcombine.low %v279_v36, %v283_v37 }
 0x1bd   :  { %v219_v40 = vld [vmem:[#allocation3 + $0x2b8] sm:$0xff] }
 0x1be   :  { %3359 = vmatpush2.bf16.msra.mxu0 %v6479_v56  ;;  %v6242_v46 = vcombine.high %v215_v38, %v219_v40  ;;  %v271_v51 = vld [vmem:[#allocation3 + $0x458] sm:$0xff]  ;;  %v6241_v54 = vcombine.low %v215_v38, %v219_v40 }
 0x1bf   :  { %3429 = vmatpush1.bf16.msra.mxu1 %v6161_v47  ;;  %3457 = vmatprep.subr.bf16.mxu0 %v6346_v57  ;;  %v275_v52 = vld [vmem:[#allocation3 + $0x478] sm:$0xff] }
 0x1c0   :  { %3430 = vmatprep.subr.bf16.mxu1 %v6282_v59  ;;  %v207_v16 = vld [vmem:[#allocation3 + $0x258] sm:$0xff]  ;;  %v6298_v4 = vcombine.high %v271_v51, %v275_v52  ;;  %v6297_v28 = vcombine.low %v271_v51, %v275_v52 }
 0x1c1   :  { %3361 = vmatmul.mubr.bf16.vlgmr.msra.gmra.mxu0 %v7739_v48  ;;  %v6265_v48 = vcombine.low %v239_v9, %v243_v18  ;;  %v211_v53 = vld [vmem:[#allocation3 + $0x278] sm:$0xff] }
 0x1c2   :  { %3458 = vmatpush1.bf16.msra.mxu0 %v6345_v2  ;;  %3489 = vmatprep.mubr.bf16.mxu0 %v7751_v55  ;;  %v291_v55 = vld [vmem:[#allocation3 + $0x4f8] sm:$0xff]  ;;  %v6234_v56 = vcombine.high %v207_v16, %v211_v53  ;;  %v6233_v63 = vcombine.low %v207_v16, %v211_v53  ;;  %v3104_v8 = vpop.f32.mrf.mxu1 }
 0x1c3   :  { %3431 = vmatpush2.bf16.msra.mxu1 %v6281_v3  ;;  %3459 = vmatprep.subr.bf16.mxu0 %v6338_v6  ;;  %v6314_v34 = vcombine.high %v287_v25, %v291_v55  ;;  %v6313_v42 = vcombine.low %v287_v25, %v291_v55  ;;  %v263_v47 = vld [vmem:[#allocation3 + $0x418] sm:$0xff]  ;;  %v592_v3 = vsub.s32 2, %v7754_v30 }
 0x1c4   :  { %3432 = vmatprep.subr.bf16.mxu1 %v6274_v7  ;;  %v267_v57 = vld [vmem:[#allocation3 + $0x438] sm:$0xff]  ;;  %v7807_v20 = vpop.f32.mrf.mxu1 }
 0x1c5   :  { %v199_v59 = vld [vmem:[#allocation3 + $0x218] sm:$0xff]  ;;  %v6290_v2 = vcombine.high %v263_v47, %v267_v57 }
 0x1c6   :  { %3460 = vmatpush1.bf16.msra.mxu0 %v6337_v10  ;;  %v203_v60 = vld [vmem:[#allocation3 + $0x238] sm:$0xff]  ;;  %v6289_v10 = vcombine.low %v263_v47, %v267_v57 }
 0x1c7   :  { %3433 = vmatpush2.bf16.msra.mxu1 %v6273_v11  ;;  %3461 = vmatprep.subr.bf16.mxu0 %v6330_v12  ;;  %v6226_v6 = vcombine.high %v199_v59, %v203_v60  ;;  %v383_v7 = vld [vmem:[#allocation3 + $0x7d8] sm:$0xff]  ;;  %v6225_v11 = vcombine.low %v199_v59, %v203_v60 }
 0x1c8   :  { %3434 = vmatprep.subr.bf16.mxu1 %v6266_v13  ;;  %v387_v58 = vld [vmem:[#allocation3 + $0x7f8] sm:$0xff]  ;;  %v593_v13 = vrot.slane %v7759_v41, %v592_v3 }
 0x1c9   :  { %v447_v9 = vld [vmem:[#allocation3 + $0x9d8] sm:$0xff]  ;;  %v6410_v12 = vcombine.high %v383_v7, %v387_v58 }
 0x1ca   :  { %3462 = vmatpush1.bf16.msra.mxu0 %v6329_v21  ;;  %v451_v18 = vld [vmem:[#allocation3 + $0x9f8] sm:$0xff]  ;;  %v3105_v27 = vadd.f32 %v3104_v8, %v593_v13 }
 0x1cb   :  { %3435 = vmatpush2.bf16.msra.mxu1 %v6265_v48  ;;  %3463 = vmatprep.subr.bf16.mxu0 %v6322_v23  ;;  %v6474_v14 = vcombine.high %v447_v9, %v451_v18  ;;  %v375_v15 = vld [vmem:[#allocation3 + $0x798] sm:$0xff]  ;;  %v6409_v23 = vcombine.low %v383_v7, %v387_v58  ;;  %v6473_v25 = vcombine.low %v447_v9, %v451_v18 }
 0x1cc   :  { %3436 = vmatprep.subr.bf16.mxu1 %v6258_v24  ;;  %v379_v17 = vld [vmem:[#allocation3 + $0x7b8] sm:$0xff]  ;;  %v7809_v24 = vpop.f32.mrf.mxu0 }
 0x1cd   :  { %v439_v21 = vld [vmem:[#allocation3 + $0x998] sm:$0xff]  ;;  %v6402_v55 = vcombine.high %v375_v15, %v379_v17  ;;  %v6401_v38 = vcombine.low %v375_v15, %v379_v17 }
 0x1ce   :  { %3464 = vmatpush1.bf16.msra.mxu0 %v6321_v31  ;;  %v443_v48 = vld [vmem:[#allocation3 + $0x9b8] sm:$0xff] }
 0x1cf   :  { %3437 = vmatpush2.bf16.msra.mxu1 %v6257_v33  ;;  %3465 = vmatprep.subr.bf16.mxu0 %v6314_v34  ;;  %v6466_v29 = vcombine.high %v439_v21, %v443_v48  ;;  %v367_v41 = vld [vmem:[#allocation3 + $0x758] sm:$0xff]  ;;  %v3108_v33 = vpop.f32.mrf.mxu1 }
 0x1d0   :  { %3438 = vmatprep.subr.bf16.mxu1 %v6250_v35  ;;  %v371_v31 = vld [vmem:[#allocation3 + $0x778] sm:$0xff] }
 0x1d1   :  { %v431_v35 = vld [vmem:[#allocation3 + $0x958] sm:$0xff] }
 0x1d2   :  { %3466 = vmatpush1.bf16.msra.mxu0 %v6313_v42  ;;  %v435_v36 = vld [vmem:[#allocation3 + $0x978] sm:$0xff]  ;;  %v6465_v42 = vcombine.low %v439_v21, %v443_v48 }
 0x1d3   :  { %3439 = vmatpush2.bf16.msra.mxu1 %v6249_v43  ;;  %3467 = vmatprep.subr.bf16.mxu0 %v6306_v45  ;;  %v6394_v43 = vcombine.high %v367_v41, %v371_v31  ;;  %v3109_v45 = vadd.f32 %v3108_v33, %v593_v13  ;;  %v359_v51 = vld [vmem:[#allocation3 + $0x718] sm:$0xff] }
 0x1d4   :  { %3440 = vmatprep.subr.bf16.mxu1 %v6242_v46  ;;  %v6458_v46 = vcombine.high %v431_v35, %v435_v36  ;;  %v363_v52 = vld [vmem:[#allocation3 + $0x738] sm:$0xff] }
 0x1d5   :  { %v423_v53 = vld [vmem:[#allocation3 + $0x918] sm:$0xff] }
 0x1d6   :  { %3468 = vmatpush1.bf16.msra.mxu0 %v6305_v61  ;;  %v427_v61 = vld [vmem:[#allocation3 + $0x938] sm:$0xff] }
 0x1d7   :  { %3441 = vmatpush2.bf16.msra.mxu1 %v6241_v54  ;;  %3469 = vmatprep.subr.bf16.mxu0 %v6298_v4  ;;  %v6457_v4 = vcombine.low %v431_v35, %v435_v36  ;;  %v6450_v47 = vcombine.high %v423_v53, %v427_v61  ;;  %v351_v57 = vld [vmem:[#allocation3 + $0x6d8] sm:$0xff] }
 0x1d8   :  { %3442 = vmatprep.subr.bf16.mxu1 %v6234_v56  ;;  %v6386_v56 = vcombine.high %v359_v51, %v363_v52  ;;  %v355_v59 = vld [vmem:[#allocation3 + $0x6f8] sm:$0xff] }
 0x1d9   :  { %v415_v60 = vld [vmem:[#allocation3 + $0x8d8] sm:$0xff]  ;;  %v6377_v18 = vcombine.low %v351_v57, %v355_v59 }
 0x1da   :  { %3470 = vmatpush1.bf16.msra.mxu0 %v6297_v28  ;;  %v419_v28 = vld [vmem:[#allocation3 + $0x8f8] sm:$0xff] }
 0x1db   :  { %3443 = vmatpush2.bf16.msra.mxu1 %v6233_v63  ;;  %3471 = vmatprep.subr.bf16.mxu0 %v6290_v2  ;;  %v6385_v63 = vcombine.low %v359_v51, %v363_v52  ;;  %v6378_v2 = vcombine.high %v351_v57, %v355_v59  ;;  %v343_v7 = vld [vmem:[#allocation3 + $0x698] sm:$0xff]  ;;  %v7821_v59 = vpop.f32.mrf.mxu1 }
 0x1dc   :  { %3444 = vmatprep.subr.bf16.mxu1 %v6226_v6  ;;  %v6442_v6 = vcombine.high %v415_v60, %v419_v28  ;;  %v347_v58 = vld [vmem:[#allocation3 + $0x6b8] sm:$0xff] }
 0x1dd   :  { %v407_v8 = vld [vmem:[#allocation3 + $0x898] sm:$0xff]  ;;  %v6369_v21 = vcombine.low %v343_v7, %v347_v58 }
 0x1de   :  { %3472 = vmatpush1.bf16.msra.mxu0 %v6289_v10  ;;  %v411_v9 = vld [vmem:[#allocation3 + $0x8b8] sm:$0xff]  ;;  %v6441_v10 = vcombine.low %v415_v60, %v419_v28 }
 0x1df   :  { %3445 = vmatpush2.bf16.msra.mxu1 %v6225_v11  ;;  %3473 = vmatprep.subr.bf16.mxu0 %v6410_v12  ;;  %v6370_v11 = vcombine.high %v343_v7, %v347_v58  ;;  %v6434_v12 = vcombine.high %v407_v8, %v411_v9  ;;  %v335_v13 = vld [vmem:[#allocation3 + $0x658] sm:$0xff]  ;;  %v6433_v48 = vcombine.low %v407_v8, %v411_v9 }
 0x1e0   :  { %3500 = vmatprep.subr.bf16.mxu1 %v6474_v14  ;;  %v339_v14 = vld [vmem:[#allocation3 + $0x678] sm:$0xff] }
 0x1e1   :  { %v3147_v34 = vpop.f32.mrf.mxu0  ;;  %v399_v15 = vld [vmem:[#allocation3 + $0x858] sm:$0xff] }
 0x1e2   :  { %v7811_v37 = vadd.f32 %v3147_v34, %v3105_v27  ;;  %3447 = vmatmul.mubr.bf16.vlgmr.msra.gmra.mxu1 %v7774_v19  ;;  %3474 = vmatpush2.bf16.msra.mxu0 %v6409_v23  ;;  %v6393_v19 = vcombine.low %v367_v41, %v371_v31  ;;  %v403_v17 = vld [vmem:[#allocation3 + $0x878] sm:$0xff]  ;;  %v6362_v23 = vcombine.high %v335_v13, %v339_v14 }
 0x1e3   :  { %3501 = vmatpush1.bf16.msra.mxu1 %v6473_v25  ;;  %v7814_v40 = vpop.f32.mrf.mxu0  ;;  %3475 = vmatprep.subr.bf16.mxu0 %v6402_v55  ;;  %v6426_v25 = vcombine.high %v399_v15, %v403_v17  ;;  %v327_v55 = vld [vmem:[#allocation3 + $0x618] sm:$0xff]  ;;  %v6361_v31 = vcombine.low %v335_v13, %v339_v14  ;;  %v6425_v33 = vcombine.low %v399_v15, %v403_v17 }
 0x1e4   :  { %3502 = vmatprep.subr.bf16.mxu1 %v6466_v29  ;;  %3532 = vmatprep.mubr.bf16.mxu1 %v7782_v32  ;;  %v6449_v32 = vcombine.low %v423_v53, %v427_v61  ;;  %v331_v27 = vld [vmem:[#allocation3 + $0x638] sm:$0xff] }
 0x1e5   :  { %v3151_v16 = vpop.f32.mrf.mxu0  ;;  %v391_v29 = vld [vmem:[#allocation3 + $0x818] sm:$0xff]  ;;  %v6354_v34 = vcombine.high %v327_v55, %v331_v27 }
 0x1e6   :  { %v7817_v54 = vadd.f32 %v3151_v16, %v3109_v45  ;;  %3476 = vmatpush2.bf16.msra.mxu0 %v6401_v38  ;;  %v395_v41 = vld [vmem:[#allocation3 + $0x838] sm:$0xff]  ;;  %v6353_v45 = vcombine.low %v327_v55, %v331_v27 }
 0x1e7   :  { %3503 = vmatpush1.bf16.msra.mxu1 %v6465_v42  ;;  %3477 = vmatprep.subr.bf16.mxu0 %v6394_v43  ;;  %v6418_v35 = vcombine.high %v391_v29, %v395_v41  ;;  %v575_v36 = vld [vmem:[#allocation3 + $0xdd8] sm:$0xff] }
 0x1e8   :  { %3504 = vmatprep.subr.bf16.mxu1 %v6458_v46  ;;  %v579_v38 = vld [vmem:[#allocation3 + $0xdf8] sm:$0xff]  ;;  %v6417_v46 = vcombine.low %v391_v29, %v395_v41 }
 0x1e9   :  { %v511_v42 = vld [vmem:[#allocation3 + $0xbd8] sm:$0xff]  ;;  %v6602_v51 = vcombine.high %v575_v36, %v579_v38 }
 0x1ea   :  { %3478 = vmatpush2.bf16.msra.mxu0 %v6393_v19  ;;  %v515_v43 = vld [vmem:[#allocation3 + $0xbf8] sm:$0xff] }
 0x1eb   :  { %3505 = vmatpush1.bf16.msra.mxu1 %v6457_v4  ;;  %3479 = vmatprep.subr.bf16.mxu0 %v6386_v56  ;;  %v6538_v52 = vcombine.high %v511_v42, %v515_v43  ;;  %v567_v16 = vld [vmem:[#allocation3 + $0xd98] sm:$0xff]  ;;  %v6601_v4 = vcombine.low %v575_v36, %v579_v38  ;;  %v7819_v56 = vpop.f32.mrf.mxu0 }
 0x1ec   :  { %3506 = vmatprep.subr.bf16.mxu1 %v6450_v47  ;;  %v571_v53 = vld [vmem:[#allocation3 + $0xdb8] sm:$0xff]  ;;  %v6537_v47 = vcombine.low %v511_v42, %v515_v43  ;;  %v7837_v43 = vld [vmem:[#allocation5] sm:$0xff] }
 0x1ed   :  { %v503_v61 = vld [vmem:[#allocation3 + $0xb98] sm:$0xff]  ;;  %v6594_v57 = vcombine.high %v567_v16, %v571_v53  ;;  %v6593_v8 = vcombine.low %v567_v16, %v571_v53 }
 0x1ee   :  { %3480 = vmatpush2.bf16.msra.mxu0 %v6385_v63  ;;  %v507_v19 = vld [vmem:[#allocation3 + $0xbb8] sm:$0xff] }
 0x1ef   :  { %3507 = vmatpush1.bf16.msra.mxu1 %v6449_v32  ;;  %3481 = vmatprep.subr.bf16.mxu0 %v6378_v2  ;;  %v6530_v60 = vcombine.high %v503_v61, %v507_v19  ;;  %v559_v28 = vld [vmem:[#allocation3 + $0xd58] sm:$0xff]  ;;  %v7444_v2 = vld [vmem:[%s7932_s0 + $0x8] ss:$28 sps:$4 sm:$0xff]  }
 0x1f0   :  { %3508 = vmatprep.subr.bf16.mxu1 %v6442_v6  ;;  %v563_v63 = vld [vmem:[#allocation3 + $0xd78] sm:$0xff] }
 0x1f1   :  { %v495_v6 = vld [vmem:[#allocation3 + $0xb58] sm:$0xff] }
 0x1f2   :  { %3482 = vmatpush2.bf16.msra.mxu0 %v6377_v18  ;;  %v499_v7 = vld [vmem:[#allocation3 + $0xb78] sm:$0xff]  ;;  %v6529_v18 = vcombine.low %v503_v61, %v507_v19 }
 0x1f3   :  { %3509 = vmatpush1.bf16.msra.mxu1 %v6441_v10  ;;  %3483 = vmatprep.subr.bf16.mxu0 %v6370_v11  ;;  %v6586_v10 = vcombine.high %v559_v28, %v563_v63  ;;  %v6522_v13 = vcombine.high %v495_v6, %v499_v7  ;;  %v551_v14 = vld [vmem:[#allocation3 + $0xd18] sm:$0xff]  ;;  %v6521_v55 = vcombine.low %v495_v6, %v499_v7 }
 0x1f4   :  { %3510 = vmatprep.subr.bf16.mxu1 %v6434_v12  ;;  %v555_v15 = vld [vmem:[#allocation3 + $0xd38] sm:$0xff] }
 0x1f5   :  { %v6578_v27 = vcombine.high %v551_v14, %v555_v15  ;;  %v479_v38 = vld [vmem:[#allocation3 + $0xad8] sm:$0xff] }
 0x1f6   :  { %3484 = vmatpush2.bf16.msra.mxu0 %v6369_v21  ;;  %v487_v21 = vld [vmem:[#allocation3 + $0xb18] sm:$0xff] }
 0x1f7   :  { %3511 = vmatpush1.bf16.msra.mxu1 %v6433_v48  ;;  %3485 = vmatprep.subr.bf16.mxu0 %v6362_v23  ;;  %v491_v48 = vld [vmem:[#allocation3 + $0xb38] sm:$0xff]  ;;  %v7833_v23 = vsub.s32 1, %v7754_v30 }
 0x1f8   :  { %3512 = vmatprep.subr.bf16.mxu1 %v6426_v25  ;;  %v6514_v41 = vcombine.high %v487_v21, %v491_v48  ;;  %v483_v42 = vld [vmem:[#allocation3 + $0xaf8] sm:$0xff] }
 0x1f9   :  { %v6506_v53 = vcombine.high %v479_v38, %v483_v42  ;;  %v535_v61 = vld [vmem:[#allocation3 + $0xc98] sm:$0xff]  ;;  %v6505_v6 = vcombine.low %v479_v38, %v483_v42 }
 0x1fa   :  { %3486 = vmatpush2.bf16.msra.mxu0 %v6361_v31  ;;  %v543_v31 = vld [vmem:[#allocation3 + $0xcd8] sm:$0xff] }
 0x1fb   :  { %3513 = vmatpush1.bf16.msra.mxu1 %v6425_v33  ;;  %3487 = vmatprep.subr.bf16.mxu0 %v6354_v34  ;;  %v547_v33 = vld [vmem:[#allocation3 + $0xcf8] sm:$0xff]  ;;  %v596_v34 = vsub.s32 3, %v7754_v30 }
 0x1fc   :  { %3514 = vmatprep.subr.bf16.mxu1 %v6418_v35  ;;  %v539_v19 = vld [vmem:[#allocation3 + $0xcb8] sm:$0xff] }
 0x1fd   :  { %v6562_v7 = vcombine.high %v535_v61, %v539_v19 }
 0x1fe   :  { %3488 = vmatpush2.bf16.msra.mxu0 %v6353_v45  ;;  %v6577_v45 = vcombine.low %v551_v14, %v555_v15  ;;  %v463_v14 = vld [vmem:[#allocation3 + $0xa58] sm:$0xff] }
 0x1ff   :  { %3515 = vmatpush1.bf16.msra.mxu1 %v6417_v46  ;;  %3543 = vmatprep.subr.bf16.mxu0 %v6602_v51  ;;  %v6513_v51 = vcombine.low %v487_v21, %v491_v48  ;;  %v467_v15 = vld [vmem:[#allocation3 + $0xa78] sm:$0xff]  ;;  %v6561_v48 = vcombine.low %v535_v61, %v539_v19 }
 0x200   :  { %3516 = vmatprep.subr.bf16.mxu1 %v6538_v52  ;;  %v6570_v52 = vcombine.high %v543_v31, %v547_v33  ;;  %v6958_v19 = vld [vmem:[#allocation7 + $0xc4] ss:$16 sps:$4 sm:$0xff]  }
 0x201   :  { %v3233_v32 = vpop.f32.mrf.mxu0  ;;  %3490 = vmatmul.mubr.bf16.vlgmr.msra.gmra.mxu0 %v7444_v2  ;;  %v6569_v2 = vcombine.low %v543_v31, %v547_v33  ;;  %v6489_v33 = vcombine.low %v463_v14, %v467_v15 }
 0x202   :  { %v3190_v58 = vpop.f32.mrf.mxu1  ;;  %3544 = vmatpush1.bf16.msra.mxu0 %v6601_v4  ;;  %3575 = vmatprep.mubr.bf16.mxu0 %v7609_v1  ;;  %v597_v4 = vrot.slane %v7837_v43, %v596_v34 }
 0x203   :  { %v3191_v9 = vadd.f32 %v3190_v58, %v7811_v37  ;;  %3517 = vmatpush2.bf16.msra.mxu1 %v6537_v47  ;;  %3545 = vmatprep.subr.bf16.mxu0 %v6594_v57  ;;  %v7830_v12 = vpop.f32.mrf.mxu0  ;;  %v6585_v37 = vcombine.low %v559_v28, %v563_v63  ;;  %v475_v28 = vld [vmem:[#allocation3 + $0xab8] sm:$0xff] }
 0x204   :  { %v7828_v11 = vpop.f32.mrf.mxu1  ;;  %3518 = vmatprep.subr.bf16.mxu1 %v6530_v60  ;;  %v471_v60 = vld [vmem:[#allocation3 + $0xa98] sm:$0xff] }
 0x205   :  { %v3234_v17 = vadd.f32 %v3233_v32, %v3191_v9  ;;  %v3237_v29 = vpop.f32.mrf.mxu0  ;;  %v6498_v9 = vcombine.high %v471_v60, %v475_v28  ;;  %v6497_v21 = vcombine.low %v471_v60, %v475_v28  ;;  %v6961_v60 = vld [vmem:[#allocation7 + $0x2c4] ss:$16 sps:$4 sm:$0xff]  }
 0x206   :  { %v3194_v1 = vpop.f32.mrf.mxu1  ;;  %3546 = vmatpush1.bf16.msra.mxu0 %v6593_v8  ;;  %v7447_v28 = vld [vmem:[%s7932_s0 + $0x10] ss:$28 sps:$4 sm:$0xff]  }
 0x207   :  { %v3195_v25 = vadd.f32 %v3194_v1, %v7817_v54  ;;  %3519 = vmatpush2.bf16.msra.mxu1 %v6529_v18  ;;  %3547 = vmatprep.subr.bf16.mxu0 %v6586_v10  ;;  %v3604_v35 = vmul.f32 0.2, %v3234_v17  ;;  %v589_v54 = vrot.slane %v7837_v43, %v7833_v23  ;;  %vm3588_vm2 = vcmp.gt.f32.partialorder %v3234_v17, 0.0  ;;  %v527_v18 = vld [vmem:[#allocation3 + $0xc58] sm:$0xff] }
 0x208   :  { %3520 = vmatprep.subr.bf16.mxu1 %v6522_v13  ;;  %v3196_v8 = vpop.f32.mrf.mxu1  ;;  %v531_v10 = vld [vmem:[#allocation3 + $0xc78] sm:$0xff]  ;;  %v3107_v13 = vadd.f32 %v7807_v20, %v597_v4  ;;  %v6490_v20 = vcombine.high %v463_v14, %v467_v15 }
 0x209   :  { %v3238_v36 = vadd.f32 %v3237_v29, %v3195_v25  ;;  %v2939_v16 = vadd.f32 %v7787_v44, %v589_v54  ;;  %v3620_v47 = vsel %vm3588_vm2, %v3234_v17, %v3604_v35  ;;  %v2935_v63 = vadd.f32 %v7763_v0, %v589_v54  ;;  %v459_v29 = vld [vmem:[#allocation3 + $0xa38] sm:$0xff] }
 0x20a   :  { %3548 = vmatpush1.bf16.msra.mxu0 %v6585_v37  ;;  %v3111_v44 = vadd.f32 %v7821_v59, %v597_v4  ;;  %v6554_v37 = vcombine.high %v527_v18, %v531_v10  ;;  %v6553_v31 = vcombine.low %v527_v18, %v531_v10  ;;  %v7446_v4 = vld [vmem:[%s7932_s0 + $0x18] ss:$28 sps:$4 sm:$0xff]   ;;  %v6973_v18 = vld [vmem:[#allocation7 + $0x284] ss:$16 sps:$4 sm:$0xff]  }
 0x20b   :  { %vm3596_vm3 = vcmp.gt.f32.partialorder %v3238_v36, 0.0  ;;  %v3612_v46 = vmul.f32 0.2, %v3238_v36  ;;  %3521 = vmatpush2.bf16.msra.mxu1 %v6521_v55  ;;  %3549 = vmatprep.subr.bf16.mxu0 %v6578_v27  ;;  %v2982_v58 = vadd.f32 %v7785_v26, %v2939_v16  ;;  %v2978_v17 = vadd.f32 %v7767_v5, %v2935_v63  ;;  %v523_v55 = vld [vmem:[#allocation3 + $0xc38] sm:$0xff] }
 0x20c   :  { %3522 = vmatprep.subr.bf16.mxu1 %v6514_v41  ;;  %v3154_v0 = vadd.f32 %v7819_v56, %v3111_v44  ;;  %v3150_v26 = vadd.f32 %v7814_v40, %v3107_v13  ;;  %v519_v56 = vld [vmem:[#allocation3 + $0xc18] sm:$0xff]  ;;  %v3239_v41 = vpop.f32.mrf.mxu0 }
 0x20d   :  { %v3628_v57 = vsel %vm3596_vm3, %v3238_v36, %v3612_v46  ;;  %v3025_v59 = vadd.f32 %v7809_v24, %v2982_v58  ;;  %v3021_v25 = vadd.f32 %v7793_v50, %v2978_v17  ;;  %v455_v5 = vld [vmem:[#allocation3 + $0xa18] sm:$0xff]  ;;  %v6546_v35 = vcombine.high %v519_v56, %v523_v55 }
 0x20e   :  { %v7846_v32 = vpack.c.bf16 %v3628_v57, %v3620_v47  ;;  %3550 = vmatpush1.bf16.msra.mxu0 %v6577_v45  ;;  %v3197_v1 = vadd.f32 %v3196_v8, %v3154_v0  ;;  %v3193_v27 = vadd.f32 %v7828_v11, %v3150_v26  ;;  %v6482_v36 = vcombine.high %v455_v5, %v459_v29  ;;  %v6952_v45 = vld [vmem:[#allocation7 + $0xe4] ss:$16 sps:$4 sm:$0xff]   ;;  %v6959_v44 = vld [vmem:[#allocation7 + $0x2c0] ss:$16 sps:$4 sm:$0xff]  }
 0x20f   :  { %3523 = vmatpush2.bf16.msra.mxu1 %v6513_v51  ;;  %3551 = vmatprep.subr.bf16.mxu0 %v6570_v52  ;;  %v3068_v24 = vadd.f32 %v7801_v62, %v3025_v59  ;;  %v3064_v50 = vadd.f32 %v7791_v49, %v3021_v25  ;;  %v6545_v11 = vcombine.low %v519_v56, %v523_v55  ;;  %v6955_v51 = vld [vmem:[#allocation7 + $0x2e4] ss:$16 sps:$4 sm:$0xff]   ;;  %v6950_v49 = vld [vmem:[#allocation7 + $0xe0] ss:$16 sps:$4 sm:$0xff]  }
 0x210   :  { %3524 = vmatprep.subr.bf16.mxu1 %v6506_v53  ;;  %v3240_v40 = vadd.f32 %v3239_v41, %v3197_v1  ;;  %v3236_v38 = vadd.f32 %v7830_v12, %v3193_v27  ;;  %v6481_v62 = vcombine.low %v455_v5, %v459_v29  ;;  %v6953_v12 = vld [vmem:[#allocation7 + $0x2e0] ss:$16 sps:$4 sm:$0xff]   ;;  %v6976_v0 = vld [vmem:[#allocation7 + $0x64] ss:$16 sps:$4 sm:$0xff]  }
 0x211   :  { %v3611_v42 = vmul.f32 0.2, %v3068_v24  ;;  %vm3595_vm4 = vcmp.gt.f32.partialorder %v3068_v24, 0.0  ;;  %v3603_v46 = vmul.f32 0.2, %v3064_v50  ;;  %vm3587_vm6 = vcmp.gt.f32.partialorder %v3064_v50, 0.0 }
 0x212   :  { %3552 = vmatpush1.bf16.msra.mxu0 %v6569_v2  ;;  %v3613_v54 = vmul.f32 0.2, %v3240_v40  ;;  %vm3597_vm5 = vcmp.gt.f32.partialorder %v3240_v40, 0.0  ;;  %v3605_v52 = vmul.f32 0.2, %v3236_v38  ;;  %vm3589_vm7 = vcmp.gt.f32.partialorder %v3236_v38, 0.0 }
 0x213   :  { %3525 = vmatpush2.bf16.msra.mxu1 %v6505_v6  ;;  %3553 = vmatprep.subr.bf16.mxu0 %v6562_v7  ;;  %v3627_v16 = vsel %vm3595_vm4, %v3068_v24, %v3611_v42  ;;  %v3619_v61 = vsel %vm3587_vm6, %v3064_v50, %v3603_v46  ;;  %v6956_v2 = vld [vmem:[#allocation7 + $0xc0] ss:$16 sps:$4 sm:$0xff]   ;;  %v6964_v6 = vld [vmem:[#allocation7 + $0xa4] ss:$16 sps:$4 sm:$0xff]  }
 0x214   :  { %3526 = vmatprep.subr.bf16.mxu1 %v6498_v9  ;;  %v3629_v53 = vsel %vm3597_vm5, %v3240_v40, %v3613_v54  ;;  %v7863_v47 = vpack.c.bf16 %v3627_v16, %v3619_v61  ;;  %v3621_v57 = vsel %vm3589_vm7, %v3236_v38, %v3605_v52  ;;  %v6967_v7 = vld [vmem:[#allocation7 + $0x2a4] ss:$16 sps:$4 sm:$0xff]   ;;  %v6962_v58 = vld [vmem:[#allocation7 + $0xa0] ss:$16 sps:$4 sm:$0xff]  }
 0x215   :  { %v7868_v63 = vpack.c.bf16 %v3629_v53, %v3621_v57  ;;  %v6965_v8 = vld [vmem:[#allocation7 + $0x2a0] ss:$16 sps:$4 sm:$0xff]   ;;  %v6970_v9 = vld [vmem:[#allocation7 + $0x84] ss:$16 sps:$4 sm:$0xff]  }
 0x216   :  { %3554 = vmatpush1.bf16.msra.mxu0 %v6561_v48  ;;  %v6968_v10 = vld [vmem:[#allocation7 + $0x80] ss:$16 sps:$4 sm:$0xff]   ;;  %v6979_v14 = vld [vmem:[#allocation7 + $0x264] ss:$16 sps:$4 sm:$0xff]  }
 0x217   :  { %3527 = vmatpush2.bf16.msra.mxu1 %v6497_v21  ;;  %3555 = vmatprep.subr.bf16.mxu0 %v6554_v37  ;;  %v6971_v13 = vld [vmem:[#allocation7 + $0x280] ss:$16 sps:$4 sm:$0xff]   ;;  %v6982_v59 = vld [vmem:[#allocation7 + $0x44] ss:$16 sps:$4 sm:$0xff]  }
 0x218   :  { %3528 = vmatprep.subr.bf16.mxu1 %v6490_v20  ;;  %v6974_v15 = vld [vmem:[#allocation7 + $0x60] ss:$16 sps:$4 sm:$0xff]   ;;  %v6985_v21 = vld [vmem:[#allocation7 + $0x244] ss:$16 sps:$4 sm:$0xff]  }
 0x219   :  { %v6977_v17 = vld [vmem:[#allocation7 + $0x260] ss:$16 sps:$4 sm:$0xff]   ;;  %v6988_v1 = vld [vmem:[#allocation7 + $0x24] ss:$16 sps:$4 sm:$0xff]  }
 0x21a   :  { %3556 = vmatpush1.bf16.msra.mxu0 %v6553_v31  ;;  %v6980_v48 = vld [vmem:[#allocation7 + $0x40] ss:$16 sps:$4 sm:$0xff]   ;;  %v6991_v37 = vld [vmem:[#allocation7 + $0x224] ss:$16 sps:$4 sm:$0xff]  }
 0x21b   :  { %3529 = vmatpush2.bf16.msra.mxu1 %v6489_v33  ;;  %3557 = vmatprep.subr.bf16.mxu0 %v6546_v35  ;;  %v6983_v26 = vld [vmem:[#allocation7 + $0x240] ss:$16 sps:$4 sm:$0xff]   ;;  %v6994_v56 = vld [vmem:[#allocation7 + $0x4] ss:$16 sps:$4 sm:$0xff]  }
 0x21c   :  { %3530 = vmatprep.subr.bf16.mxu1 %v6482_v36  ;;  %v6986_v25 = vld [vmem:[#allocation7 + $0x20] ss:$16 sps:$4 sm:$0xff]   ;;  %v6997_v55 = vld [vmem:[#allocation7 + $0x204] ss:$16 sps:$4 sm:$0xff]  }
 0x21d   :  { %v6989_v20 = vld [vmem:[#allocation7 + $0x220] ss:$16 sps:$4 sm:$0xff]   ;;  %v7000_v29 = vld [vmem:[#allocation7 + $0x1e4] ss:$16 sps:$4 sm:$0xff]  }
 0x21e   :  { %3558 = vmatpush1.bf16.msra.mxu0 %v6545_v11  ;;  %v6992_v27 = vld [vmem:[#allocation7] ss:$16 sps:$4 sm:$0xff]   ;;  %v7003_v24 = vld [vmem:[#allocation7 + $0x3e4] ss:$16 sps:$4 sm:$0xff]  }
 0x21f   :  { %3531 = vmatpush2.bf16.msra.mxu1 %v6481_v62  ;;  %5200 = vmatprep.subr.bf16.mxu0 %v6952_v45  ;;  %v6995_v5 = vld [vmem:[#allocation7 + $0x200] ss:$16 sps:$4 sm:$0xff]   ;;  %v7006_v40 = vld [vmem:[#allocation7 + $0x1c4] ss:$16 sps:$4 sm:$0xff]  }
 0x220   :  { %5243 = vmatprep.subr.bf16.mxu1 %v6955_v51  ;;  %v6998_v41 = vld [vmem:[#allocation7 + $0x1e0] ss:$16 sps:$4 sm:$0xff]   ;;  %v7009_v33 = vld [vmem:[#allocation7 + $0x3c4] ss:$16 sps:$4 sm:$0xff]  }
 0x221   :  { %3576 = vmatmul.mubr.bf16.vlgmr.msra.gmra.mxu0 %v7446_v4  ;;  %v7001_v31 = vld [vmem:[#allocation7 + $0x3e0] ss:$16 sps:$4 sm:$0xff]   ;;  %v7012_v36 = vld [vmem:[#allocation7 + $0x1a4] ss:$16 sps:$4 sm:$0xff]  }
 0x222   :  { %3533 = vmatmul.mubr.bf16.vlgmr.msra.gmra.mxu1 %v7447_v28  ;;  %5201 = vmatpush1.bf16.msra.mxu0 %v6950_v49  ;;  %v7004_v35 = vld [vmem:[#allocation7 + $0x1c0] ss:$16 sps:$4 sm:$0xff]   ;;  %v7015_v38 = vld [vmem:[#allocation7 + $0x3a4] ss:$16 sps:$4 sm:$0xff]  }
 0x223   :  { %5232 = vmatprep.mubr.bf16.mxu0 %v7863_v47  ;;  %5244 = vmatpush1.bf16.msra.mxu1 %v6953_v12  ;;  %v7007_v50 = vld [vmem:[#allocation7 + $0x3c0] ss:$16 sps:$4 sm:$0xff]   ;;  %v7018_v54 = vld [vmem:[#allocation7 + $0x184] ss:$16 sps:$4 sm:$0xff]  }
 0x224   :  { %5275 = vmatprep.mubr.bf16.mxu1 %v7868_v63  ;;  %5202 = vmatprep.subr.bf16.mxu0 %v6958_v19  ;;  %v7010_v42 = vld [vmem:[#allocation7 + $0x1a0] ss:$16 sps:$4 sm:$0xff]   ;;  %v7021_v62 = vld [vmem:[#allocation7 + $0x384] ss:$16 sps:$4 sm:$0xff]  }
 0x225   :  { %5245 = vmatprep.subr.bf16.mxu1 %v6961_v60  ;;  %v7013_v11 = vld [vmem:[#allocation7 + $0x3a0] ss:$16 sps:$4 sm:$0xff]   ;;  %v7024_v51 = vld [vmem:[#allocation7 + $0x164] ss:$16 sps:$4 sm:$0xff]  }
 0x226   :  { %5203 = vmatpush1.bf16.msra.mxu0 %v6956_v2  ;;  %v7016_v45 = vld [vmem:[#allocation7 + $0x180] ss:$16 sps:$4 sm:$0xff]   ;;  %v7027_v52 = vld [vmem:[#allocation7 + $0x364] ss:$16 sps:$4 sm:$0xff]  }
 0x227   :  { %5246 = vmatpush1.bf16.msra.mxu1 %v6959_v44  ;;  %5204 = vmatprep.subr.bf16.mxu0 %v6964_v6  ;;  %v7019_v46 = vld [vmem:[#allocation7 + $0x380] ss:$16 sps:$4 sm:$0xff]   ;;  %v7030_v12 = vld [vmem:[#allocation7 + $0x144] ss:$16 sps:$4 sm:$0xff]  }
 0x228   :  { %5247 = vmatprep.subr.bf16.mxu1 %v6967_v7  ;;  %v7022_v49 = vld [vmem:[#allocation7 + $0x160] ss:$16 sps:$4 sm:$0xff]   ;;  %v7033_v53 = vld [vmem:[#allocation7 + $0x344] ss:$16 sps:$4 sm:$0xff]  }
 0x229   :  { %v7025_v16 = vld [vmem:[#allocation7 + $0x360] ss:$16 sps:$4 sm:$0xff]   ;;  %v7036_v4 = vld [vmem:[#allocation7 + $0x124] ss:$16 sps:$4 sm:$0xff]  }
 0x22a   :  { %5205 = vmatpush1.bf16.msra.mxu0 %v6962_v58  ;;  %v7028_v61 = vld [vmem:[#allocation7 + $0x140] ss:$16 sps:$4 sm:$0xff]   ;;  %v7039_v57 = vld [vmem:[#allocation7 + $0x324] ss:$16 sps:$4 sm:$0xff]  }
 0x22b   :  { %5248 = vmatpush1.bf16.msra.mxu1 %v6965_v8  ;;  %5206 = vmatprep.subr.bf16.mxu0 %v6970_v9  ;;  %v7031_v19 = vld [vmem:[#allocation7 + $0x340] ss:$16 sps:$4 sm:$0xff]   ;;  %v7042_v2 = vld [vmem:[#allocation7 + $0x104] ss:$16 sps:$4 sm:$0xff]  }
 0x22c   :  { %5249 = vmatprep.subr.bf16.mxu1 %v6973_v18  ;;  %v7034_v60 = vld [vmem:[#allocation7 + $0x120] ss:$16 sps:$4 sm:$0xff]   ;;  %v7045_v44 = vld [vmem:[#allocation7 + $0x304] ss:$16 sps:$4 sm:$0xff]  }
 0x22d   :  { %v7037_v28 = vld [vmem:[#allocation7 + $0x320] ss:$16 sps:$4 sm:$0xff]   ;;  %v7048_v58 = vld [vmem:[#allocation7 + $0x4e4] ss:$16 sps:$4 sm:$0xff]  }
 0x22e   :  { %5207 = vmatpush1.bf16.msra.mxu0 %v6968_v10  ;;  %v7040_v6 = vld [vmem:[#allocation7 + $0x100] ss:$16 sps:$4 sm:$0xff]   ;;  %v7108_v8 = vld [vmem:[#allocation7 + $0x6e4] ss:$16 sps:$4 sm:$0xff]  }
 0x22f   :  { %5250 = vmatpush1.bf16.msra.mxu1 %v6971_v13  ;;  %5208 = vmatprep.subr.bf16.mxu0 %v6976_v0  ;;  %v7043_v7 = vld [vmem:[#allocation7 + $0x300] ss:$16 sps:$4 sm:$0xff]   ;;  %v7051_v18 = vld [vmem:[#allocation7 + $0x4c4] ss:$16 sps:$4 sm:$0xff]  }
 0x230   :  { %5251 = vmatprep.subr.bf16.mxu1 %v6979_v14  ;;  %v7046_v9 = vld [vmem:[#allocation7 + $0x4e0] ss:$16 sps:$4 sm:$0xff]   ;;  %v7114_v13 = vld [vmem:[#allocation7 + $0x6c4] ss:$16 sps:$4 sm:$0xff]  }
 0x231   :  { %v7106_v10 = vld [vmem:[#allocation7 + $0x6e0] ss:$16 sps:$4 sm:$0xff]   ;;  %v7054_v14 = vld [vmem:[#allocation7 + $0x4a4] ss:$16 sps:$4 sm:$0xff]  }
 0x232   :  { %5209 = vmatpush1.bf16.msra.mxu0 %v6974_v15  ;;  %v7049_v0 = vld [vmem:[#allocation7 + $0x4c0] ss:$16 sps:$4 sm:$0xff]  }
 0x233   :  { %5252 = vmatpush1.bf16.msra.mxu1 %v6977_v17  ;;  %5210 = vmatprep.subr.bf16.mxu0 %v6982_v59  ;;  %v7112_v15 = vld [vmem:[#allocation7 + $0x6c0] ss:$16 sps:$4 sm:$0xff]   ;;  %v7120_v17 = vld [vmem:[#allocation7 + $0x6a4] ss:$16 sps:$4 sm:$0xff]  }
 0x234   :  { %5253 = vmatprep.subr.bf16.mxu1 %v6985_v21  ;;  %v7052_v59 = vld [vmem:[#allocation7 + $0x4a0] ss:$16 sps:$4 sm:$0xff]   ;;  %v7057_v21 = vld [vmem:[#allocation7 + $0x484] ss:$16 sps:$4 sm:$0xff]  }
 0x236   :  { %5211 = vmatpush1.bf16.msra.mxu0 %v6980_v48  ;;  %v7118_v48 = vld [vmem:[#allocation7 + $0x6a0] ss:$16 sps:$4 sm:$0xff]  }
 0x237   :  { %5254 = vmatpush1.bf16.msra.mxu1 %v6983_v26  ;;  %5212 = vmatprep.subr.bf16.mxu0 %v6988_v1  ;;  %v7126_v26 = vld [vmem:[#allocation7 + $0x684] ss:$16 sps:$4 sm:$0xff]   ;;  %v7055_v1 = vld [vmem:[#allocation7 + $0x480] ss:$16 sps:$4 sm:$0xff]  }
 0x238   :  { %5255 = vmatprep.subr.bf16.mxu1 %v6991_v37  ;;  %v7060_v37 = vld [vmem:[#allocation7 + $0x464] ss:$16 sps:$4 sm:$0xff]  }
 0x23a   :  { %5213 = vmatpush1.bf16.msra.mxu0 %v6986_v25  ;;  %v7124_v25 = vld [vmem:[#allocation7 + $0x680] ss:$16 sps:$4 sm:$0xff]  }
 0x23b   :  { %5256 = vmatpush1.bf16.msra.mxu1 %v6989_v20  ;;  %5214 = vmatprep.subr.bf16.mxu0 %v6994_v56  ;;  %v7132_v20 = vld [vmem:[#allocation7 + $0x664] ss:$16 sps:$4 sm:$0xff]   ;;  %v7058_v56 = vld [vmem:[#allocation7 + $0x460] ss:$16 sps:$4 sm:$0xff]  }
 0x23c   :  { %5257 = vmatprep.subr.bf16.mxu1 %v6997_v55  ;;  %v7063_v55 = vld [vmem:[#allocation7 + $0x444] ss:$16 sps:$4 sm:$0xff]  }
 0x23e   :  { %5215 = vmatpush1.bf16.msra.mxu0 %v6992_v27  ;;  %v7130_v27 = vld [vmem:[#allocation7 + $0x660] ss:$16 sps:$4 sm:$0xff]  }
 0x23f   :  { %5258 = vmatpush1.bf16.msra.mxu1 %v6995_v5  ;;  %5216 = vmatprep.subr.bf16.mxu0 %v7000_v29  ;;  %v7138_v29 = vld [vmem:[#allocation7 + $0x644] ss:$16 sps:$4 sm:$0xff]  }
 0x240   :  { %5259 = vmatprep.subr.bf16.mxu1 %v7003_v24  ;;  %v7061_v24 = vld [vmem:[#allocation7 + $0x440] ss:$16 sps:$4 sm:$0xff]  }
 0x242   :  { %5217 = vmatpush2.bf16.msra.mxu0 %v6998_v41  ;;  %v7874_v5 = vpop.f32.mrf.mxu1  ;;  %v7876_v41 = vpop.f32.mrf.mxu0 }
 0x243   :  { %5260 = vmatpush2.bf16.msra.mxu1 %v7001_v31  ;;  %5218 = vmatprep.subr.bf16.mxu0 %v7006_v40  ;;  %v7066_v31 = vld [vmem:[#allocation7 + $0x424] ss:$16 sps:$4 sm:$0xff]   ;;  %v7136_v40 = vld [vmem:[#allocation7 + $0x640] ss:$16 sps:$4 sm:$0xff]  }
 0x244   :  { %5261 = vmatprep.subr.bf16.mxu1 %v7009_v33  ;;  %v3321_v33 = vpop.f32.mrf.mxu1 }
 0x246   :  { %5219 = vmatpush2.bf16.msra.mxu0 %v7004_v35  ;;  %v7144_v35 = vld [vmem:[#allocation7 + $0x624] ss:$16 sps:$4 sm:$0xff]  }
 0x247   :  { %5262 = vmatpush2.bf16.msra.mxu1 %v7007_v50  ;;  %5220 = vmatprep.subr.bf16.mxu0 %v7012_v36  ;;  %v604_v50 = vsub.s32 5, %v7754_v30  ;;  %v7064_v36 = vld [vmem:[#allocation7 + $0x420] ss:$16 sps:$4 sm:$0xff]  }
 0x248   :  { %5263 = vmatprep.subr.bf16.mxu1 %v7015_v38  ;;  %v3278_v38 = vpop.f32.mrf.mxu0 }
 0x24a   :  { %5221 = vmatpush2.bf16.msra.mxu0 %v7010_v42  ;;  %v7069_v42 = vld [vmem:[#allocation7 + $0x404] ss:$16 sps:$4 sm:$0xff]  }
 0x24b   :  { %5264 = vmatpush2.bf16.msra.mxu1 %v7013_v11  ;;  %5222 = vmatprep.subr.bf16.mxu0 %v7018_v54  ;;  %v7142_v11 = vld [vmem:[#allocation7 + $0x620] ss:$16 sps:$4 sm:$0xff]   ;;  %v7879_v54 = vpop.f32.mrf.mxu1 }
 0x24c   :  { %5265 = vmatprep.subr.bf16.mxu1 %v7021_v62  ;;  %v7150_v62 = vld [vmem:[#allocation7 + $0x604] ss:$16 sps:$4 sm:$0xff]  }
 0x24e   :  { %5223 = vmatpush2.bf16.msra.mxu0 %v7016_v45  ;;  %v605_v45 = vrot.slane %v7837_v43, %v604_v50 }
 0x24f   :  { %5266 = vmatpush2.bf16.msra.mxu1 %v7019_v46  ;;  %5224 = vmatprep.subr.bf16.mxu0 %v7024_v51  ;;  %v7067_v46 = vld [vmem:[#allocation7 + $0x400] ss:$16 sps:$4 sm:$0xff]   ;;  %v3280_v51 = vpop.f32.mrf.mxu0 }
 0x250   :  { %5267 = vmatprep.subr.bf16.mxu1 %v7027_v52  ;;  %v7072_v52 = vld [vmem:[#allocation7 + $0x5e4] ss:$16 sps:$4 sm:$0xff]  }
 0x252   :  { %5225 = vmatpush2.bf16.msra.mxu0 %v7022_v49  ;;  %v7148_v49 = vld [vmem:[#allocation7 + $0x600] ss:$16 sps:$4 sm:$0xff]  }
 0x253   :  { %5268 = vmatpush2.bf16.msra.mxu1 %v7025_v16  ;;  %5226 = vmatprep.subr.bf16.mxu0 %v7030_v12  ;;  %v3325_v16 = vpop.f32.mrf.mxu1  ;;  %v7156_v12 = vld [vmem:[#allocation7 + $0x7e4] ss:$16 sps:$4 sm:$0xff]  }
 0x254   :  { %5269 = vmatprep.subr.bf16.mxu1 %v7033_v53  ;;  %v3279_v53 = vadd.f32 %v3278_v38, %v605_v45  ;;  %v7082_v38 = vld [vmem:[#allocation7 + $0x560] ss:$16 sps:$4 sm:$0xff]  }
 0x256   :  { %5227 = vmatpush2.bf16.msra.mxu0 %v7028_v61 }
 0x257   :  { %5270 = vmatpush2.bf16.msra.mxu1 %v7031_v19  ;;  %5228 = vmatprep.subr.bf16.mxu0 %v7036_v4  ;;  %v7070_v19 = vld [vmem:[#allocation7 + $0x5e0] ss:$16 sps:$4 sm:$0xff]   ;;  %v3282_v4 = vpop.f32.mrf.mxu0 }
 0x258   :  { %5271 = vmatprep.subr.bf16.mxu1 %v7039_v57  ;;  %v7075_v57 = vld [vmem:[#allocation7 + $0x5c4] ss:$16 sps:$4 sm:$0xff]  }
 0x25a   :  { %5229 = vmatpush2.bf16.msra.mxu0 %v7034_v60  ;;  %v7154_v60 = vld [vmem:[#allocation7 + $0x7e0] ss:$16 sps:$4 sm:$0xff]  }
 0x25b   :  { %5272 = vmatpush2.bf16.msra.mxu1 %v7037_v28  ;;  %5230 = vmatprep.subr.bf16.mxu0 %v7042_v2  ;;  %v7162_v28 = vld [vmem:[#allocation7 + $0x7c4] ss:$16 sps:$4 sm:$0xff]  }
 0x25c   :  { %5273 = vmatprep.subr.bf16.mxu1 %v7045_v44  ;;  %v3322_v44 = vadd.f32 %v3321_v33, %v3279_v53 }
 0x25e   :  { %5231 = vmatpush2.bf16.msra.mxu0 %v7040_v6 }
 0x25f   :  { %5274 = vmatpush2.bf16.msra.mxu1 %v7043_v7  ;;  %5286 = vmatprep.subr.bf16.mxu0 %v7048_v58  ;;  %v7073_v7 = vld [vmem:[#allocation7 + $0x5c0] ss:$16 sps:$4 sm:$0xff]   ;;  %v3283_v58 = vadd.f32 %v3282_v4, %v605_v45 }
 0x260   :  { %5329 = vmatprep.subr.bf16.mxu1 %v7108_v8  ;;  %v7178_v45 = vld [vmem:[#allocation7 + $0x760] ss:$16 sps:$4 sm:$0xff]  }
 0x261   :  { %5233 = vmatmul.mubr.bf16.vlgmr.msra.gmra.mxu0 %v7797_v22 }
 0x262   :  { %5276 = vmatmul.mubr.bf16.vlgmr.msra.gmra.mxu1 %v7846_v32  ;;  %5287 = vmatpush1.bf16.msra.mxu0 %v7046_v9  ;;  %v7882_v61 = vpop.f32.mrf.mxu1  ;;  %v7078_v9 = vld [vmem:[#allocation7 + $0x5a4] ss:$16 sps:$4 sm:$0xff]  }
 0x263   :  { %5288 = vmatprep.subr.bf16.mxu0 %v7051_v18  ;;  %5330 = vmatpush1.bf16.msra.mxu1 %v7106_v10  ;;  %v7160_v18 = vld [vmem:[#allocation7 + $0x7c0] ss:$16 sps:$4 sm:$0xff]   ;;  %v600_v10 = vsub.s32 4, %v7754_v30 }
 0x264   :  { %5331 = vmatprep.subr.bf16.mxu1 %v7114_v13  ;;  %v3407_v6 = vpop.f32.mrf.mxu1 }
 0x266   :  { %5289 = vmatpush1.bf16.msra.mxu0 %v7049_v0  ;;  %v7168_v0 = vld [vmem:[#allocation7 + $0x7a4] ss:$16 sps:$4 sm:$0xff]  }
 0x267   :  { %5290 = vmatprep.subr.bf16.mxu0 %v7054_v14  ;;  %5332 = vmatpush1.bf16.msra.mxu1 %v7112_v15  ;;  %v3409_v15 = vpop.f32.mrf.mxu1 }
 0x268   :  { %5333 = vmatprep.subr.bf16.mxu1 %v7120_v17  ;;  %v7076_v17 = vld [vmem:[#allocation7 + $0x5a0] ss:$16 sps:$4 sm:$0xff]  }
 0x26a   :  { %5291 = vmatpush1.bf16.msra.mxu0 %v7052_v59  ;;  %v3326_v59 = vadd.f32 %v3325_v16, %v3283_v58  ;;  %v7090_v16 = vld [vmem:[#allocation7 + $0x524] ss:$16 sps:$4 sm:$0xff]   ;;  %v7196_v58 = vld [vmem:[#allocation7 + $0x700] ss:$16 sps:$4 sm:$0xff]  }
 0x26b   :  { %5292 = vmatprep.subr.bf16.mxu0 %v7057_v21  ;;  %5334 = vmatpush1.bf16.msra.mxu1 %v7118_v48 }
 0x26c   :  { %5335 = vmatprep.subr.bf16.mxu1 %v7126_v26  ;;  %v7081_v26 = vld [vmem:[#allocation7 + $0x584] ss:$16 sps:$4 sm:$0xff]  }
 0x26e   :  { %5293 = vmatpush1.bf16.msra.mxu0 %v7055_v1  ;;  %v7166_v1 = vld [vmem:[#allocation7 + $0x7a0] ss:$16 sps:$4 sm:$0xff]  }
 0x26f   :  { %5294 = vmatprep.subr.bf16.mxu0 %v7060_v37  ;;  %5336 = vmatpush1.bf16.msra.mxu1 %v7124_v25  ;;  %v601_v37 = vrot.slane %v7837_v43, %v600_v10  ;;  %v7174_v25 = vld [vmem:[#allocation7 + $0x784] ss:$16 sps:$4 sm:$0xff]  }
 0x270   :  { %5337 = vmatprep.subr.bf16.mxu1 %v7132_v20 }
 0x271   :  { %v3277_v33 = vadd.f32 %v7876_v41, %v601_v37  ;;  %v7186_v41 = vld [vmem:[#allocation7 + $0x744] ss:$16 sps:$4 sm:$0xff]  }
 0x272   :  { %5295 = vmatpush1.bf16.msra.mxu0 %v7058_v56  ;;  %v3281_v56 = vadd.f32 %v3280_v51, %v601_v37  ;;  %v7123_v37 = vld [vmem:[#allocation7 + $0x2c] ss:$16 sps:$4 sm:$0xff]  }
 0x273   :  { %5296 = vmatprep.subr.bf16.mxu0 %v7063_v55  ;;  %5338 = vmatpush1.bf16.msra.mxu1 %v7130_v27  ;;  %v3411_v55 = vpop.f32.mrf.mxu1  ;;  %v7079_v27 = vld [vmem:[#allocation7 + $0x580] ss:$16 sps:$4 sm:$0xff]  }
 0x274   :  { %5339 = vmatprep.subr.bf16.mxu1 %v7138_v29 }
 0x276   :  { %5297 = vmatpush1.bf16.msra.mxu0 %v7061_v24 }
 0x277   :  { %5298 = vmatprep.subr.bf16.mxu0 %v7066_v31  ;;  %5340 = vmatpush1.bf16.msra.mxu1 %v7136_v40  ;;  %v7084_v31 = vld [vmem:[#allocation7 + $0x564] ss:$16 sps:$4 sm:$0xff]   ;;  %v7172_v40 = vld [vmem:[#allocation7 + $0x780] ss:$16 sps:$4 sm:$0xff]  }
 0x278   :  { %5341 = vmatprep.subr.bf16.mxu1 %v7144_v35  ;;  %v7180_v35 = vld [vmem:[#allocation7 + $0x764] ss:$16 sps:$4 sm:$0xff]  }
 0x27a   :  { %5299 = vmatpush1.bf16.msra.mxu0 %v7064_v36  ;;  %v3324_v36 = vadd.f32 %v7879_v54, %v3281_v56  ;;  %v7085_v54 = vld [vmem:[#allocation7 + $0x540] ss:$16 sps:$4 sm:$0xff]   ;;  %v7135_v56 = vld [vmem:[#allocation7 + $0x1ec] ss:$16 sps:$4 sm:$0xff]  }
 0x27b   :  { %5300 = vmatprep.subr.bf16.mxu0 %v7069_v42  ;;  %5342 = vmatpush1.bf16.msra.mxu1 %v7142_v11 }
 0x27c   :  { %5343 = vmatprep.subr.bf16.mxu1 %v7150_v62  ;;  %v7087_v62 = vld [vmem:[#allocation7 + $0x544] ss:$16 sps:$4 sm:$0xff]  }
 0x27e   :  { %5301 = vmatpush1.bf16.msra.mxu0 %v7067_v46  ;;  %v3320_v46 = vadd.f32 %v7874_v5, %v3277_v33  ;;  %v7088_v5 = vld [vmem:[#allocation7 + $0x520] ss:$16 sps:$4 sm:$0xff]   ;;  %v7151_v33 = vld [vmem:[#allocation7 + $0x188] ss:$16 sps:$4 sm:$0xff]  }
 0x27f   :  { %5302 = vmatprep.subr.bf16.mxu0 %v7072_v52  ;;  %5344 = vmatpush1.bf16.msra.mxu1 %v7148_v49 }
 0x280   :  { %5345 = vmatprep.subr.bf16.mxu1 %v7156_v12  ;;  %v7184_v12 = vld [vmem:[#allocation7 + $0x740] ss:$16 sps:$4 sm:$0xff]  }
 0x281   :  { %v3362_v2 = vpop.f32.mrf.mxu0 }
 0x282   :  { %5303 = vmatpush2.bf16.msra.mxu0 %v7070_v19  ;;  %v3363_v49 = vadd.f32 %v3362_v2, %v3320_v46  ;;  %v7192_v19 = vld [vmem:[#allocation7 + $0x724] ss:$16 sps:$4 sm:$0xff]  }
 0x283   :  { %v3364_v8 = vpop.f32.mrf.mxu0  ;;  %5304 = vmatprep.subr.bf16.mxu0 %v7075_v57  ;;  %5346 = vmatpush2.bf16.msra.mxu1 %v7154_v60  ;;  %v7093_v57 = vld [vmem:[#allocation7 + $0x504] ss:$16 sps:$4 sm:$0xff]   ;;  %v7190_v60 = vld [vmem:[#allocation7 + $0x720] ss:$16 sps:$4 sm:$0xff]  }
 0x284   :  { %v3365_v13 = vadd.f32 %v3364_v8, %v3322_v44  ;;  %5347 = vmatprep.subr.bf16.mxu1 %v7162_v28  ;;  %v3406_v4 = vadd.f32 %v7882_v61, %v3363_v49  ;;  %v7198_v2 = vld [vmem:[#allocation7 + $0x704] ss:$16 sps:$4 sm:$0xff]   ;;  %v7204_v61 = vld [vmem:[#allocation7 + $0x2ec] ss:$16 sps:$4 sm:$0xff]   ;;  %v608_v49 = vsub.s32 6, %v7754_v30 }
 0x285   :  { %v3366_v14 = vpop.f32.mrf.mxu0 }
 0x286   :  { %5305 = vmatpush2.bf16.msra.mxu0 %v7073_v7  ;;  %v3408_v21 = vadd.f32 %v3407_v6, %v3365_v13  ;;  %v3367_v51 = vadd.f32 %v3366_v14, %v3324_v36  ;;  %v3606_v44 = vmul.f32 0.2, %v3406_v4  ;;  %v7091_v6 = vld [vmem:[#allocation7 + $0x500] ss:$16 sps:$4 sm:$0xff]   ;;  %vm3590_vm11 = vcmp.gt.f32.partialorder %v3406_v4, 0.0 }
 0x287   :  { %v3368_v48 = vpop.f32.mrf.mxu0  ;;  %5306 = vmatprep.subr.bf16.mxu0 %v7078_v9  ;;  %5348 = vmatpush2.bf16.msra.mxu1 %v7160_v18  ;;  %v7096_v7 = vld [vmem:[#allocation7 + $0xec] ss:$16 sps:$4 sm:$0xff]   ;;  %v7094_v18 = vld [vmem:[#allocation7 + $0xe8] ss:$16 sps:$4 sm:$0xff]  }
 0x288   :  { %5349 = vmatprep.subr.bf16.mxu1 %v7168_v0  ;;  %v3369_v20 = vadd.f32 %v3368_v48, %v3326_v59  ;;  %v3607_v29 = vmul.f32 0.2, %v3408_v21  ;;  %vm3591_vm8 = vcmp.gt.f32.partialorder %v3408_v21, 0.0  ;;  %v3410_v53 = vadd.f32 %v3409_v15, %v3367_v51  ;;  %v7099_v13 = vld [vmem:[#allocation7 + $0xcc] ss:$16 sps:$4 sm:$0xff]  }
 0x289   :  { %v3622_v9 = vsel %vm3590_vm11, %v3406_v4, %v3606_v44  ;;  %v7097_v0 = vld [vmem:[#allocation7 + $0xc8] ss:$16 sps:$4 sm:$0xff]   ;;  %v7102_v14 = vld [vmem:[#allocation7 + $0xac] ss:$16 sps:$4 sm:$0xff]   ;;  %v609_v4 = vrot.slane %v7837_v43, %v608_v49 }
 0x28a   :  { %5307 = vmatpush2.bf16.msra.mxu0 %v7076_v17  ;;  %v3412_v24 = vadd.f32 %v3411_v55, %v3369_v20  ;;  %v3623_v42 = vsel %vm3591_vm8, %v3408_v21, %v3607_v29  ;;  %v3614_v28 = vmul.f32 0.2, %v3410_v53  ;;  %vm3598_vm10 = vcmp.gt.f32.partialorder %v3410_v53, 0.0  ;;  %v7100_v15 = vld [vmem:[#allocation7 + $0xa8] ss:$16 sps:$4 sm:$0xff]  }
 0x28b   :  { %5308 = vmatprep.subr.bf16.mxu0 %v7081_v26  ;;  %5350 = vmatpush2.bf16.msra.mxu1 %v7166_v1  ;;  %v7105_v17 = vld [vmem:[#allocation7 + $0x8c] ss:$16 sps:$4 sm:$0xff]   ;;  %v7103_v59 = vld [vmem:[#allocation7 + $0x88] ss:$16 sps:$4 sm:$0xff]  }
 0x28c   :  { %5351 = vmatprep.subr.bf16.mxu1 %v7174_v25  ;;  %vm3599_vm9 = vcmp.gt.f32.partialorder %v3412_v24, 0.0  ;;  %v3615_v50 = vmul.f32 0.2, %v3412_v24  ;;  %v3630_v8 = vsel %vm3598_vm10, %v3410_v53, %v3614_v28  ;;  %v7111_v21 = vld [vmem:[#allocation7 + $0x6c] ss:$16 sps:$4 sm:$0xff]  }
 0x28d   :  { %v7893_v10 = vpack.c.bf16 %v3630_v8, %v3622_v9  ;;  %v7109_v48 = vld [vmem:[#allocation7 + $0x68] ss:$16 sps:$4 sm:$0xff]   ;;  %v7117_v26 = vld [vmem:[#allocation7 + $0x4c] ss:$16 sps:$4 sm:$0xff]  }
 0x28e   :  { %5309 = vmatpush2.bf16.msra.mxu0 %v7079_v27  ;;  %v3631_v11 = vsel %vm3599_vm9, %v3412_v24, %v3615_v50  ;;  %v7115_v1 = vld [vmem:[#allocation7 + $0x48] ss:$16 sps:$4 sm:$0xff]   ;;  %v7129_v25 = vld [vmem:[#allocation7 + $0xc] ss:$16 sps:$4 sm:$0xff]  }
 0x28f   :  { %5310 = vmatprep.subr.bf16.mxu0 %v7084_v31  ;;  %5352 = vmatpush2.bf16.msra.mxu1 %v7172_v40  ;;  %v7889_v52 = vpack.c.bf16 %v3631_v11, %v3623_v42  ;;  %v7127_v20 = vld [vmem:[#allocation7 + $0x8] ss:$16 sps:$4 sm:$0xff]   ;;  %v7141_v27 = vld [vmem:[#allocation7 + $0x1cc] ss:$16 sps:$4 sm:$0xff]  }
 0x290   :  { %5353 = vmatprep.subr.bf16.mxu1 %v7180_v35  ;;  %v7133_v55 = vld [vmem:[#allocation7 + $0x1e8] ss:$16 sps:$4 sm:$0xff]   ;;  %v7147_v24 = vld [vmem:[#allocation7 + $0x1ac] ss:$16 sps:$4 sm:$0xff]  }
 0x291   :  { %5318 = vmatprep.mubr.bf16.mxu0 %v7889_v52  ;;  %v7139_v29 = vld [vmem:[#allocation7 + $0x1c8] ss:$16 sps:$4 sm:$0xff]   ;;  %v7153_v40 = vld [vmem:[#allocation7 + $0x18c] ss:$16 sps:$4 sm:$0xff]  }
 0x292   :  { %5311 = vmatpush2.bf16.msra.mxu0 %v7082_v38  ;;  %v7145_v31 = vld [vmem:[#allocation7 + $0x1a8] ss:$16 sps:$4 sm:$0xff]   ;;  %v7159_v35 = vld [vmem:[#allocation7 + $0x16c] ss:$16 sps:$4 sm:$0xff]  }
 0x293   :  { %5312 = vmatprep.subr.bf16.mxu0 %v7087_v62  ;;  %5354 = vmatpush2.bf16.msra.mxu1 %v7178_v45  ;;  %v7157_v50 = vld [vmem:[#allocation7 + $0x168] ss:$16 sps:$4 sm:$0xff]   ;;  %v7165_v36 = vld [vmem:[#allocation7 + $0x14c] ss:$16 sps:$4 sm:$0xff]  }
 0x294   :  { %5355 = vmatprep.subr.bf16.mxu1 %v7186_v41  ;;  %v7163_v38 = vld [vmem:[#allocation7 + $0x148] ss:$16 sps:$4 sm:$0xff]   ;;  %v7171_v11 = vld [vmem:[#allocation7 + $0x12c] ss:$16 sps:$4 sm:$0xff]  }
 0x295   :  { %v7169_v45 = vld [vmem:[#allocation7 + $0x128] ss:$16 sps:$4 sm:$0xff]   ;;  %v7177_v51 = vld [vmem:[#allocation7 + $0x10c] ss:$16 sps:$4 sm:$0xff]  }
 0x296   :  { %5313 = vmatpush2.bf16.msra.mxu0 %v7085_v54  ;;  %v612_v54 = vsub.s32 7, %v7754_v30  ;;  %v7183_v53 = vld [vmem:[#allocation7 + $0x4ec] ss:$16 sps:$4 sm:$0xff]   ;;  %v7187_v8 = vld [vmem:[#allocation7 + $0x4c8] ss:$16 sps:$4 sm:$0xff]  }
 0x297   :  { %5314 = vmatprep.subr.bf16.mxu0 %v7090_v16  ;;  %5356 = vmatpush2.bf16.msra.mxu1 %v7184_v12  ;;  %v7175_v16 = vld [vmem:[#allocation7 + $0x108] ss:$16 sps:$4 sm:$0xff]   ;;  %v7189_v28 = vld [vmem:[#allocation7 + $0x4cc] ss:$16 sps:$4 sm:$0xff]  }
 0x298   :  { %5357 = vmatprep.subr.bf16.mxu1 %v7192_v19  ;;  %v7211_v49 = vld [vmem:[#allocation7 + $0x448] ss:$16 sps:$4 sm:$0xff]  }
 0x29a   :  { %5315 = vmatpush2.bf16.msra.mxu0 %v7088_v5  ;;  %v613_v5 = vrot.slane %v7837_v43, %v612_v54  ;;  %v7219_v54 = vld [vmem:[#allocation7 + $0x42c] ss:$16 sps:$4 sm:$0xff]  }
 0x29b   :  { %5316 = vmatprep.subr.bf16.mxu0 %v7093_v57  ;;  %5358 = vmatpush2.bf16.msra.mxu1 %v7190_v60  ;;  %v7181_v57 = vld [vmem:[#allocation7 + $0x4e8] ss:$16 sps:$4 sm:$0xff]  }
 0x29c   :  { %5359 = vmatprep.subr.bf16.mxu1 %v7198_v2 }
 0x29e   :  { %5317 = vmatpush2.bf16.msra.mxu0 %v7091_v6 }
 0x29f   :  { %5372 = vmatprep.subr.bf16.mxu0 %v7096_v7  ;;  %5360 = vmatpush2.bf16.msra.mxu1 %v7196_v58 }
 0x2a0   :  { %5415 = vmatprep.subr.bf16.mxu1 %v7204_v61 }
 0x2a1   :  { %5319 = vmatmul.mubr.bf16.vlgmr.msra.gmra.mxu0 %v7893_v10 }
 0x2a2   :  { %5373 = vmatpush1.bf16.msra.mxu0 %v7094_v18  ;;  %5404 = vmatprep.mubr.bf16.mxu0 %v7863_v47  ;;  %v7121_v47 = vld [vmem:[#allocation7 + $0x28] ss:$16 sps:$4 sm:$0xff]   ;;  %v3448_v62 = vpop.f32.mrf.mxu1 }
 0x2a3   :  { %5374 = vmatprep.subr.bf16.mxu0 %v7099_v13  ;;  %v3449_v44 = vadd.f32 %v3448_v62, %v609_v4  ;;  %v7195_v13 = vld [vmem:[#allocation7 + $0x4ac] ss:$16 sps:$4 sm:$0xff]  }
 0x2a4   :  { %v3450_v41 = vpop.f32.mrf.mxu1 }
 0x2a5   :  { %v3451_v6 = vadd.f32 %v3450_v41, %v613_v5  ;;  %v7210_v41 = vld [vmem:[#allocation7 + $0x2cc] ss:$16 sps:$4 sm:$0xff]  }
 0x2a6   :  { %5375 = vmatpush1.bf16.msra.mxu0 %v7097_v0  ;;  %v3452_v19 = vpop.f32.mrf.mxu1 }
 0x2a7   :  { %5376 = vmatprep.subr.bf16.mxu0 %v7102_v14  ;;  %v3453_v61 = vadd.f32 %v3452_v19, %v609_v4  ;;  %v7225_v19 = vld [vmem:[#allocation7 + $0x40c] ss:$16 sps:$4 sm:$0xff]   ;;  %v7214_v4 = vld [vmem:[#allocation7 + $0x2a8] ss:$16 sps:$4 sm:$0xff]  }
 0x2a8   :  { %v3454_v2 = vpop.f32.mrf.mxu1 }
 0x2aa   :  { %5377 = vmatpush1.bf16.msra.mxu0 %v7100_v15 }
 0x2ab   :  { %5378 = vmatprep.subr.bf16.mxu0 %v7105_v17 }
 0x2ae   :  { %5379 = vmatpush1.bf16.msra.mxu0 %v7103_v59  ;;  %v3455_v59 = vadd.f32 %v3454_v2, %v613_v5  ;;  %v7222_v5 = vld [vmem:[#allocation7 + $0x28c] ss:$16 sps:$4 sm:$0xff]   ;;  %v7229_v2 = vld [vmem:[#allocation7 + $0x5e8] ss:$16 sps:$4 sm:$0xff]  }
 0x2af   :  { %5380 = vmatprep.subr.bf16.mxu0 %v7111_v21 }
 0x2b2   :  { %5381 = vmatpush1.bf16.msra.mxu0 %v7109_v48  ;;  %v7193_v48 = vld [vmem:[#allocation7 + $0x4a8] ss:$16 sps:$4 sm:$0xff]  }
 0x2b3   :  { %5382 = vmatprep.subr.bf16.mxu0 %v7117_v26 }
 0x2b6   :  { %5383 = vmatpush1.bf16.msra.mxu0 %v7115_v1  ;;  %v7201_v1 = vld [vmem:[#allocation7 + $0x48c] ss:$16 sps:$4 sm:$0xff]  }
 0x2b7   :  { %5384 = vmatprep.subr.bf16.mxu0 %v7123_v37 }
 0x2ba   :  { %5385 = vmatpush1.bf16.msra.mxu0 %v7121_v47 }
 0x2bb   :  { %5386 = vmatprep.subr.bf16.mxu0 %v7129_v25 }
 0x2be   :  { %5387 = vmatpush1.bf16.msra.mxu0 %v7127_v20 }
 0x2bf   :  { %5388 = vmatprep.subr.bf16.mxu0 %v7135_v56 }
 0x2c1   :  { %v3491_v42 = vpop.f32.mrf.mxu0 }
 0x2c2   :  { %5389 = vmatpush2.bf16.msra.mxu0 %v7133_v55  ;;  %v3492_v9 = vadd.f32 %v3491_v42, %v3449_v44  ;;  %v7199_v55 = vld [vmem:[#allocation7 + $0x488] ss:$16 sps:$4 sm:$0xff]   ;;  %v7237_v44 = vld [vmem:[#allocation7 + $0x5cc] ss:$16 sps:$4 sm:$0xff]  }
 0x2c3   :  { %5390 = vmatprep.subr.bf16.mxu0 %v7141_v27  ;;  %v3493_v46 = vpop.f32.mrf.mxu0 }
 0x2c4   :  { %v3494_v18 = vadd.f32 %v3493_v46, %v3451_v6  ;;  %v7202_v46 = vld [vmem:[#allocation7 + $0x2e8] ss:$16 sps:$4 sm:$0xff]  }
 0x2c5   :  { %v3495_v12 = vpop.f32.mrf.mxu0  ;;  %v7226_v6 = vld [vmem:[#allocation7 + $0x268] ss:$16 sps:$4 sm:$0xff]  }
 0x2c6   :  { %5391 = vmatpush2.bf16.msra.mxu0 %v7139_v29  ;;  %v3496_v14 = vadd.f32 %v3495_v12, %v3453_v61  ;;  %v7216_v12 = vld [vmem:[#allocation7 + $0x2ac] ss:$16 sps:$4 sm:$0xff]   ;;  %v7232_v61 = vld [vmem:[#allocation7 + $0x248] ss:$16 sps:$4 sm:$0xff]  }
 0x2c7   :  { %5392 = vmatprep.subr.bf16.mxu0 %v7147_v24  ;;  %v3497_v60 = vpop.f32.mrf.mxu0  ;;  %v7207_v24 = vld [vmem:[#allocation7 + $0x46c] ss:$16 sps:$4 sm:$0xff]  }
 0x2ca   :  { %5393 = vmatpush2.bf16.msra.mxu0 %v7145_v31 }
 0x2cb   :  { %5394 = vmatprep.subr.bf16.mxu0 %v7153_v40 }
 0x2ce   :  { %5395 = vmatpush2.bf16.msra.mxu0 %v7151_v33 }
 0x2cf   :  { %5396 = vmatprep.subr.bf16.mxu0 %v7159_v35 }
 0x2d2   :  { %5397 = vmatpush2.bf16.msra.mxu0 %v7157_v50  ;;  %v7205_v50 = vld [vmem:[#allocation7 + $0x468] ss:$16 sps:$4 sm:$0xff]  }
 0x2d3   :  { %5398 = vmatprep.subr.bf16.mxu0 %v7165_v36 }
 0x2d6   :  { %5399 = vmatpush2.bf16.msra.mxu0 %v7163_v38  ;;  %v7213_v38 = vld [vmem:[#allocation7 + $0x44c] ss:$16 sps:$4 sm:$0xff]  }
 0x2d7   :  { %5400 = vmatprep.subr.bf16.mxu0 %v7171_v11 }
 0x2da   :  { %5401 = vmatpush2.bf16.msra.mxu0 %v7169_v45 }
 0x2db   :  { %5402 = vmatprep.subr.bf16.mxu0 %v7177_v51 }
 0x2de   :  { %5403 = vmatpush2.bf16.msra.mxu0 %v7175_v16  ;;  %v7208_v16 = vld [vmem:[#allocation7 + $0x2c8] ss:$16 sps:$4 sm:$0xff]  }
 0x2df   :  { %5458 = vmatprep.subr.bf16.mxu0 %v7183_v53  ;;  %v7217_v53 = vld [vmem:[#allocation7 + $0x428] ss:$16 sps:$4 sm:$0xff]  }
 0x2e1   :  { %v3577_v7 = vpop.f32.mrf.mxu0  ;;  %5405 = vmatmul.mubr.bf16.vlgmr.msra.gmra.mxu0 %v7797_v22 }
 0x2e2   :  { %v3534_v58 = vpop.f32.mrf.mxu1  ;;  %5459 = vmatpush1.bf16.msra.mxu0 %v7181_v57  ;;  %5490 = vmatprep.mubr.bf16.mxu0 %v7889_v52  ;;  %v3498_v52 = vadd.f32 %v3497_v60, %v3455_v59  ;;  %v7223_v57 = vld [vmem:[#allocation7 + $0x408] ss:$16 sps:$4 sm:$0xff]   ;;  %v7231_v60 = vld [vmem:[#allocation7 + $0x5ec] ss:$16 sps:$4 sm:$0xff]  }
 0x2e3   :  { %v3579_v43 = vpop.f32.mrf.mxu0  ;;  %5460 = vmatprep.subr.bf16.mxu0 %v7189_v28  ;;  %v3535_v15 = vadd.f32 %v3534_v58, %v3492_v9  ;;  %v7220_v28 = vld [vmem:[#allocation7 + $0x288] ss:$16 sps:$4 sm:$0xff]   ;;  %v7240_v9 = vld [vmem:[#allocation7 + $0x22c] ss:$16 sps:$4 sm:$0xff]  }
 0x2e4   :  { %v3536_v0 = vpop.f32.mrf.mxu1  ;;  %v7235_v58 = vld [vmem:[#allocation7 + $0x5c8] ss:$16 sps:$4 sm:$0xff]   ;;  %v7252_v59 = vld [vmem:[#allocation7 + $0x3ec] ss:$16 sps:$4 sm:$0xff]  }
 0x2e5   :  { %v3537_v17 = vadd.f32 %v3536_v0, %v3494_v18  ;;  %v3581_v26 = vpop.f32.mrf.mxu0  ;;  %v3578_v25 = vadd.f32 %v3577_v7, %v3535_v15  ;;  %v7234_v7 = vld [vmem:[#allocation7 + $0x24c] ss:$16 sps:$4 sm:$0xff]   ;;  %v7241_v18 = vld [vmem:[#allocation7 + $0x5a8] ss:$16 sps:$4 sm:$0xff]  }
 0x2e6   :  { %v3538_v21 = vpop.f32.mrf.mxu1  ;;  %5461 = vmatpush1.bf16.msra.mxu0 %v7187_v8  ;;  %v7243_v8 = vld [vmem:[#allocation7 + $0x5ac] ss:$16 sps:$4 sm:$0xff]  }
 0x2e7   :  { %v3539_v22 = vadd.f32 %v3538_v21, %v3496_v14  ;;  %5462 = vmatprep.subr.bf16.mxu0 %v7195_v13  ;;  %v3580_v37 = vadd.f32 %v3579_v43, %v3537_v17  ;;  %v3583_v29 = vpop.f32.mrf.mxu0  ;;  %v3608_v33 = vmul.f32 0.2, %v3578_v25  ;;  %vm3592_vm14 = vcmp.gt.f32.partialorder %v3578_v25, 0.0  ;;  %v7249_v43 = vld [vmem:[#allocation7 + $0x58c] ss:$16 sps:$4 sm:$0xff]  }
 0x2e8   :  { %v3540_v47 = vpop.f32.mrf.mxu1  ;;  %v7238_v13 = vld [vmem:[#allocation7 + $0x228] ss:$16 sps:$4 sm:$0xff]   ;;  %v7246_v0 = vld [vmem:[#allocation7 + $0x20c] ss:$16 sps:$4 sm:$0xff]  }
 0x2e9   :  { %v3582_v20 = vadd.f32 %v3581_v26, %v3539_v22  ;;  %v3541_v56 = vadd.f32 %v3540_v47, %v3498_v52  ;;  %v3609_v31 = vmul.f32 0.2, %v3580_v37  ;;  %vm3593_vm13 = vcmp.gt.f32.partialorder %v3580_v37, 0.0  ;;  %v7247_v14 = vld [vmem:[#allocation7 + $0x588] ss:$16 sps:$4 sm:$0xff]  }
 0x2ea   :  { %5463 = vmatpush1.bf16.msra.mxu0 %v7193_v48  ;;  %v3624_v62 = vsel %vm3592_vm14, %v3578_v25, %v3608_v33  ;;  %v7255_v15 = vld [vmem:[#allocation7 + $0x56c] ss:$16 sps:$4 sm:$0xff]   ;;  %v7244_v17 = vld [vmem:[#allocation7 + $0x208] ss:$16 sps:$4 sm:$0xff]  }
 0x2eb   :  { %v3616_v27 = vmul.f32 0.2, %v3582_v20  ;;  %5464 = vmatprep.subr.bf16.mxu0 %v7201_v1  ;;  %vm3600_vm12 = vcmp.gt.f32.partialorder %v3582_v20, 0.0  ;;  %v3584_v40 = vadd.f32 %v3583_v29, %v3541_v56  ;;  %v3625_v42 = vsel %vm3593_vm13, %v3580_v37, %v3609_v31  ;;  %v7253_v21 = vld [vmem:[#allocation7 + $0x568] ss:$16 sps:$4 sm:$0xff]  }
 0x2ec   :  { %v7261_v48 = vld [vmem:[#allocation7 + $0x54c] ss:$16 sps:$4 sm:$0xff]   ;;  %v7250_v22 = vld [vmem:[#allocation7 + $0x3e8] ss:$16 sps:$4 sm:$0xff]  }
 0x2ed   :  { %vm3601_vm15 = vcmp.gt.f32.partialorder %v3584_v40, 0.0  ;;  %v3617_v35 = vmul.f32 0.2, %v3584_v40  ;;  %v3632_v36 = vsel %vm3600_vm12, %v3582_v20, %v3616_v27  ;;  %v7258_v26 = vld [vmem:[#allocation7 + $0x3cc] ss:$16 sps:$4 sm:$0xff]   ;;  %vm6138_vm12 = vcmask 122880  }
 0x2ee   :  { %5465 = vmatpush1.bf16.msra.mxu0 %v7199_v55  ;;  %v7905_v51 = vpack.c.bf16 %v3632_v36, %v3624_v62  ;;  %v7259_v1 = vld [vmem:[#allocation7 + $0x548] ss:$16 sps:$4 sm:$0xff]   ;;  %v7267_v52 = vld [vmem:[#allocation7 + $0x52c] ss:$16 sps:$4 sm:$0xff]  }
 0x2ef   :  { %5466 = vmatprep.subr.bf16.mxu0 %v7207_v24  ;;  %v3633_v11 = vsel %vm3601_vm15, %v3584_v40, %v3617_v35  ;;  %v7256_v37 = vld [vmem:[#allocation7 + $0x3c8] ss:$16 sps:$4 sm:$0xff]   ;;  %v7264_v47 = vld [vmem:[#allocation7 + $0x3ac] ss:$16 sps:$4 sm:$0xff]  }
 0x2f0   :  { %v7903_v45 = vpack.c.bf16 %v3633_v11, %v3625_v42  ;;  %v7265_v25 = vld [vmem:[#allocation7 + $0x528] ss:$16 sps:$4 sm:$0xff]   ;;  %v7273_v20 = vld [vmem:[#allocation7 + $0x50c] ss:$16 sps:$4 sm:$0xff]  }
 0x2f1   :  { %v7262_v56 = vld [vmem:[#allocation7 + $0x3a8] ss:$16 sps:$4 sm:$0xff]   ;;  %v7270_v55 = vld [vmem:[#allocation7 + $0x38c] ss:$16 sps:$4 sm:$0xff]  }
 0x2f2   :  { %5467 = vmatpush1.bf16.msra.mxu0 %v7205_v50  ;;  %5361 = vmatprep.mubr.bf16.mxu1 %v7903_v45  ;;  %v7271_v27 = vld [vmem:[#allocation7 + $0x508] ss:$16 sps:$4 sm:$0xff]   ;;  %v7276_v31 = vld [vmem:[#allocation7 + $0x36c] ss:$16 sps:$4 sm:$0xff]  }
 0x2f3   :  { %5468 = vmatprep.subr.bf16.mxu0 %v7213_v38  ;;  %5362 = vmatmul.mubr.bf16.vlgmr.msra.gmra.mxu1 %v7905_v51  ;;  %v7336_v29 = vld [vmem:[#allocation10 + $0x74] ss:$8 sps:$4 sm:$0xff]   ;;  %v7334_v40 = vld [vmem:[#allocation10 + $0x70] ss:$8 sps:$4 sm:$0xff]   ;;  %v7339_v33 = vld [vmem:[#allocation10 + $0x64] ss:$8 sps:$4 sm:$0xff]  }
 0x2f4   :  { %5416 = vmatpush1.bf16.msra.mxu1 %v7202_v46  ;;  %5447 = vmatprep.mubr.bf16.mxu1 %v7868_v63  ;;  %v7228_v63 = vld [vmem:[#allocation7 + $0x26c] ss:$16 sps:$4 sm:$0xff]   ;;  %v7268_v24 = vld [vmem:[#allocation7 + $0x388] ss:$16 sps:$4 sm:$0xff]  }
 0x2f5   :  { %5417 = vmatprep.subr.bf16.mxu1 %v7210_v41  ;;  %v7274_v35 = vld [vmem:[#allocation7 + $0x368] ss:$16 sps:$4 sm:$0xff]   ;;  %v7279_v50 = vld [vmem:[#allocation7 + $0x34c] ss:$16 sps:$4 sm:$0xff]  }
 0x2f6   :  { %5469 = vmatpush1.bf16.msra.mxu0 %v7211_v49  ;;  %v7337_v36 = vld [vmem:[#allocation10 + $0x60] ss:$8 sps:$4 sm:$0xff]   ;;  %v7342_v38 = vld [vmem:[#allocation10 + $0x54] ss:$8 sps:$4 sm:$0xff]   ;;  %v7340_v62 = vld [vmem:[#allocation10 + $0x50] ss:$8 sps:$4 sm:$0xff]  }
 0x2f7   :  { %5470 = vmatprep.subr.bf16.mxu0 %v7219_v54  ;;  %v7277_v42 = vld [vmem:[#allocation7 + $0x348] ss:$16 sps:$4 sm:$0xff]   ;;  %v7282_v11 = vld [vmem:[#allocation7 + $0x32c] ss:$16 sps:$4 sm:$0xff]  }
 0x2f8   :  { %5418 = vmatpush1.bf16.msra.mxu1 %v7208_v16  ;;  %v7345_v46 = vld [vmem:[#allocation10 + $0x44] ss:$8 sps:$4 sm:$0xff]   ;;  %v7285_v49 = vld [vmem:[#allocation7 + $0x30c] ss:$16 sps:$4 sm:$0xff]   ;;  %v7348_v54 = vld [vmem:[#allocation10 + $0x34] ss:$8 sps:$4 sm:$0xff]  }
 0x2f9   :  { %5419 = vmatprep.subr.bf16.mxu1 %v7216_v12  ;;  %v7280_v41 = vld [vmem:[#allocation7 + $0x328] ss:$16 sps:$4 sm:$0xff]   ;;  %v7288_v12 = vld [vmem:[#allocation7 + $0x6ec] ss:$16 sps:$4 sm:$0xff]  }
 0x2fa   :  { %5471 = vmatpush1.bf16.msra.mxu0 %v7217_v53  ;;  %v7283_v16 = vld [vmem:[#allocation7 + $0x308] ss:$16 sps:$4 sm:$0xff]   ;;  %v7346_v53 = vld [vmem:[#allocation10 + $0x30] ss:$8 sps:$4 sm:$0xff]  }
 0x2fb   :  { %5472 = vmatprep.subr.bf16.mxu0 %v7225_v19  ;;  %v7351_v19 = vld [vmem:[#allocation10 + $0x24] ss:$8 sps:$4 sm:$0xff]  }
 0x2fc   :  { %5420 = vmatpush1.bf16.msra.mxu1 %v7214_v4  ;;  %v7286_v4 = vld [vmem:[#allocation7 + $0x6e8] ss:$16 sps:$4 sm:$0xff]  }
 0x2fd   :  { %5421 = vmatprep.subr.bf16.mxu1 %v7222_v5  ;;  %v7291_v5 = vld [vmem:[#allocation7 + $0x6cc] ss:$16 sps:$4 sm:$0xff]  }
 0x2fe   :  { %5473 = vmatpush1.bf16.msra.mxu0 %v7223_v57  ;;  %v7349_v57 = vld [vmem:[#allocation10 + $0x20] ss:$8 sps:$4 sm:$0xff]  }
 0x2ff   :  { %5474 = vmatprep.subr.bf16.mxu0 %v7231_v60  ;;  %v7354_v60 = vld [vmem:[#allocation10 + $0x14] ss:$8 sps:$4 sm:$0xff]  }
 0x300   :  { %5422 = vmatpush1.bf16.msra.mxu1 %v7220_v28  ;;  %v7289_v28 = vld [vmem:[#allocation7 + $0x6c8] ss:$16 sps:$4 sm:$0xff]  }
 0x301   :  { %5423 = vmatprep.subr.bf16.mxu1 %v7228_v63  ;;  %v7294_v63 = vld [vmem:[#allocation7 + $0x6ac] ss:$16 sps:$4 sm:$0xff]  }
 0x302   :  { %5475 = vmatpush2.bf16.msra.mxu0 %v7229_v2  ;;  %v7352_v2 = vld [vmem:[#allocation10 + $0x10] ss:$8 sps:$4 sm:$0xff]  }
 0x303   :  { %5476 = vmatprep.subr.bf16.mxu0 %v7237_v44  ;;  %v7357_v44 = vld [vmem:[#allocation10 + $0x4] ss:$8 sps:$4 sm:$0xff]  }
 0x304   :  { %5424 = vmatpush1.bf16.msra.mxu1 %v7226_v6  ;;  %v7292_v6 = vld [vmem:[#allocation7 + $0x6a8] ss:$16 sps:$4 sm:$0xff]  }
 0x305   :  { %5425 = vmatprep.subr.bf16.mxu1 %v7234_v7  ;;  %v7297_v7 = vld [vmem:[#allocation7 + $0x68c] ss:$16 sps:$4 sm:$0xff]  }
 0x306   :  { %5477 = vmatpush2.bf16.msra.mxu0 %v7235_v58  ;;  %v7355_v58 = vld [vmem:[#allocation10] ss:$8 sps:$4 sm:$0xff]  }
 0x307   :  { %5478 = vmatprep.subr.bf16.mxu0 %v7243_v8  ;;  %v7360_v8 = vld [vmem:[#allocation10 + $0xf4] ss:$8 sps:$4 sm:$0xff]  }
 0x308   :  { %5426 = vmatpush1.bf16.msra.mxu1 %v7232_v61  ;;  %v7300_v61 = vld [vmem:[#allocation7 + $0x66c] ss:$16 sps:$4 sm:$0xff]  }
 0x309   :  { %5427 = vmatprep.subr.bf16.mxu1 %v7240_v9  ;;  %v7363_v9 = vld [vmem:[#allocation10 + $0xe4] ss:$8 sps:$4 sm:$0xff]  }
 0x30a   :  { %5479 = vmatpush2.bf16.msra.mxu0 %v7241_v18  ;;  %v7298_v18 = vld [vmem:[#allocation7 + $0x668] ss:$16 sps:$4 sm:$0xff]  }
 0x30b   :  { %5480 = vmatprep.subr.bf16.mxu0 %v7249_v43  ;;  %v7303_v43 = vld [vmem:[#allocation7 + $0x64c] ss:$16 sps:$4 sm:$0xff]  }
 0x30c   :  { %5428 = vmatpush1.bf16.msra.mxu1 %v7238_v13  ;;  %v7361_v13 = vld [vmem:[#allocation10 + $0xe0] ss:$8 sps:$4 sm:$0xff]  }
 0x30d   :  { %5429 = vmatprep.subr.bf16.mxu1 %v7246_v0  ;;  %v7366_v0 = vld [vmem:[#allocation10 + $0xd4] ss:$8 sps:$4 sm:$0xff]  }
 0x30e   :  { %5481 = vmatpush2.bf16.msra.mxu0 %v7247_v14  ;;  %v7301_v14 = vld [vmem:[#allocation7 + $0x648] ss:$16 sps:$4 sm:$0xff]  }
 0x30f   :  { %5482 = vmatprep.subr.bf16.mxu0 %v7255_v15  ;;  %v7306_v15 = vld [vmem:[#allocation7 + $0x62c] ss:$16 sps:$4 sm:$0xff]  }
 0x310   :  { %5430 = vmatpush1.bf16.msra.mxu1 %v7244_v17  ;;  %v7364_v17 = vld [vmem:[#allocation10 + $0xd0] ss:$8 sps:$4 sm:$0xff]  }
 0x311   :  { %5431 = vmatprep.subr.bf16.mxu1 %v7252_v59  ;;  %v7369_v59 = vld [vmem:[#allocation10 + $0xc4] ss:$8 sps:$4 sm:$0xff]  }
 0x312   :  { %5483 = vmatpush2.bf16.msra.mxu0 %v7253_v21  ;;  %v7304_v21 = vld [vmem:[#allocation7 + $0x628] ss:$16 sps:$4 sm:$0xff]  }
 0x313   :  { %5484 = vmatprep.subr.bf16.mxu0 %v7261_v48  ;;  %v7309_v48 = vld [vmem:[#allocation7 + $0x60c] ss:$16 sps:$4 sm:$0xff]  }
 0x314   :  { %5432 = vmatpush2.bf16.msra.mxu1 %v7250_v22  ;;  %v7367_v22 = vld [vmem:[#allocation10 + $0xc0] ss:$8 sps:$4 sm:$0xff]  }
 0x315   :  { %5433 = vmatprep.subr.bf16.mxu1 %v7258_v26  ;;  %v7372_v26 = vld [vmem:[#allocation10 + $0xb4] ss:$8 sps:$4 sm:$0xff]  }
 0x316   :  { %5485 = vmatpush2.bf16.msra.mxu0 %v7259_v1  ;;  %v7307_v1 = vld [vmem:[#allocation7 + $0x608] ss:$16 sps:$4 sm:$0xff]  }
 0x317   :  { %5486 = vmatprep.subr.bf16.mxu0 %v7267_v52  ;;  %v7312_v52 = vld [vmem:[#allocation7 + $0x7ec] ss:$16 sps:$4 sm:$0xff]  }
 0x318   :  { %5434 = vmatpush2.bf16.msra.mxu1 %v7256_v37  ;;  %v7370_v37 = vld [vmem:[#allocation10 + $0xb0] ss:$8 sps:$4 sm:$0xff]  }
 0x319   :  { %5435 = vmatprep.subr.bf16.mxu1 %v7264_v47  ;;  %v7375_v47 = vld [vmem:[#allocation10 + $0xa4] ss:$8 sps:$4 sm:$0xff]  }
 0x31a   :  { %5487 = vmatpush2.bf16.msra.mxu0 %v7265_v25  ;;  %v7310_v25 = vld [vmem:[#allocation7 + $0x7e8] ss:$16 sps:$4 sm:$0xff]  }
 0x31b   :  { %5488 = vmatprep.subr.bf16.mxu0 %v7273_v20  ;;  %v7315_v20 = vld [vmem:[#allocation7 + $0x7cc] ss:$16 sps:$4 sm:$0xff]  }
 0x31c   :  { %5436 = vmatpush2.bf16.msra.mxu1 %v7262_v56  ;;  %v7373_v56 = vld [vmem:[#allocation10 + $0xa0] ss:$8 sps:$4 sm:$0xff]  }
 0x31d   :  { %5437 = vmatprep.subr.bf16.mxu1 %v7270_v55  ;;  %v7378_v55 = vld [vmem:[#allocation10 + $0x94] ss:$8 sps:$4 sm:$0xff]  }
 0x31e   :  { %5489 = vmatpush2.bf16.msra.mxu0 %v7271_v27  ;;  %v7313_v27 = vld [vmem:[#allocation7 + $0x7c8] ss:$16 sps:$4 sm:$0xff]  }
 0x31f   :  { %5968 = vmatprep.subr.bf16.mxu0 %v7336_v29  ;;  %v7318_v29 = vld [vmem:[#allocation7 + $0x7ac] ss:$16 sps:$4 sm:$0xff]  }
 0x320   :  { %5438 = vmatpush2.bf16.msra.mxu1 %v7268_v24  ;;  %v7376_v24 = vld [vmem:[#allocation10 + $0x90] ss:$8 sps:$4 sm:$0xff]  }
 0x321   :  { %5491 = vmatmul.mubr.bf16.vlgmr.msra.gmra.mxu0 %v7893_v10  ;;  %5439 = vmatprep.subr.bf16.mxu1 %v7276_v31  ;;  %v7343_v10 = vld [vmem:[#allocation10 + $0x40] ss:$8 sps:$4 sm:$0xff]   ;;  %v7381_v31 = vld [vmem:[#allocation10 + $0x84] ss:$8 sps:$4 sm:$0xff]  }
 0x322   :  { %5969 = vmatpush1.bf16.msra.mxu0 %v7334_v40  ;;  %v7316_v40 = vld [vmem:[#allocation7 + $0x7a8] ss:$16 sps:$4 sm:$0xff]  }
 0x323   :  { %5970 = vmatprep.subr.bf16.mxu0 %v7339_v33  ;;  %v7321_v33 = vld [vmem:[#allocation7 + $0x78c] ss:$16 sps:$4 sm:$0xff]  }
 0x324   :  { %5440 = vmatpush2.bf16.msra.mxu1 %v7274_v35  ;;  %v7379_v35 = vld [vmem:[#allocation10 + $0x80] ss:$8 sps:$4 sm:$0xff]  }
 0x325   :  { %5441 = vmatprep.subr.bf16.mxu1 %v7279_v50  ;;  %v7319_v50 = vld [vmem:[#allocation7 + $0x788] ss:$16 sps:$4 sm:$0xff]  }
 0x326   :  { %5971 = vmatpush1.bf16.msra.mxu0 %v7337_v36  ;;  %v7324_v36 = vld [vmem:[#allocation7 + $0x76c] ss:$16 sps:$4 sm:$0xff]  }
 0x327   :  { %5972 = vmatprep.subr.bf16.mxu0 %v7342_v38  ;;  %v7322_v38 = vld [vmem:[#allocation7 + $0x768] ss:$16 sps:$4 sm:$0xff]  }
 0x328   :  { %5442 = vmatpush2.bf16.msra.mxu1 %v7277_v42  ;;  %v7327_v42 = vld [vmem:[#allocation7 + $0x74c] ss:$16 sps:$4 sm:$0xff]  }
 0x329   :  { %5443 = vmatprep.subr.bf16.mxu1 %v7282_v11  ;;  %v7325_v11 = vld [vmem:[#allocation7 + $0x748] ss:$16 sps:$4 sm:$0xff]  }
 0x32a   :  { %5973 = vmatpush1.bf16.msra.mxu0 %v7340_v62  ;;  %v7330_v62 = vld [vmem:[#allocation7 + $0x72c] ss:$16 sps:$4 sm:$0xff]  }
 0x32b   :  { %5974 = vmatprep.subr.bf16.mxu0 %v7345_v46  ;;  %v7328_v46 = vld [vmem:[#allocation7 + $0x728] ss:$16 sps:$4 sm:$0xff]  }
 0x32c   :  { %5444 = vmatpush2.bf16.msra.mxu1 %v7280_v41  ;;  %v7333_v41 = vld [vmem:[#allocation7 + $0x70c] ss:$16 sps:$4 sm:$0xff]  }
 0x32d   :  { %5445 = vmatprep.subr.bf16.mxu1 %v7285_v49  ;;  %v7331_v49 = vld [vmem:[#allocation7 + $0x708] ss:$16 sps:$4 sm:$0xff]  }
 0x32e   :  { %5975 = vmatpush1.bf16.msra.mxu0 %v7343_v10  ;;  %v7382_v10 = vld [vmem:[#allocation10 + $0x170] ss:$8 sps:$4 sm:$0xff]  }
 0x32f   :  { %5976 = vmatprep.subr.bf16.mxu0 %v7348_v54  ;;  %v7384_v54 = vld [vmem:[#allocation10 + $0x174] ss:$8 sps:$4 sm:$0xff]  }
 0x330   :  { %5446 = vmatpush2.bf16.msra.mxu1 %v7283_v16  ;;  %v7387_v16 = vld [vmem:[#allocation10 + $0x164] ss:$8 sps:$4 sm:$0xff]  }
 0x331   :  { %5501 = vmatprep.subr.bf16.mxu1 %v7288_v12  ;;  %v7385_v12 = vld [vmem:[#allocation10 + $0x160] ss:$8 sps:$4 sm:$0xff]  }
 0x332   :  { %5977 = vmatpush1.bf16.msra.mxu0 %v7346_v53  ;;  %v7390_v53 = vld [vmem:[#allocation10 + $0x154] ss:$8 sps:$4 sm:$0xff]  }
 0x333   :  { %5978 = vmatprep.subr.bf16.mxu0 %v7351_v19  ;;  %5448 = vmatmul.mubr.bf16.vlgmr.msra.gmra.mxu1 %v7846_v32  ;;  %v7295_v32 = vld [vmem:[#allocation7 + $0x688] ss:$16 sps:$4 sm:$0xff]   ;;  %v7388_v19 = vld [vmem:[#allocation10 + $0x150] ss:$8 sps:$4 sm:$0xff]  }
 0x334   :  { %5502 = vmatpush1.bf16.msra.mxu1 %v7286_v4  ;;  %5533 = vmatprep.mubr.bf16.mxu1 %v7903_v45  ;;  %v7358_v45 = vld [vmem:[#allocation10 + $0xf0] ss:$8 sps:$4 sm:$0xff]   ;;  %v7393_v4 = vld [vmem:[#allocation10 + $0x144] ss:$8 sps:$4 sm:$0xff]  }
 0x335   :  { %5503 = vmatprep.subr.bf16.mxu1 %v7291_v5  ;;  %v7391_v5 = vld [vmem:[#allocation10 + $0x140] ss:$8 sps:$4 sm:$0xff]  }
 0x336   :  { %5979 = vmatpush1.bf16.msra.mxu0 %v7349_v57  ;;  %v7396_v57 = vld [vmem:[#allocation10 + $0x134] ss:$8 sps:$4 sm:$0xff]  }
 0x337   :  { %5980 = vmatprep.subr.bf16.mxu0 %v7354_v60  ;;  %v7394_v60 = vld [vmem:[#allocation10 + $0x130] ss:$8 sps:$4 sm:$0xff]  }
 0x338   :  { %5504 = vmatpush1.bf16.msra.mxu1 %v7289_v28  ;;  %v7397_v28 = vld [vmem:[#allocation10 + $0x120] ss:$8 sps:$4 sm:$0xff]  }
 0x339   :  { %5505 = vmatprep.subr.bf16.mxu1 %v7294_v63  ;;  %v7402_v63 = vld [vmem:[#allocation10 + $0x114] ss:$8 sps:$4 sm:$0xff]  }
 0x33a   :  { %5981 = vmatpush1.bf16.msra.mxu0 %v7352_v2  ;;  %v7400_v2 = vld [vmem:[#allocation10 + $0x110] ss:$8 sps:$4 sm:$0xff]  }
 0x33b   :  { %5982 = vmatprep.subr.bf16.mxu0 %v7357_v44  ;;  %v7405_v44 = vld [vmem:[#allocation10 + $0x104] ss:$8 sps:$4 sm:$0xff]  }
 0x33c   :  { %5506 = vmatpush1.bf16.msra.mxu1 %v7292_v6  ;;  %v7403_v6 = vld [vmem:[#allocation10 + $0x100] ss:$8 sps:$4 sm:$0xff]  }
 0x33d   :  { %5507 = vmatprep.subr.bf16.mxu1 %v7297_v7  ;;  %v7408_v7 = vld [vmem:[#allocation10 + $0x1f4] ss:$8 sps:$4 sm:$0xff]  }
 0x33e   :  { %5983 = vmatpush1.bf16.msra.mxu0 %v7355_v58  ;;  %v7406_v58 = vld [vmem:[#allocation10 + $0x1f0] ss:$8 sps:$4 sm:$0xff]  }
 0x33f   :  { %5984 = vmatprep.subr.bf16.mxu0 %v7360_v8  ;;  %v7411_v8 = vld [vmem:[#allocation10 + $0x1e4] ss:$8 sps:$4 sm:$0xff]  }
 0x340   :  { %5508 = vmatpush1.bf16.msra.mxu1 %v7295_v32  ;;  %v5234_v32 = vpop.f32.mrf.mxu0 }
 0x341   :  { %5509 = vmatprep.subr.bf16.mxu1 %v7300_v61  ;;  %v7409_v61 = vld [vmem:[#allocation10 + $0x1e0] ss:$8 sps:$4 sm:$0xff]  }
 0x342   :  { %5985 = vmatpush2.bf16.msra.mxu0 %v7358_v45  ;;  %v7414_v45 = vld [vmem:[#allocation10 + $0x1d4] ss:$8 sps:$4 sm:$0xff]  }
 0x343   :  { %5986 = vmatprep.subr.bf16.mxu0 %v7363_v9  ;;  %v5236_v9 = vpop.f32.mrf.mxu0 }
 0x344   :  { %5510 = vmatpush1.bf16.msra.mxu1 %v7298_v18  ;;  %v7412_v18 = vld [vmem:[#allocation10 + $0x1d0] ss:$8 sps:$4 sm:$0xff]  }
 0x345   :  { %5511 = vmatprep.subr.bf16.mxu1 %v7303_v43  ;;  %v7417_v43 = vld [vmem:[#allocation10 + $0x1c4] ss:$8 sps:$4 sm:$0xff]  }
 0x346   :  { %5987 = vmatpush2.bf16.msra.mxu0 %v7361_v13  ;;  %v5238_v13 = vpop.f32.mrf.mxu0 }
 0x347   :  { %5988 = vmatprep.subr.bf16.mxu0 %v7366_v0  ;;  %v5277_v0 = vpop.f32.mrf.mxu1 }
 0x348   :  { %5512 = vmatpush1.bf16.msra.mxu1 %v7301_v14  ;;  %v7415_v14 = vld [vmem:[#allocation10 + $0x1c0] ss:$8 sps:$4 sm:$0xff]  }
 0x349   :  { %5513 = vmatprep.subr.bf16.mxu1 %v7306_v15  ;;  %v7420_v15 = vld [vmem:[#allocation10 + $0x1b4] ss:$8 sps:$4 sm:$0xff]  }
 0x34a   :  { %5989 = vmatpush2.bf16.msra.mxu0 %v7364_v17  ;;  %v5240_v17 = vpop.f32.mrf.mxu0 }
 0x34b   :  { %5990 = vmatprep.subr.bf16.mxu0 %v7369_v59  ;;  %v7914_v59 = vld [vmem:[#allocation8] sm:$0xf] }
 0x34c   :  { %5514 = vmatpush1.bf16.msra.mxu1 %v7304_v21  ;;  %v5279_v21 = vpop.f32.mrf.mxu1 }
 0x34d   :  { %5515 = vmatprep.subr.bf16.mxu1 %v7309_v48 }
 0x34e   :  { %5991 = vmatpush2.bf16.msra.mxu0 %v7367_v22  ;;  %v7418_v22 = vld [vmem:[#allocation10 + $0x1b0] ss:$8 sps:$4 sm:$0xff]  }
 0x34f   :  { %5992 = vmatprep.subr.bf16.mxu0 %v7372_v26  ;;  %v3907_v26 = vrot.slane %v7914_v59, %v7833_v23 }
 0x350   :  { %5516 = vmatpush1.bf16.msra.mxu1 %v7307_v1  ;;  %v3903_v1 = vrot.slane %v7914_v59, %v7757_v39 }
 0x351   :  { %5517 = vmatprep.subr.bf16.mxu1 %v7312_v52  ;;  %v5281_v52 = vpop.f32.mrf.mxu1 }
 0x352   :  { %5993 = vmatpush2.bf16.msra.mxu0 %v7370_v37 }
 0x353   :  { %5994 = vmatprep.subr.bf16.mxu0 %v7375_v47  ;;  %v5237_v47 = vadd.f32 %v5236_v9, %v3907_v26 }
 0x354   :  { %5518 = vmatpush2.bf16.msra.mxu1 %v7310_v25  ;;  %v5235_v25 = vadd.f32 %v5234_v32, %v3903_v1 }
 0x355   :  { %5519 = vmatprep.subr.bf16.mxu1 %v7315_v20  ;;  %v5239_v20 = vadd.f32 %v5238_v13, %v3903_v1  ;;  %v3911_v13 = vrot.slane %v7914_v59, %v592_v3 }
 0x356   :  { %5995 = vmatpush2.bf16.msra.mxu0 %v7373_v56  ;;  %v5283_v56 = vpop.f32.mrf.mxu1 }
 0x357   :  { %5996 = vmatprep.subr.bf16.mxu0 %v7378_v55 }
 0x358   :  { %5520 = vmatpush2.bf16.msra.mxu1 %v7313_v27  ;;  %v5280_v27 = vadd.f32 %v5279_v21, %v5237_v47 }
 0x359   :  { %5521 = vmatprep.subr.bf16.mxu1 %v7318_v29  ;;  %v5241_v29 = vadd.f32 %v5240_v17, %v3907_v26 }
 0x35a   :  { %5997 = vmatpush2.bf16.msra.mxu0 %v7376_v24  ;;  %v5278_v24 = vadd.f32 %v5277_v0, %v5235_v25 }
 0x35b   :  { %5998 = vmatprep.subr.bf16.mxu0 %v7381_v31 }
 0x35c   :  { %5522 = vmatpush2.bf16.msra.mxu1 %v7316_v40  ;;  %v5282_v40 = vadd.f32 %v5281_v52, %v5239_v20 }
 0x35d   :  { %5523 = vmatprep.subr.bf16.mxu1 %v7321_v33 }
 0x35e   :  { %5999 = vmatpush2.bf16.msra.mxu0 %v7379_v35  ;;  %v7423_v35 = vld [vmem:[#allocation10 + $0x1a4] ss:$8 sps:$4 sm:$0xff]  }
 0x360   :  { %5524 = vmatpush2.bf16.msra.mxu1 %v7319_v50 }
 0x361   :  { %5525 = vmatprep.subr.bf16.mxu1 %v7324_v36  ;;  %v5320_v48 = vpop.f32.mrf.mxu0 }
 0x362   :  { %v5321_v50 = vadd.f32 %v5320_v48, %v5278_v24 }
 0x363   :  { %v5322_v37 = vpop.f32.mrf.mxu0 }
 0x364   :  { %5526 = vmatpush2.bf16.msra.mxu1 %v7322_v38  ;;  %v5323_v33 = vadd.f32 %v5322_v37, %v5280_v27 }
 0x365   :  { %5527 = vmatprep.subr.bf16.mxu1 %v7327_v42  ;;  %v5324_v55 = vpop.f32.mrf.mxu0  ;;  %v7421_v42 = vld [vmem:[#allocation10 + $0x1a0] ss:$8 sps:$4 sm:$0xff]  }
 0x367   :  { %v5326_v36 = vpop.f32.mrf.mxu0 }
 0x368   :  { %5528 = vmatpush2.bf16.msra.mxu1 %v7325_v11  ;;  %v5284_v11 = vadd.f32 %v5283_v56, %v5241_v29 }
 0x369   :  { %5529 = vmatprep.subr.bf16.mxu1 %v7330_v62  ;;  %v5325_v62 = vadd.f32 %v5324_v55, %v5282_v40 }
 0x36c   :  { %5530 = vmatpush2.bf16.msra.mxu1 %v7328_v46 }
 0x36d   :  { %5531 = vmatprep.subr.bf16.mxu1 %v7333_v41 }
 0x370   :  { %5532 = vmatpush2.bf16.msra.mxu1 %v7331_v49 }
 0x371   :  { %6011 = vmatprep.subr.bf16.mxu1 %v7384_v54 }
 0x373   :  { %5534 = vmatmul.mubr.bf16.vlgmr.msra.gmra.mxu1 %v7905_v51  ;;  %v7399_v51 = vld [vmem:[#allocation10 + $0x124] ss:$8 sps:$4 sm:$0xff]  }
 0x374   :  { %6012 = vmatpush1.bf16.msra.mxu1 %v7382_v10  ;;  %v5327_v10 = vadd.f32 %v5326_v36, %v5284_v11 }
 0x375   :  { %6013 = vmatprep.subr.bf16.mxu1 %v7387_v16  ;;  %v7426_v16 = vld [vmem:[#allocation10 + $0x194] ss:$8 sps:$4 sm:$0xff]  }
 0x378   :  { %6014 = vmatpush1.bf16.msra.mxu1 %v7385_v12 }
 0x379   :  { %6015 = vmatprep.subr.bf16.mxu1 %v7390_v53  ;;  %v7424_v53 = vld [vmem:[#allocation10 + $0x190] ss:$8 sps:$4 sm:$0xff]  }
 0x37c   :  { %6016 = vmatpush1.bf16.msra.mxu1 %v7388_v19 }
 0x37d   :  { %6017 = vmatprep.subr.bf16.mxu1 %v7393_v4 }
 0x380   :  { %6018 = vmatpush1.bf16.msra.mxu1 %v7391_v5 }
 0x381   :  { %6019 = vmatprep.subr.bf16.mxu1 %v7396_v57 }
 0x384   :  { %6020 = vmatpush1.bf16.msra.mxu1 %v7394_v60 }
 0x385   :  { %6021 = vmatprep.subr.bf16.mxu1 %v7399_v51  ;;  %v7429_v51 = vld [vmem:[#allocation10 + $0x184] ss:$8 sps:$4 sm:$0xff]  }
 0x388   :  { %6022 = vmatpush1.bf16.msra.mxu1 %v7397_v28 }
 0x389   :  { %6023 = vmatprep.subr.bf16.mxu1 %v7402_v63  ;;  %v7427_v63 = vld [vmem:[#allocation10 + $0x180] ss:$8 sps:$4 sm:$0xff]  }
 0x38c   :  { %6024 = vmatpush1.bf16.msra.mxu1 %v7400_v2 }
 0x38d   :  { %6025 = vmatprep.subr.bf16.mxu1 %v7405_v44 }
 0x390   :  { %6026 = vmatpush1.bf16.msra.mxu1 %v7403_v6 }
 0x391   :  { %6027 = vmatprep.subr.bf16.mxu1 %v7408_v7 }
 0x394   :  { %6028 = vmatpush2.bf16.msra.mxu1 %v7406_v58 }
 0x395   :  { %6029 = vmatprep.subr.bf16.mxu1 %v7411_v8 }
 0x398   :  { %6030 = vmatpush2.bf16.msra.mxu1 %v7409_v61 }
 0x399   :  { %6031 = vmatprep.subr.bf16.mxu1 %v7414_v45 }
 0x39c   :  { %6032 = vmatpush2.bf16.msra.mxu1 %v7412_v18 }
 0x39d   :  { %6033 = vmatprep.subr.bf16.mxu1 %v7417_v43  ;;  %v3915_v43 = vrot.slane %v7914_v59, %v596_v34 }
 0x3a0   :  { %6034 = vmatpush2.bf16.msra.mxu1 %v7415_v14 }
 0x3a1   :  { %6035 = vmatprep.subr.bf16.mxu1 %v7420_v15  ;;  %v5406_v8 = vpop.f32.mrf.mxu0 }
 0x3a2   :  { %v5407_v17 = vadd.f32 %v5406_v8, %v3911_v13 }
 0x3a3   :  { %v5408_v32 = vpop.f32.mrf.mxu0 }
 0x3a4   :  { %6036 = vmatpush2.bf16.msra.mxu1 %v7418_v22  ;;  %v5409_v15 = vadd.f32 %v5408_v32, %v3915_v43 }
 0x3a5   :  { %6037 = vmatprep.subr.bf16.mxu1 %v7423_v35  ;;  %v5410_v61 = vpop.f32.mrf.mxu0 }
 0x3a6   :  { %v5411_v48 = vadd.f32 %v5410_v61, %v3911_v13 }
 0x3a7   :  { %v5412_v9 = vpop.f32.mrf.mxu0 }
 0x3a8   :  { %6038 = vmatpush2.bf16.msra.mxu1 %v7421_v42  ;;  %v5413_v52 = vadd.f32 %v5412_v9, %v3915_v43 }
 0x3a9   :  { %6039 = vmatprep.subr.bf16.mxu1 %v7426_v16 }
 0x3ac   :  { %6040 = vmatpush2.bf16.msra.mxu1 %v7424_v53  ;;  %v5636_v53 = vld [vmem:[#allocation11] sm:$0x3] }
 0x3ad   :  { %6041 = vmatprep.subr.bf16.mxu1 %v7429_v51 }
 0x3b0   :  { %6042 = vmatpush2.bf16.msra.mxu1 %v7427_v63 }
 0x3b3   :  { %v5363_v31 = vpop.f32.mrf.mxu1 }
 0x3b4   :  { %v5364_v41 = vadd.f32 %v5363_v31, %v5321_v50 }
 0x3b5   :  { %v5365_v38 = vpop.f32.mrf.mxu1 }
 0x3b6   :  { %v5366_v46 = vadd.f32 %v5365_v38, %v5323_v33  ;;  %v5552_v57 = vmul.f32 0.2, %v5364_v41  ;;  %vm5544_vm2 = vcmp.gt.f32.partialorder %v5364_v41, 0.0 }
 0x3b7   :  { %v5367_v49 = vpop.f32.mrf.mxu1 }
 0x3b8   :  { %v5368_v54 = vadd.f32 %v5367_v49, %v5325_v62  ;;  %v5553_v19 = vmul.f32 0.2, %v5366_v46  ;;  %vm5545_vm1 = vcmp.gt.f32.partialorder %v5366_v46, 0.0  ;;  %v5560_v6 = vsel %vm5544_vm2, %v5364_v41, %v5552_v57 }
 0x3b9   :  { %v5369_v12 = vpop.f32.mrf.mxu1 }
 0x3ba   :  { %vm5548_vm0 = vcmp.gt.f32.partialorder %v5368_v54, 0.0  ;;  %v5556_v4 = vmul.f32 0.2, %v5368_v54  ;;  %v5370_v5 = vadd.f32 %v5369_v12, %v5327_v10  ;;  %v5561_v2 = vsel %vm5545_vm1, %v5366_v46, %v5553_v19  ;;  %v7432_v10 = vld [vmem:[#allocation13 + $0x4] ss:$8 sps:$4 sm:$0xff]  }
 0x3bb   :  { %v5645_v19 = vrot.slane %v5636_v53, %v7833_v23 }
 0x3bc   :  { %vm5549_vm3 = vcmp.gt.f32.partialorder %v5370_v5, 0.0  ;;  %v5557_v60 = vmul.f32 0.2, %v5370_v5  ;;  %v5564_v28 = vsel %vm5548_vm0, %v5368_v54, %v5556_v4  ;;  %v6120_v54 = vld [vmem:[#allocation2] sm:$0x1]  ;;  %v5641_v4 = vrot.slane %v5636_v53, %v7757_v39 }
 0x3bd   :  { %v5568_v58 = vpack.c.bf16 %v5564_v28, %v5560_v6  ;;  %6123 = vperm.xlu0 %6939, %v6120_v54  }
 0x3be   :  { %v5565_v44 = vsel %vm5549_vm3, %v5370_v5, %v5557_v60 }
 0x3bf   :  { %v5569_v7 = vpack.c.bf16 %v5565_v44, %v5561_v2 }
 0x3c1   :  { %6000 = vmatprep.mubr.bf16.mxu0 %v5569_v7 }
 0x3c2   :  { %6001 = vmatmul.mubr.bf16.vlgmr.msra.gmra.mxu0 %v5568_v58 }
 0x3c3   :  { %6112 = vmatprep.mubr.bf16.mxu0 %v7432_v10 }
 0x3e1   :  { %v5492_v0 = vpop.f32.mrf.mxu0 }
 0x3e3   :  { %v5494_v21 = vpop.f32.mrf.mxu0 }
 0x3e5   :  { %v5496_v47 = vpop.f32.mrf.mxu0 }
 0x3e7   :  { %v5498_v3 = vpop.f32.mrf.mxu0 }
 0x3f3   :  { %v5449_v45 = vpop.f32.mrf.mxu1 }
 0x3f4   :  { %v5450_v26 = vadd.f32 %v5449_v45, %v5407_v17 }
 0x3f5   :  { %v5451_v18 = vpop.f32.mrf.mxu1 }
 0x3f6   :  { %v5452_v22 = vadd.f32 %v5451_v18, %v5409_v15  ;;  %v5493_v34 = vadd.f32 %v5492_v0, %v5450_v26 }
 0x3f7   :  { %v5453_v14 = vpop.f32.mrf.mxu1 }
 0x3f8   :  { %v5454_v37 = vadd.f32 %v5453_v14, %v5411_v48  ;;  %v5495_v56 = vadd.f32 %v5494_v21, %v5452_v22  ;;  %v7430_v21 = vld [vmem:[#allocation13] ss:$8 sps:$4 sm:$0xff]  }
 0x3f9   :  { %v5455_v1 = vpop.f32.mrf.mxu1 }
 0x3fa   :  { %v5456_v20 = vadd.f32 %v5455_v1, %v5413_v52  ;;  %v5497_v27 = vadd.f32 %v5496_v47, %v5454_v37 }
 0x3fc   :  { %v5499_v31 = vadd.f32 %v5498_v3, %v5456_v20 }
 0x433   :  { %v5535_v25 = vpop.f32.mrf.mxu1 }
 0x434   :  { %v5536_v59 = vadd.f32 %v5535_v25, %v5493_v34 }
 0x435   :  { %v5537_v55 = vpop.f32.mrf.mxu1 }
 0x436   :  { %v5538_v30 = vadd.f32 %v5537_v55, %v5495_v56  ;;  %v5554_v36 = vmul.f32 0.2, %v5536_v59  ;;  %vm5546_vm6 = vcmp.gt.f32.partialorder %v5536_v59, 0.0 }
 0x437   :  { %v5539_v29 = vpop.f32.mrf.mxu1 }
 0x438   :  { %v5540_v24 = vadd.f32 %v5539_v29, %v5497_v27  ;;  %v5555_v33 = vmul.f32 0.2, %v5538_v30  ;;  %vm5547_vm5 = vcmp.gt.f32.partialorder %v5538_v30, 0.0  ;;  %v5562_v46 = vsel %vm5546_vm6, %v5536_v59, %v5554_v36  ;;  %v6124_v48 = vpop.permute.xlu0 %6123 }
 0x439   :  { %v5541_v40 = vpop.f32.mrf.mxu1  ;;  %v6129_v22 = vrot.slane %v6124_v48, %v7757_v39 }
 0x43a   :  { %vm5550_vm4 = vcmp.gt.f32.partialorder %v5540_v24, 0.0  ;;  %v5558_v35 = vmul.f32 0.2, %v5540_v24  ;;  %v5542_v50 = vadd.f32 %v5541_v40, %v5499_v31  ;;  %v5563_v11 = vsel %vm5547_vm5, %v5538_v30, %v5555_v33 }
 0x43c   :  { %vm5551_vm7 = vcmp.gt.f32.partialorder %v5542_v50, 0.0  ;;  %v5559_v38 = vmul.f32 0.2, %v5542_v50  ;;  %v5566_v42 = vsel %vm5550_vm4, %v5540_v24, %v5558_v35 }
 0x43d   :  { %v5570_v49 = vpack.c.bf16 %v5566_v42, %v5562_v46 }
 0x43e   :  { %v5567_v62 = vsel %vm5551_vm7, %v5542_v50, %v5559_v38 }
 0x43f   :  { %v5571_v41 = vpack.c.bf16 %v5567_v62, %v5563_v11 }
 0x441   :  { %6043 = vmatprep.mubr.bf16.mxu1 %v5571_v41 }
 0x442   :  { %6044 = vmatmul.mubr.bf16.vlgmr.msra.gmra.mxu1 %v5570_v49 }
 0x482   :  { %v6002_v16 = vpop.f32.mrf.mxu0 }
 0x483   :  { %v6003_v51 = vadd.f32 %v6002_v16, %v5641_v4 }
 0x484   :  { %v6004_v12 = vpop.f32.mrf.mxu0 }
 0x485   :  { %v6005_v60 = vadd.f32 %v6004_v12, %v5645_v19 }
 0x486   :  { %v6006_v5 = vpop.f32.mrf.mxu0 }
 0x487   :  { %v6007_v2 = vadd.f32 %v6006_v5, %v5641_v4 }
 0x488   :  { %v6008_v28 = vpop.f32.mrf.mxu0 }
 0x489   :  { %v6009_v58 = vadd.f32 %v6008_v28, %v5645_v19 }
 0x502   :  { %v6045_v57 = vpop.f32.mrf.mxu1 }
 0x503   :  { %v6046_v6 = vadd.f32 %v6045_v57, %v6003_v51 }
 0x504   :  { %v6047_v63 = vpop.f32.mrf.mxu1 }
 0x505   :  { %v6048_v44 = vadd.f32 %v6047_v63, %v6005_v60  ;;  %v6058_v23 = vmul.f32 0.2, %v6046_v6  ;;  %vm6054_vm10 = vcmp.gt.f32.partialorder %v6046_v6, 0.0 }
 0x506   :  { %v6049_v7 = vpop.f32.mrf.mxu1 }
 0x507   :  { %v6050_v8 = vadd.f32 %v6049_v7, %v6007_v2  ;;  %v6059_v61 = vmul.f32 0.2, %v6048_v44  ;;  %vm6055_vm9 = vcmp.gt.f32.partialorder %v6048_v44, 0.0  ;;  %v6062_v14 = vsel %vm6054_vm10, %v6046_v6, %v6058_v23 }
 0x508   :  { %v6051_v32 = vpop.f32.mrf.mxu1 }
 0x509   :  { %vm6056_vm8 = vcmp.gt.f32.partialorder %v6050_v8, 0.0  ;;  %v6060_v45 = vmul.f32 0.2, %v6050_v8  ;;  %v6052_v9 = vadd.f32 %v6051_v32, %v6009_v58  ;;  %v6063_v13 = vsel %vm6055_vm9, %v6048_v44, %v6059_v61 }
 0x50b   :  { %vm6057_vm11 = vcmp.gt.f32.partialorder %v6052_v9, 0.0  ;;  %v6061_v18 = vmul.f32 0.2, %v6052_v9  ;;  %v6064_v43 = vsel %vm6056_vm8, %v6050_v8, %v6060_v45 }
 0x50c   :  { %v6068_v17 = vpack.c.bf16 %v6064_v43, %v6062_v14 }
 0x50d   :  { %v6065_v0 = vsel %vm6057_vm11, %v6052_v9, %v6061_v18 }
 0x50e   :  { %v6069_v15 = vpack.c.bf16 %v6065_v0, %v6063_v13 }
 0x510   :  { %6094 = vmatprep.subr.bf16.mxu0 %v6069_v15 }
 0x511   :  { %6095 = vmatpush1.bf16.xpose.msra.mxu0 %v6068_v17 }
 0x518   :  { %6113 = vmatmul.mubr.bf16.vlgmr.msra.gmra.mxu0 %v7430_v21 }
 0x5d8   :  { %v6114_v26 = vpop.f32.mrf.mxu0 }
 0x5d9   :  { %v6130_v1 = vadd.f32 %v6129_v22, %v6114_v26 }
 0x5da   :  { %v6116_v52 = vpop.f32.mrf.mxu0 }
 0x5db   :  { %v6131_v37 = vsub.f32 0.0, %v6130_v1 }
 0x5dc   :  { %v6117_v47 = vpop.f32.mrf.mxu0 }
 0x5dd   :  { %v6132_v25 = vmul.f32 1.442695, %v6131_v37 }
 0x5de   :  { %v6118_v20 = vpop.f32.mrf.mxu0 }
 0x5df   :  { %7433 = vpow2.f32 %v6132_v25 }
 0x5ec   :  { %v7434_v56 = vpop.eup %7433 }
 0x5ed   :  { %v6134_v34 = vadd.f32 1.0, %v7434_v56 }
 0x5ef   :  { %7435 = vrcp.f32 %v6134_v34 }
 0x5fc   :  { %v7436_v55 = vpop.eup %7435 }
 0x5fd   :  { %v6136_v30 = vmax.f32 %v7436_v55, 0.0 }
 0x5ff   :  { %v6137_v27 = vmin.f32 %v6136_v30, 1.0 }
 0x601   :  { %6139 = vst.msk [vmem:[%s7941_s9] sm:$0x1] %vm6138_vm12, %v6137_v27 }
 0x602   :  { %6144 = vsyncpa [#allocation4], 1 }
 0x603   :  { %6145 = vsyncpa [#allocation6], 1 }
 0x604   :  { %6146 = vsyncpa [#allocation9], 1 }
 0x605   :  { %6147 = vsyncpa [#allocation12], 1 }

</bundles_post_ra>
